<compile_context>
chip_gen: v6e
topology: v6e:2x2x1
jax: 0.10.0
libtpu: 0.0.40
codegen_flags: <defaults>
</compile_context>

<pallas_src>
import jax
import jax.numpy as jnp
from jax import lax
from jax.experimental import pallas as pl
from jax.experimental.pallas import tpu as pltpu


# ----------------------------- Pallas kernel -------------------------------
def _head_kernel(x_ref, w_ref, b_ref, o_ref):
    # x_ref: (1, C, tl) f32   w_ref: (C, F) bf16   b_ref: (1, F) f32
    # o_ref: (1, tl, F) f32
    x = x_ref[0].astype(jnp.bfloat16)                     # (C, tl) bf16
    # Transposed-LHS contraction: (C, tl) x (C, F) -> (tl, F), f32 accumulate.
    y = lax.dot_general(
        x, w_ref[...],
        dimension_numbers=(((0,), (0,)), ((), ())),
        preferred_element_type=jnp.float32,
    )
    y = y + b_ref[...]                                    # broadcast (1, F)
    # Numerically stable softplus (matches torch.nn.Softplus to ~2e-9).
    sp = jnp.maximum(y, 0.0) + jnp.log1p(jnp.exp(-jnp.abs(y)))
    o_ref[0] = sp.astype(o_ref.dtype)


def _pick_tile(L, tl_req):
    """Pick an L-tile satisfying TPU layout rules (multiple of 128, or == L)
    and dividing the (possibly padded) length.  Returns (tile, padded_L)."""
    if L <= tl_req:
        return L, L                        # single full tile along L
    t = (tl_req // 128) * 128
    while t >= 128:
        if L % t == 0:
            return t, L                    # exact divisor, no padding needed
        t -= 128
    t = max(128, (tl_req // 128) * 128)    # no divisor: pad L up to a multiple
    Lp = ((L + t - 1) // t) * t
    return t, Lp


def _linear_softplus(x_cf, w, b, *, tl=512):
    """x_cf: (B, C, L) f32 channels-first, w: (C, F) bf16, b: (1, F) f32
       -> (B, L, F) f32 == softplus(rearrange(x,'b c l -> b l c') @ W + b)."""
    B, C, L = x_cf.shape
    F = w.shape[1]

    # Shrink the requested tile if the rough VMEM estimate (double-buffered x
    # and out tiles + bf16 weights) exceeds a conservative budget -- v7x only
    # has 64 MiB of VMEM (32 MiB scoped by default).
    tl_req = max(128, tl)
    while tl_req > 128:
        vmem_est = 2 * tl_req * C * 4 + 2 * tl_req * F * 4 + C * F * 2
        if vmem_est <= (24 << 20):
            break
        tl_req //= 2
    tl, Lp = _pick_tile(L, tl_req)

    if Lp != L:
        x_cf = jnp.pad(x_cf, ((0, 0), (0, 0), (0, Lp - L)))

    out = pl.pallas_call(
        _head_kernel,
        out_shape=jax.ShapeDtypeStruct((B, Lp, F), jnp.float32),
        grid_spec=pltpu.PrefetchScalarGridSpec(
            num_scalar_prefetch=0,
            grid=(B, Lp // tl),
            in_specs=[
                pl.BlockSpec((1, C, tl), lambda bi, li: (bi, 0, li)),
                pl.BlockSpec((C, F), lambda bi, li: (0, 0)),
                pl.BlockSpec((1, F), lambda bi, li: (0, 0)),
            ],
            out_specs=pl.BlockSpec((1, tl, F), lambda bi, li: (bi, li, 0)),
        ),
        compiler_params=pltpu.CompilerParams(
            dimension_semantics=("parallel", "parallel")
        ),
    )(x_cf, w, b)

    if Lp != L:
        out = out[:, :L, :]
    return out


# ----------------------------- Module wrapper -------------------------------
class OutputHeadsPallas:
    """JAX/Pallas equivalent of the PyTorch OutputHeads module."""

    IN_FEATURES = 1536

    def __init__(self, output_heads: dict, key):
        self.params = {}
        self._slices = {}
        ws, bs = [], []
        off = 0
        bound = 1.0 / float(self.IN_FEATURES) ** 0.5
        for name, features in output_heads.items():
            key, kw, kb = jax.random.split(key, 3)
            # PyTorch nn.Linear default init: U(-1/sqrt(fan_in), 1/sqrt(fan_in))
            w = jax.random.uniform(
                kw, (self.IN_FEATURES, features), jnp.float32, -bound, bound
            )
            b = jax.random.uniform(kb, (1, features), jnp.float32, -bound, bound)
            w_bf16 = w.astype(jnp.bfloat16)   # bf16 MXU inputs, f32 accumulation
            self.params[name] = (w_bf16, b)
            ws.append(w_bf16)
            bs.append(b)
            self._slices[name] = (off, off + features)
            off += features
        # Fused weights so all heads can be computed with one matmul.
        self._w_all = jnp.concatenate(ws, axis=1)
        self._b_all = jnp.concatenate(bs, axis=1)

    def __call__(self, x, head, *, tl=512):
        # x: (B, C=1536, L) channels-first.  The 'b c l -> b l c' rearrange is
        # fused into the kernel (no HBM transpose pass).
        w, b = self.params[head]
        return _linear_softplus(x.astype(jnp.float32), w, b, tl=tl)

    def all_heads(self, x, *, tl=512):
        """Evaluate every head with a single fused (C, sum F) matmul; the
        activation tensor is streamed from HBM only once."""
        out = _linear_softplus(
            x.astype(jnp.float32), self._w_all, self._b_all, tl=tl
        )
        return {name: out[..., s:e] for name, (s, e) in self._slices.items()}


# --------------------------------- main -------------------------------------
if __name__ == "__main__":
    key = jax.random.PRNGKey(0)
    key, kx = jax.random.split(key)

    B, C, L = 2, 1536, 256          # C fixed at 1536 by the module definition
    heads = {"human": 128, "mouse": 256}

    model = OutputHeadsPallas(heads, key)
    x = jax.random.normal(kx, (B, C, L), jnp.float32)

    # Per-head path (matches OutputHeads.forward(x, head)).
    out_human = jax.block_until_ready(model(x, "human"))          # one full L tile
    out_mouse = jax.block_until_ready(model(x, "mouse", tl=128))  # exercises tiled-L grid

    # Fused path: all heads from one matmul, x read from HBM once.
    fused = model.all_heads(x)
    fused = {k: jax.block_until_ready(v) for k, v in fused.items()}

    # Reference (same math as torch Linear + Softplus, with the bf16 weights).
    def ref(x_cf, w, b):
        w32 = w.astype(jnp.float32)
        y = jnp.einsum("bcl,cf->blf", x_cf, w32) + b[0]
        return jnp.maximum(y, 0.0) + jnp.log1p(jnp.exp(-jnp.abs(y)))

    ref_h = ref(x, *model.params["human"])
    ref_m = ref(x, *model.params["mouse"])

    assert out_human.shape == (B, L, heads["human"])
    assert out_mouse.shape == (B, L, heads["mouse"])
    # bf16 MXU inputs with f32 accumulation -> loose tolerance vs f32 reference.
    assert jnp.allclose(out_human, ref_h, atol=3e-2, rtol=3e-2)
    assert jnp.allclose(out_mouse, ref_m, atol=3e-2, rtol=3e-2)
    # Fused heads must agree with the per-head results (same math, same weights).
    assert jnp.allclose(fused["human"], out_human, atol=1e-5, rtol=1e-5)
    assert jnp.allclose(fused["mouse"], out_mouse, atol=1e-5, rtol=1e-5)

    print("KERNEL_OK")
</pallas_src>

<mosaic_0001>
module attributes {stable_mosaic.version = 11 : i64} {
  func.func @_head_kernel(%arg0: i32, %arg1: i32, %arg2: memref<1x1536x256xf32, #tpu.memory_space<vmem>>, %arg3: memref<1536x128xbf16, #tpu.memory_space<vmem>>, %arg4: memref<1x128xf32, #tpu.memory_space<vmem>>, %arg5: memref<1x256x128xf32, #tpu.memory_space<vmem>>) attributes {dimension_semantics = [#tpu.dimension_semantics<parallel>, #tpu.dimension_semantics<parallel>], iteration_bounds = array<i64: 2, 1>, scalar_prefetch = 0 : i64, scratch_operands = 0 : i64, tpu.core_type = #tpu.core_type<tc>, window_params = [{transform_indices = @transform_0, window_bounds = array<i64: 1, 1536, 256>}, {pipeline_mode = #tpu.pipeline_mode<synchronous>, transform_indices = @transform_1, window_bounds = array<i64: 1536, 128>}, {pipeline_mode = #tpu.pipeline_mode<synchronous>, transform_indices = @transform_2, window_bounds = array<i64: 1, 128>}, {transform_indices = @transform_3, window_bounds = array<i64: 1, 256, 128>}]} {
    %c0 = arith.constant 0 : index
    %c0_0 = arith.constant 0 : index
    %c0_1 = arith.constant 0 : index
    %0 = vector.load %arg2[%c0, %c0_0, %c0_1] : memref<1x1536x256xf32, #tpu.memory_space<vmem>>, vector<1x1536x256xf32>
    %1 = vector.shape_cast %0 : vector<1x1536x256xf32> to vector<1536x256xf32>
    %2 = arith.truncf %1 : vector<1536x256xf32> to vector<1536x256xbf16>
    %c0_2 = arith.constant 0 : index
    %c0_3 = arith.constant 0 : index
    %3 = vector.load %arg3[%c0_2, %c0_3] : memref<1536x128xbf16, #tpu.memory_space<vmem>>, vector<1536x128xbf16>
    %cst = arith.constant dense<0.000000e+00> : vector<256x128xf32>
    %4 = tpu.matmul %2, %3, %cst {dimension_numbers = #tpu.dot_dimension_numbers<[0], [0], [1], [1], [0, 1, 1, 1], [], []>} : vector<1536x256xbf16>, vector<1536x128xbf16>, vector<256x128xf32> -> vector<256x128xf32>
    %c0_4 = arith.constant 0 : index
    %c0_5 = arith.constant 0 : index
    %5 = vector.load %arg4[%c0_4, %c0_5] : memref<1x128xf32, #tpu.memory_space<vmem>>, vector<1x128xf32>
    %6 = vector.broadcast %5 : vector<1x128xf32> to vector<256x128xf32>
    %7 = arith.addf %4, %6 : vector<256x128xf32>
    %cst_6 = arith.constant 0.000000e+00 : f32
    %8 = vector.broadcast %cst_6 : f32 to vector<256x128xf32>
    %9 = arith.maximumf %7, %8 : vector<256x128xf32>
    %10 = math.absf %7 : vector<256x128xf32>
    %cst_7 = arith.constant 0.000000e+00 : f32
    %11 = vector.broadcast %cst_7 : f32 to vector<256x128xf32>
    %12 = arith.subf %11, %10 : vector<256x128xf32>
    %13 = math.exp %12 : vector<256x128xf32>
    %14 = math.log1p %13 : vector<256x128xf32>
    %15 = arith.addf %9, %14 : vector<256x128xf32>
    %c0_8 = arith.constant 0 : index
    %c0_9 = arith.constant 0 : index
    %c0_10 = arith.constant 0 : index
    %16 = vector.load %arg5[%c0_8, %c0_9, %c0_10] : memref<1x256x128xf32, #tpu.memory_space<vmem>>, vector<1x256x128xf32>
    %17 = vector.shape_cast %16 : vector<1x256x128xf32> to vector<256x128xf32>
    %18 = vector.shape_cast %15 : vector<256x128xf32> to vector<1x256x128xf32>
    tpu.vector_store %arg5[%c0_8, %c0_9, %c0_10], %18 {strides = array<i32>} : memref<1x256x128xf32, #tpu.memory_space<vmem>>, vector<1x256x128xf32>,
    return
  }
  func.func @transform_0(%arg0: i32, %arg1: i32) -> (i32, i32, i32) {
    %c0_i32 = arith.constant 0 : i32
    %c0_i32_0 = arith.constant 0 : i32
    return %arg0, %c0_i32, %arg1 : i32, i32, i32
  }
  func.func @transform_1(%arg0: i32, %arg1: i32) -> (i32, i32) {
    %c0_i32 = arith.constant 0 : i32
    %c0_i32_0 = arith.constant 0 : i32
    %c0_i32_1 = arith.constant 0 : i32
    return %c0_i32, %c0_i32_0 : i32, i32
  }
  func.func @transform_2(%arg0: i32, %arg1: i32) -> (i32, i32) {
    %c0_i32 = arith.constant 0 : i32
    %c0_i32_0 = arith.constant 0 : i32
    %c0_i32_1 = arith.constant 0 : i32
    return %c0_i32, %c0_i32_0 : i32, i32
  }
  func.func @transform_3(%arg0: i32, %arg1: i32) -> (i32, i32, i32) {
    %c0_i32 = arith.constant 0 : i32
    %c0_i32_0 = arith.constant 0 : i32
    return %arg0, %arg1, %c0_i32 : i32, i32, i32
  }
}

</mosaic_0001>

<bundles_post_ra>
// kernel: tpu_custom_call.1
= control target key start
LH: loop header
LB: loop body
LE: loop exit
PB: predicated region body
PF: predicated region fallthrough
CT: control target
= control target key end

     0   :  { %8 = vsyncpa [#allocation3], 0  ;;  %s6672_s0 = inlined_call_operand.hbm [shape: f32[2,1536,256], index: 0, kind: input, shape index: {}]   ;;  %s6673_s1 = inlined_call_operand.hbm [shape: bf16[1536,128], index: 1, kind: input, shape index: {}]   ;;  %s6674_s2 = inlined_call_operand.hbm [shape: f32[1,128], index: 2, kind: input, shape index: {}]   ;;  %s6675_s3 = inlined_call_operand.hbm [shape: f32[2,256,128], index: 3, kind: output, shape index: {}]  }
   0x1   :  { %10 = vsyncpa [#allocation3 + $0x1], 0 }
   0x2   :  { %11 = vsyncpa [#allocation6], 0 }
   0x3   :  { %12 = vsyncpa [#allocation4], 0 }
   0x4   :  { %14 = vsyncpa [#allocation4 + $0x1], 0  ;;  %s4870_s12 = smov 0   ;;  %s4872_s13 = smov 0  }
   0x5   :  { %s4874_s14 = smov 0   ;;  %s4876_s15 = smov 0  }
   0x6   :  { %s4878_s16 = smov 0   ;;  %s4880_s17 = smov 0  }
   0x7 LB: > { %s3572_s18 = sadd.s32 4294967295, %s4838_s17   ;;  %s3573_s19 = sadd.s32 4294967294, %s4838_s17   ;;  %s4838_s17 = sphi %s4880_s17, %s20_s17   ;;  %s4834_s16 = sphi %s4878_s16, %s6728_s16   ;;  %s4830_s15 = sphi %s4876_s15, %s6727_s15   ;;  %s4826_s14 = sphi %s4874_s14, %s6726_s14   ;;  %s4822_s13 = sphi %s4872_s13, %s6725_s13   ;;  %s4818_s12 = sphi %s4870_s12, %s6724_s12  }
   0x8   : > { %p54_p0 = scmp.ne.s32.totalorder %s4822_s13, %s4818_s12  ;;  %p4904_p1 = scmp.eq.s32.totalorder %s3572_s18, 0 }
   0x9   : > { %p4908_p2 = scmp.eq.s32.totalorder %s3572_s18, 1  ;;  %p128_p3 = scmp.eq.s32.totalorder %s3573_s19, 1 }
   0xa   : > { %s6678_s20 = scalar_select %p4904_p1, 1, 0 }
   0xb   : > { %p4914_p4 = por %p4904_p1, %p54_p0  ;;  %p3574_p5 = scmp.ge.s32.totalorder %s4838_s17, 1 }
   0xc   : > { %p4919_p6 = por %p128_p3, %p54_p0  ;;  %p135_p7 = scmp.lt.s32.totalorder %s4838_s17, 3 }
   0xd   : > { %s4840_s25 = smov [#allocation5]   ;;  %s4841_s28 = smov [#allocation7]  }
   0xe   : > { %s6681_s23 = scalar_select %p4919_p6, 1, 0 }
   0xf   : > { %p4924_p8 = pnand %p3574_p5, %p135_p7  ;;  %s147_s26 = sshll.u32 %s4840_s25, 4  ;;  %s148_s26 = int_to_ptr.vmem [resolvable:$true] %s147_s26 }
  0x10   : > { %s161_s29 = sshll.u32 %s4841_s28, 4  ;;  %s4685_s30 = scalar_lea.vmem %s148_s26, 12288  ;;  %s162_s29 = int_to_ptr.vmem [resolvable:$true] %s161_s29 }
  0x11   : > { %p4373_p9 = pneg %p4924_p8  ;;  %p4686_p13 = scmp.ne.s32.totalorder %s148_s26, %s4685_s30 }
  0x12   : > { %p4693_p5 = scmp.lt.s32.totalorder %s148_s26, %s148_s26  ;;  %p4694_p7 = scmp.lt.s32.totalorder %s4685_s30, %s4685_s30 }
  0x13   : > { %p4933_p11 = pnand %p4373_p9, %p4904_p1 }
  0x14   : > { %p4695_p10 = por %p4694_p7, %p4693_p5 }
  0x15   : > { %p4676_p12 = pneg %p4933_p11 }
  0x17   : > { %p4688_p0 = pnand %p4686_p13, %p4676_p12 }
  0x19   : > { %p4689_p3 = pneg %p4688_p0 }
  0x1b   : > { %p4696_p9 = pnand %p4695_p10, %p4689_p3 }
  0x1d   : > { %4699 = shalt.err (!%p4696_p9)
}
  0x1e   : > { %s4842_s4 = smov 64   ;;  %s4843_s5 = smov 4  }
  0x1f   : > { %4376 = dma.hbm_to_vmem [thread:$0]  (!%p4933_p11), %s6673_s1, 12288, %s148_s26, [#allocation6], %s4842_s4, %s4842_s4, %s4843_s5  }
  0x20   : > { %s4711_s8 = scalar_lea.vmem %s162_s29, 16  ;;  %s4718_s9 = scalar_lea.vmem %s162_s29, 32 }
  0x21   : > { %p4712_p6 = scmp.ne.s32.totalorder %s162_s29, %s4711_s8  ;;  %p4719_p1 = scmp.lt.s32.totalorder %s162_s29, %s162_s29 }
  0x22   : > { %p4720_p5 = scmp.lt.s32.totalorder %s4718_s9, %s4711_s8 }
  0x23   : > { %p4714_p13 = pnand %p4712_p6, %p4676_p12 }
  0x24   : > { %p4721_p10 = por %p4720_p5, %p4719_p1 }
  0x25   : > { %p4715_p0 = pneg %p4714_p13 }
  0x27   : > { %p4722_p3 = pnand %p4721_p10, %p4715_p0 }
  0x29   : > { %4725 = shalt.err (!%p4722_p3)
}
  0x2a   : > { %4379 = dma.hbm_to_vmem [thread:$0]  (!%p4933_p11), %s6674_s2, 16, %s162_s29, [#allocation6]  }
  0x2b   : > { %s32_s18 = sadd.s32 1, %s4834_s16  ;;  %s41_s19 = sadd.s32 1, %s4826_s14 }
  0x2c   : > { %p34_p1 = scmp.ge.s32.totalorder %s32_s18, 2  ;;  %p48_p6 = scmp.ne.s32.totalorder %s4826_s14, %s4822_s13 }
  0x2d   : > { %p49_p12 = scmp.eq.s32.totalorder %s4838_s17, 0  ;;  %p4390_p7 = scmp.lt.s32.totalorder %s4838_s17, 2 }
  0x2e   : > { %s6730_s18 = smov (%p34_p1, %s32_s18), 0  ;;  %p4965_p13 = por %p4908_p2, %p48_p6 }
  0x2f   : > { %p50_p9 = por %p49_p12, %p48_p6  ;;  %s36_s26 = ssub.s32 %s4834_s16, %s6730_s18 }
  0x30   : > { %s172_s27 = sand.u32 1, %s4826_s14   ;;  %p39_p0 = scmp.eq.s32.totalorder %s36_s26, 0 }
  0x31   : > { %s4358_s28 = smul.u32 3072, %s172_s27  ;;  %p4972_p11 = pnand %p4390_p7, %p50_p9 }
  0x32   : > { %s4977_s30 = scalar_select %p39_p0, %s4826_s14, %s41_s19  }
  0x33   : > { %s4359_s4 = smul.u32 49152, %s4834_s16  ;;  %s176_s5 = scalar_lea.vmem [#allocation2], %s4358_s28 }
  0x34   : > { %s185_s6 = sshll.u32 %s176_s5, 4  ;;  %s173_s9 = scalar_lea.sflag [#allocation3], %s172_s27  ;;  %s186_s6 = int_to_ptr.vmem [resolvable:$true] %s185_s6 }
  0x35   : > { %s184_s8 = scalar_lea.hbm %s6672_s0, %s4359_s4  ;;  %p4728_p2 = pneg %p4972_p11 }
  0x36   : > { %s4739_s10 = scalar_lea.vmem %s186_s6, 49152  ;;  %s4844_s11 = smov [#allocation2]  }
  0x37   : > { %p4740_p5 = scmp.ne.s32.totalorder %s186_s6, %s4739_s10  ;;  %s4744_s26 = sshll.u32 %s4844_s11, 4  ;;  %s4745_s26 = int_to_ptr.vmem [resolvable:$false] %s4744_s26 }
  0x38   : > { %s4746_s19 = scalar_lea.vmem %s4745_s26, 98304  ;;  %p4747_p1 = scmp.lt.s32.totalorder %s186_s6, %s4745_s26 }
  0x39   : > { %p4742_p10 = pnand %p4740_p5, %p4728_p2  ;;  %p4748_p6 = scmp.lt.s32.totalorder %s4746_s19, %s4739_s10 }
  0x3b   : > { %p4743_p3 = pneg %p4742_p10  ;;  %p4749_p12 = por %p4748_p6, %p4747_p1 }
  0x3d   : > { %p4750_p7 = pnand %p4749_p12, %p4743_p3 }
  0x3f   : > { %4753 = shalt.err (!%p4750_p7)
}
  0x40   : > { %s4845_s28 = smov 256   ;;  %s4846_s4 = smov 16  }
  0x41   : > { %4383 = dma.hbm_to_vmem [thread:$0]  (!%p4972_p11), %s184_s8, 49152, %s186_s6, %s173_s9, %s4845_s28, %s4845_s28, %s4846_s4  }
  0x42   : > { %197 = sbr.rel (%p4924_p8) target bundleno = 863 (0x35f), region = 32 }
  0x47   : > { %s4990_s27 = sand.u32 1, %s4822_s13  }
  0x48   : > { %s4360_s5 = smul.u32 3072, %s4990_s27  ;;  %s200_s7 = scalar_lea.sflag [#allocation3], %s4990_s27 }
  0x4a   : > { %s4994_s21 = scalar_lea.vmem [#allocation2], %s4360_s5 }
  0x4b   : > { %4805 = dma.done.wait (%p4914_p4), %s200_s7, 49152  }
  0x4c   : > { %4807 = vsyncadd (%p4914_p4), %s200_s7, 4294918144  ;;  %p6686_p9 = scmp.ne.s32.totalorder %s6678_s20, 0 }
  0x4e   : > { %4809 = dma.done.wait (%p6686_p9), [#allocation6], 12304  }
  0x4f   : > { %4811 = vsyncadd (%p6686_p9), [#allocation6], 4294954992  ;;  %v269_v0 = vld [vmem:[%s4994_s21 + $0x100] sm:$0xff]  ;;  %v271_v1 = vld [vmem:[%s4994_s21 + $0x110] sm:$0xff]  ;;  %s3582_s20 = sshll.u32 %s4990_s27, 8  ;;  %s3685_s24 = sshll.u32 %s4830_s15, 12 }
  0x50   : > { %v237_v2 = vld [vmem:[%s4994_s21] sm:$0xff]  ;;  %v637_v3 = vpack.c.bf16 %v271_v1, %v269_v0  ;;  %v239_v4 = vld [vmem:[%s4994_s21 + $0x10] sm:$0xff]  ;;  %v4450_v42 = vld [vmem:[#allocation5 + $0x78] sm:$0xff]   ;;  %s6091_s22 = scalar_lea.vmem [#allocation8], %s3582_s20  ;;  %s6621_s9 = scalar_lea.hbm %s6675_s3, %s3685_s24 }
  0x51   : > { %v273_v5 = vld [vmem:[%s4994_s21 + $0x120] sm:$0xff]  ;;  %v275_v6 = vld [vmem:[%s4994_s21 + $0x130] sm:$0xff]  ;;  %v621_v7 = vpack.c.bf16 %v239_v4, %v237_v2  ;;  %3686 = vmatprep.subr.bf16.mxu0 %v4450_v42  ;;  %v4451_v47 = vld [vmem:[#allocation5 + $0x38] sm:$0xff]   ;;  %s3466_s29 = sshll.u32 %s6091_s22, 4  ;;  %s3451_s15 = scalar_lea.sflag [#allocation4], %s4990_s27  ;;  %s6623_s29 = int_to_ptr.vmem [resolvable:$true] %s3466_s29 }
  0x52   : > { %v241_v8 = vld [vmem:[%s4994_s21 + $0x20] sm:$0xff]  ;;  %v243_v9 = vld [vmem:[%s4994_s21 + $0x30] sm:$0xff]  ;;  %1044 = vxpose.xlu0.c.b16.start [1/8] %v637_v3, 128  ;;  %v639_v10 = vpack.c.bf16 %v275_v6, %v273_v5  ;;  %3687 = vmatpush3.bf16.msra.mxu0 %v4451_v47  ;;  %v4454_v57 = vld [vmem:[#allocation5 + $0x68] sm:$0xff]   ;;  %s4754_s10 = scalar_lea.vmem %s6623_s29, 4096  ;;  %s4847_s11 = smov [#allocation8]  }
  0x53   : > { %1012 = vxpose.xlu1.c.b16.start [1/8] %v621_v7, 128  ;;  %v623_v11 = vpack.c.bf16 %v243_v9, %v241_v8  ;;  %v277_v12 = vld [vmem:[%s4994_s21 + $0x140] sm:$0xff]  ;;  %v279_v13 = vld [vmem:[%s4994_s21 + $0x150] sm:$0xff]  ;;  %v4455_v59 = vld [vmem:[#allocation5 + $0x28] sm:$0xff]   ;;  %p4755_p4 = scmp.ne.s32.totalorder %s6623_s29, %s4754_s10  ;;  %s4758_s26 = sshll.u32 %s4847_s11, 4  ;;  %s4759_s26 = int_to_ptr.vmem [resolvable:$false] %s4758_s26 }
  0x54   : > { %v245_v14 = vld [vmem:[%s4994_s21 + $0x40] sm:$0xff]  ;;  %v247_v15 = vld [vmem:[%s4994_s21 + $0x50] sm:$0xff]  ;;  %v641_v16 = vpack.c.bf16 %v279_v13, %v277_v12  ;;  %v4458_v6 = vld [vmem:[#allocation5 + $0x58] sm:$0xff]   ;;  %s4760_s19 = scalar_lea.vmem %s4759_s26, 8192  ;;  %p4761_p11 = scmp.lt.s32.totalorder %s6623_s29, %s4759_s26 }
  0x55   : > { %v625_v17 = vpack.c.bf16 %v247_v15, %v245_v14  ;;  %v281_v18 = vld [vmem:[%s4994_s21 + $0x160] sm:$0xff]  ;;  %v283_v19 = vld [vmem:[%s4994_s21 + $0x170] sm:$0xff]  ;;  %p4756_p8 = pnand %p4755_p4, %p4965_p13  ;;  %p4762_p2 = scmp.lt.s32.totalorder %s4760_s19, %s4754_s10 }
  0x56   : > { %1045 = vxpose.xlu0.c.b16.cont [2/8] %v639_v10, 128  ;;  %v249_v20 = vld [vmem:[%s4994_s21 + $0x60] sm:$0xff]  ;;  %v251_v21 = vld [vmem:[%s4994_s21 + $0x70] sm:$0xff]  ;;  %v643_v22 = vpack.c.bf16 %v283_v19, %v281_v18 }
  0x57   : > { %1013 = vxpose.xlu1.c.b16.cont [2/8] %v623_v11, 128  ;;  %v627_v23 = vpack.c.bf16 %v251_v21, %v249_v20  ;;  %v285_v24 = vld [vmem:[%s4994_s21 + $0x180] sm:$0xff]  ;;  %v287_v25 = vld [vmem:[%s4994_s21 + $0x190] sm:$0xff]  ;;  %v4459_v11 = vld [vmem:[#allocation5 + $0x18] sm:$0xff]   ;;  %p4757_p0 = pneg %p4756_p8  ;;  %p4763_p5 = por %p4762_p2, %p4761_p11 }
  0x58   : > { %v253_v26 = vld [vmem:[%s4994_s21 + $0x80] sm:$0xff]  ;;  %v255_v27 = vld [vmem:[%s4994_s21 + $0x90] sm:$0xff]  ;;  %v645_v28 = vpack.c.bf16 %v287_v25, %v285_v24 }
  0x59   : > { %v629_v29 = vpack.c.bf16 %v255_v27, %v253_v26  ;;  %v289_v30 = vld [vmem:[%s4994_s21 + $0x1a0] sm:$0xff]  ;;  %v291_v31 = vld [vmem:[%s4994_s21 + $0x1b0] sm:$0xff]  ;;  %p4764_p10 = pnand %p4763_p5, %p4757_p0 }
  0x5a   : > { %1046 = vxpose.xlu0.c.b16.cont [3/8] %v641_v16, 128  ;;  %v257_v32 = vld [vmem:[%s4994_s21 + $0xa0] sm:$0xff]  ;;  %v259_v33 = vld [vmem:[%s4994_s21 + $0xb0] sm:$0xff]  ;;  %v647_v34 = vpack.c.bf16 %v291_v31, %v289_v30 }
  0x5b   : > { %1014 = vxpose.xlu1.c.b16.cont [3/8] %v625_v17, 128  ;;  %v631_v35 = vpack.c.bf16 %v259_v33, %v257_v32  ;;  %v293_v36 = vld [vmem:[%s4994_s21 + $0x1c0] sm:$0xff]  ;;  %v295_v37 = vld [vmem:[%s4994_s21 + $0x1d0] sm:$0xff] }
  0x5c   : > { %v261_v38 = vld [vmem:[%s4994_s21 + $0xc0] sm:$0xff]  ;;  %v263_v39 = vld [vmem:[%s4994_s21 + $0xd0] sm:$0xff]  ;;  %v649_v40 = vpack.c.bf16 %v295_v37, %v293_v36 }
  0x5d   : > { %v297_v41 = vld [vmem:[%s4994_s21 + $0x1e0] sm:$0xff]  ;;  %v633_v43 = vpack.c.bf16 %v263_v39, %v261_v38  ;;  %v299_v44 = vld [vmem:[%s4994_s21 + $0x1f0] sm:$0xff]  ;;  %v4467_v38 = vld [vmem:[#allocation5 + $0xb8] sm:$0xff]  }
  0x5e   : > { %1047 = vxpose.xlu0.c.b16.cont [4/8] %v643_v22, 128  ;;  %v265_v45 = vld [vmem:[%s4994_s21 + $0xe0] sm:$0xff]  ;;  %v267_v46 = vld [vmem:[%s4994_s21 + $0xf0] sm:$0xff]  ;;  %v651_v49 = vpack.c.bf16 %v299_v44, %v297_v41  ;;  %v4462_v22 = vld [vmem:[#allocation5 + $0x48] sm:$0xff]  }
  0x5f   : > { %1015 = vxpose.xlu1.c.b16.cont [4/8] %v627_v23, 128  ;;  %v4452_v48 = vld [vmem:[#allocation5 + $0x70] sm:$0xff]   ;;  %v333_v50 = vld [vmem:[%s4994_s21 + $0x300] sm:$0xff]  ;;  %v635_v52 = vpack.c.bf16 %v267_v46, %v265_v45 }
  0x60   : > { %v335_v51 = vld [vmem:[%s4994_s21 + $0x310] sm:$0xff]  ;;  %v301_v53 = vld [vmem:[%s4994_s21 + $0x200] sm:$0xff]  ;;  %3688 = vmatprep.subr.bf16.mxu0 %v4452_v48 }
  0x61   : > { %v4453_v54 = vld [vmem:[#allocation5 + $0x30] sm:$0xff]   ;;  %v337_v56 = vld [vmem:[%s4994_s21 + $0x320] sm:$0xff]  ;;  %v669_v58 = vpack.c.bf16 %v335_v51, %v333_v50  ;;  %v270_v51 = vld [vmem:[%s4994_s21 + $0x108] sm:$0xff] }
  0x62   : > { %1048 = vxpose.xlu0.c.b16.cont [5/8] %v645_v28, 128  ;;  %v303_v55 = vld [vmem:[%s4994_s21 + $0x210] sm:$0xff]  ;;  %3689 = vmatpush3.bf16.msra.mxu0 %v4453_v54  ;;  %v305_v62 = vld [vmem:[%s4994_s21 + $0x220] sm:$0xff]  ;;  %v4463_v28 = vld [vmem:[#allocation5 + $0x8] sm:$0xff]  }
  0x63   : > { %1016 = vxpose.xlu1.c.b16.cont [5/8] %v629_v29, 128  ;;  %v653_v60 = vpack.c.bf16 %v303_v55, %v301_v53  ;;  %v339_v61 = vld [vmem:[%s4994_s21 + $0x330] sm:$0xff]  ;;  %3690 = vmatprep.subr.bf16.mxu0 %v4454_v57  ;;  %v4456_v0 = vld [vmem:[#allocation5 + $0x60] sm:$0xff]   ;;  %v272_v54 = vld [vmem:[%s4994_s21 + $0x118] sm:$0xff] }
  0x64   : > { %v307_v63 = vld [vmem:[%s4994_s21 + $0x230] sm:$0xff]  ;;  %v671_v1 = vpack.c.bf16 %v339_v61, %v337_v56  ;;  %v341_v2 = vld [vmem:[%s4994_s21 + $0x340] sm:$0xff]  ;;  %v238_v57 = vld [vmem:[%s4994_s21 + $0x8] sm:$0xff] }
  0x65   : > { %v343_v3 = vld [vmem:[%s4994_s21 + $0x350] sm:$0xff]  ;;  %v4457_v4 = vld [vmem:[#allocation5 + $0x20] sm:$0xff]   ;;  %v655_v5 = vpack.c.bf16 %v307_v63, %v305_v62  ;;  %v4474_v61 = vld [vmem:[#allocation5 + $0xd8] sm:$0xff]  }
  0x66   : > { %1049 = vxpose.xlu0.c.b16.cont [6/8] %v647_v34, 128  ;;  %3691 = vmatpush3.bf16.msra.mxu0 %v4455_v59  ;;  %v309_v7 = vld [vmem:[%s4994_s21 + $0x240] sm:$0xff]  ;;  %v311_v8 = vld [vmem:[%s4994_s21 + $0x250] sm:$0xff]  ;;  %v673_v10 = vpack.c.bf16 %v343_v3, %v341_v2  ;;  %v4466_v34 = vld [vmem:[#allocation5 + $0xf8] sm:$0xff]  }
  0x67   : > { %1017 = vxpose.xlu1.c.b16.cont [6/8] %v631_v35, 128  ;;  %3692 = vmatprep.subr.bf16.mxu0 %v4456_v0  ;;  %v345_v9 = vld [vmem:[%s4994_s21 + $0x360] sm:$0xff]  ;;  %v657_v12 = vpack.c.bf16 %v311_v8, %v309_v7  ;;  %v347_v13 = vld [vmem:[%s4994_s21 + $0x370] sm:$0xff]  ;;  %v274_v63 = vld [vmem:[%s4994_s21 + $0x128] sm:$0xff] }
  0x68   : > { %v313_v14 = vld [vmem:[%s4994_s21 + $0x260] sm:$0xff]  ;;  %v4460_v15 = vld [vmem:[#allocation5 + $0x50] sm:$0xff]   ;;  %v675_v18 = vpack.c.bf16 %v347_v13, %v345_v9  ;;  %3798 = vmatprep.subr.bf16.mxu1 %v4466_v34  ;;  %v276_v0 = vld [vmem:[%s4994_s21 + $0x138] sm:$0xff] }
  0x69   : > { %v315_v16 = vld [vmem:[%s4994_s21 + $0x270] sm:$0xff]  ;;  %v349_v17 = vld [vmem:[%s4994_s21 + $0x380] sm:$0xff]  ;;  %3799 = vmatpush3.bf16.msra.mxu1 %v4467_v38  ;;  %v244_v2 = vld [vmem:[%s4994_s21 + $0x38] sm:$0xff] }
  0x6a   : > { %1050 = vxpose.xlu0.c.b16.cont [7/8] %v649_v40, 128  ;;  %3693 = vmatpush3.bf16.msra.mxu0 %v4457_v4  ;;  %v351_v19 = vld [vmem:[%s4994_s21 + $0x390] sm:$0xff]  ;;  %v659_v21 = vpack.c.bf16 %v315_v16, %v313_v14  ;;  %v317_v23 = vld [vmem:[%s4994_s21 + $0x280] sm:$0xff]  ;;  %v4475_v3 = vld [vmem:[#allocation5 + $0x98] sm:$0xff]   ;;  %v640_v4 = vpack.c.bf16 %v276_v0, %v274_v63 }
  0x6b   : > { %1018 = vxpose.xlu1.c.b16.cont [7/8] %v633_v43, 128  ;;  %3694 = vmatprep.subr.bf16.mxu0 %v4458_v6  ;;  %v4461_v20 = vld [vmem:[#allocation5 + $0x10] sm:$0xff]   ;;  %v353_v25 = vld [vmem:[%s4994_s21 + $0x3a0] sm:$0xff]  ;;  %v677_v26 = vpack.c.bf16 %v351_v19, %v349_v17  ;;  %v278_v7 = vld [vmem:[%s4994_s21 + $0x148] sm:$0xff] }
  0x6c   : > { %v319_v24 = vld [vmem:[%s4994_s21 + $0x290] sm:$0xff]  ;;  %v321_v30 = vld [vmem:[%s4994_s21 + $0x2a0] sm:$0xff]  ;;  %v280_v8 = vld [vmem:[%s4994_s21 + $0x158] sm:$0xff] }
  0x6d   : > { %v355_v27 = vld [vmem:[%s4994_s21 + $0x3b0] sm:$0xff]  ;;  %v661_v29 = vpack.c.bf16 %v319_v24, %v317_v23  ;;  %v4464_v31 = vld [vmem:[#allocation5 + $0x40] sm:$0xff]   ;;  %v246_v9 = vld [vmem:[%s4994_s21 + $0x48] sm:$0xff] }
  0x6e   : > { %1051 = vxpose.xlu0.c.b16.end [8/8] %v651_v49, 128  ;;  %3695 = vmatpush3.bf16.msra.mxu0 %v4459_v11  ;;  %v323_v32 = vld [vmem:[%s4994_s21 + $0x2b0] sm:$0xff]  ;;  %v357_v33 = vld [vmem:[%s4994_s21 + $0x3c0] sm:$0xff]  ;;  %v679_v35 = vpack.c.bf16 %v355_v27, %v353_v25  ;;  %v4470_v49 = vld [vmem:[#allocation5 + $0xe8] sm:$0xff]  }
  0x6f   : > { %1019 = vxpose.xlu1.c.b16.end [8/8] %v635_v52, 128  ;;  %3696 = vmatprep.subr.bf16.mxu0 %v4460_v15  ;;  %v359_v36 = vld [vmem:[%s4994_s21 + $0x3d0] sm:$0xff]  ;;  %v4465_v37 = vld [vmem:[#allocation5] sm:$0xff]   ;;  %v663_v39 = vpack.c.bf16 %v323_v32, %v321_v30  ;;  %v4471_v52 = vld [vmem:[#allocation5 + $0xa8] sm:$0xff]  }
  0x70   : > { %v325_v40 = vld [vmem:[%s4994_s21 + $0x2c0] sm:$0xff]  ;;  %v327_v41 = vld [vmem:[%s4994_s21 + $0x2d0] sm:$0xff]  ;;  %v681_v44 = vpack.c.bf16 %v359_v36, %v357_v33  ;;  %v282_v13 = vld [vmem:[%s4994_s21 + $0x168] sm:$0xff] }
  0x71   : > { %v4468_v42 = vld [vmem:[#allocation5 + $0xf0] sm:$0xff]   ;;  %v361_v45 = vld [vmem:[%s4994_s21 + $0x3e0] sm:$0xff]  ;;  %v665_v48 = vpack.c.bf16 %v327_v41, %v325_v40  ;;  %v4478_v14 = vld [vmem:[#allocation5 + $0xc8] sm:$0xff]  }
  0x72   : > { %1108 = vxpose.xlu0.c.b16.start [1/8] %v669_v58, 128  ;;  %3697 = vmatpush3.bf16.msra.mxu0 %v4461_v20  ;;  %v4469_v43 = vld [vmem:[#allocation5 + $0xb0] sm:$0xff]   ;;  %v329_v47 = vld [vmem:[%s4994_s21 + $0x2e0] sm:$0xff]  ;;  %v240_v58 = vld [vmem:[%s4994_s21 + $0x18] sm:$0xff] }
  0x73   : > { %1076 = vxpose.xlu1.c.b16.start [1/8] %v653_v60, 128  ;;  %3698 = vmatprep.subr.bf16.mxu0 %v4462_v22  ;;  %v363_v46 = vld [vmem:[%s4994_s21 + $0x3f0] sm:$0xff]  ;;  %v4472_v56 = vld [vmem:[#allocation5 + $0xe0] sm:$0xff]   ;;  %v638_v60 = vpack.c.bf16 %v272_v54, %v270_v51  ;;  %v622_v62 = vpack.c.bf16 %v240_v58, %v238_v57  ;;  %v284_v16 = vld [vmem:[%s4994_s21 + $0x178] sm:$0xff] }
  0x74   : > { %3800 = vmatprep.subr.bf16.mxu1 %v4468_v42  ;;  %v331_v50 = vld [vmem:[%s4994_s21 + $0x2f0] sm:$0xff]  ;;  %v683_v53 = vpack.c.bf16 %v363_v46, %v361_v45  ;;  %v4473_v59 = vld [vmem:[#allocation5 + $0xa0] sm:$0xff]   ;;  %v250_v17 = vld [vmem:[%s4994_s21 + $0x68] sm:$0xff] }
  0x75   : > { %3801 = vmatpush3.bf16.msra.mxu1 %v4469_v43  ;;  %v667_v55 = vpack.c.bf16 %v331_v50, %v329_v47  ;;  %v4477_v11 = vld [vmem:[#allocation5 + $0x90] sm:$0xff]   ;;  %v286_v19 = vld [vmem:[%s4994_s21 + $0x188] sm:$0xff]  ;;  %v4480_v22 = vld [vmem:[#allocation5 + $0xc0] sm:$0xff]  }
  0x76   : > { %1109 = vxpose.xlu0.c.b16.cont [2/8] %v671_v1, 128  ;;  %3699 = vmatpush3.bf16.msra.mxu0 %v4463_v28  ;;  %v242_v1 = vld [vmem:[%s4994_s21 + $0x28] sm:$0xff]  ;;  %v288_v24 = vld [vmem:[%s4994_s21 + $0x198] sm:$0xff]  ;;  %v4481_v28 = vld [vmem:[#allocation5 + $0x80] sm:$0xff]  }
  0x77   : > { %1077 = vxpose.xlu1.c.b16.cont [2/8] %v655_v5, 128  ;;  %3700 = vmatprep.subr.bf16.mxu0 %v4464_v31  ;;  %v4476_v5 = vld [vmem:[#allocation5 + $0xd0] sm:$0xff]   ;;  %v624_v6 = vpack.c.bf16 %v244_v2, %v242_v1  ;;  %v4479_v20 = vld [vmem:[#allocation5 + $0x88] sm:$0xff]   ;;  %v256_v27 = vld [vmem:[%s4994_s21 + $0x98] sm:$0xff] }
  0x78   : > { %3802 = vmatprep.subr.bf16.mxu1 %v4470_v49  ;;  %v254_v25 = vld [vmem:[%s4994_s21 + $0x88] sm:$0xff]  ;;  %v4484_v30 = vld [vmem:[#allocation5 + $0x1f8] sm:$0xff]  }
  0x79   : > { %3803 = vmatpush3.bf16.msra.mxu1 %v4471_v52  ;;  %v630_v31 = vpack.c.bf16 %v256_v27, %v254_v25  ;;  %v290_v32 = vld [vmem:[%s4994_s21 + $0x1a8] sm:$0xff]  ;;  %v292_v33 = vld [vmem:[%s4994_s21 + $0x1b8] sm:$0xff]  ;;  %v4494_v25 = vld [vmem:[#allocation5 + $0x160] sm:$0xff]  }
  0x7a   : > { %1110 = vxpose.xlu0.c.b16.cont [3/8] %v673_v10, 128  ;;  %3701 = vmatpush3.bf16.msra.mxu0 %v4465_v37  ;;  %v248_v10 = vld [vmem:[%s4994_s21 + $0x58] sm:$0xff]  ;;  %v258_v34 = vld [vmem:[%s4994_s21 + $0xa8] sm:$0xff]  ;;  %v648_v36 = vpack.c.bf16 %v292_v33, %v290_v32  ;;  %v4495_v33 = vld [vmem:[#allocation5 + $0x120] sm:$0xff]  }
  0x7b   : > { %1078 = vxpose.xlu1.c.b16.cont [3/8] %v657_v12, 128  ;;  %3804 = vmatprep.subr.bf16.mxu1 %v4472_v56  ;;  %v642_v12 = vpack.c.bf16 %v280_v8, %v278_v7  ;;  %v626_v15 = vpack.c.bf16 %v248_v10, %v246_v9  ;;  %v294_v38 = vld [vmem:[%s4994_s21 + $0x1c8] sm:$0xff]  ;;  %v264_v41 = vld [vmem:[%s4994_s21 + $0xd8] sm:$0xff] }
  0x7c   : > { %v262_v40 = vld [vmem:[%s4994_s21 + $0xc8] sm:$0xff]  ;;  %v300_v45 = vld [vmem:[%s4994_s21 + $0x1f8] sm:$0xff] }
  0x7d   : > { %3805 = vmatpush3.bf16.msra.mxu1 %v4473_v59  ;;  %v634_v43 = vpack.c.bf16 %v264_v41, %v262_v40  ;;  %v266_v46 = vld [vmem:[%s4994_s21 + $0xe8] sm:$0xff]  ;;  %v268_v47 = vld [vmem:[%s4994_s21 + $0xf8] sm:$0xff] }
  0x7e   : > { %1111 = vxpose.xlu0.c.b16.cont [4/8] %v675_v18, 128  ;;  %3806 = vmatprep.subr.bf16.mxu1 %v4474_v61  ;;  %v252_v18 = vld [vmem:[%s4994_s21 + $0x78] sm:$0xff]  ;;  %v636_v49 = vpack.c.bf16 %v268_v47, %v266_v46  ;;  %v334_v50 = vld [vmem:[%s4994_s21 + $0x308] sm:$0xff] }
  0x7f   : > { %1079 = vxpose.xlu1.c.b16.cont [4/8] %v659_v21, 128  ;;  %v644_v21 = vpack.c.bf16 %v284_v16, %v282_v13  ;;  %v628_v23 = vpack.c.bf16 %v252_v18, %v250_v17  ;;  %v336_v51 = vld [vmem:[%s4994_s21 + $0x318] sm:$0xff]  ;;  %v302_v52 = vld [vmem:[%s4994_s21 + $0x208] sm:$0xff] }
  0x80   : > { %v670_v54 = vpack.c.bf16 %v336_v51, %v334_v50  ;;  %v340_v57 = vld [vmem:[%s4994_s21 + $0x338] sm:$0xff]  ;;  %v306_v58 = vld [vmem:[%s4994_s21 + $0x228] sm:$0xff] }
  0x81   : > { %3807 = vmatpush3.bf16.msra.mxu1 %v4475_v3  ;;  %v308_v59 = vld [vmem:[%s4994_s21 + $0x238] sm:$0xff]  ;;  %v310_v2 = vld [vmem:[%s4994_s21 + $0x248] sm:$0xff] }
  0x82   : > { %1112 = vxpose.xlu0.c.b16.cont [5/8] %v677_v26, 128  ;;  %3808 = vmatprep.subr.bf16.mxu1 %v4476_v5  ;;  %v4482_v26 = vld [vmem:[#allocation5 + $0x178] sm:$0xff]   ;;  %v656_v61 = vpack.c.bf16 %v308_v59, %v306_v58  ;;  %v314_v9 = vld [vmem:[%s4994_s21 + $0x268] sm:$0xff]  ;;  %v4503_v58 = vld [vmem:[#allocation5 + $0x110] sm:$0xff]  }
  0x83   : > { %1080 = vxpose.xlu1.c.b16.cont [5/8] %v661_v29, 128  ;;  %3910 = vmatprep.subr.bf16.mxu0 %v4482_v26  ;;  %v646_v29 = vpack.c.bf16 %v288_v24, %v286_v19  ;;  %v344_v63 = vld [vmem:[%s4994_s21 + $0x358] sm:$0xff]  ;;  %v350_v18 = vld [vmem:[%s4994_s21 + $0x388] sm:$0xff] }
  0x84   : > { %v4483_v0 = vld [vmem:[#allocation5 + $0x138] sm:$0xff]   ;;  %v354_v27 = vld [vmem:[%s4994_s21 + $0x3a8] sm:$0xff] }
  0x85   : > { %3809 = vmatpush3.bf16.msra.mxu1 %v4477_v11  ;;  %v312_v3 = vld [vmem:[%s4994_s21 + $0x258] sm:$0xff]  ;;  %v326_v40 = vld [vmem:[%s4994_s21 + $0x2c8] sm:$0xff] }
  0x86   : > { %1113 = vxpose.xlu0.c.b16.cont [6/8] %v679_v35, 128  ;;  %3810 = vmatprep.subr.bf16.mxu1 %v4478_v14  ;;  %v260_v35 = vld [vmem:[%s4994_s21 + $0xb8] sm:$0xff]  ;;  %v658_v11 = vpack.c.bf16 %v312_v3, %v310_v2  ;;  %v4490_v14 = vld [vmem:[#allocation5 + $0x168] sm:$0xff]   ;;  %v403_v2 = vld [vmem:[%s4994_s21 + $0x530] sm:$0xff] }
  0x87   : > { %1081 = vxpose.xlu1.c.b16.cont [6/8] %v663_v39, 128  ;;  %v632_v37 = vpack.c.bf16 %v260_v35, %v258_v34  ;;  %v296_v39 = vld [vmem:[%s4994_s21 + $0x1d8] sm:$0xff]  ;;  %v362_v47 = vld [vmem:[%s4994_s21 + $0x3e8] sm:$0xff] }
  0x88   : > { %v650_v42 = vpack.c.bf16 %v296_v39, %v294_v38  ;;  %v348_v8 = vld [vmem:[%s4994_s21 + $0x378] sm:$0xff]  ;;  %v330_v50 = vld [vmem:[%s4994_s21 + $0x2e8] sm:$0xff] }
  0x89   : > { %3811 = vmatpush3.bf16.msra.mxu1 %v4479_v20  ;;  %v316_v10 = vld [vmem:[%s4994_s21 + $0x278] sm:$0xff] }
  0x8a   : > { %1114 = vxpose.xlu0.c.b16.cont [7/8] %v681_v44, 128  ;;  %3812 = vmatprep.subr.bf16.mxu1 %v4480_v22  ;;  %v298_v44 = vld [vmem:[%s4994_s21 + $0x1e8] sm:$0xff]  ;;  %v660_v17 = vpack.c.bf16 %v316_v10, %v314_v9  ;;  %v352_v19 = vld [vmem:[%s4994_s21 + $0x398] sm:$0xff] }
  0x8b   : > { %1082 = vxpose.xlu1.c.b16.cont [7/8] %v665_v48, 128  ;;  %v652_v48 = vpack.c.bf16 %v300_v45, %v298_v44  ;;  %v320_v22 = vld [vmem:[%s4994_s21 + $0x298] sm:$0xff]  ;;  %v678_v26 = vpack.c.bf16 %v352_v19, %v350_v18  ;;  %v4507_v10 = vld [vmem:[#allocation5 + $0x108] sm:$0xff]   ;;  %v409_v18 = vld [vmem:[%s4994_s21 + $0x560] sm:$0xff] }
  0x8c   : > { %v324_v32 = vld [vmem:[%s4994_s21 + $0x2b8] sm:$0xff]  ;;  %v4488_v19 = vld [vmem:[#allocation5 + $0x1f0] sm:$0xff]  }
  0x8d   : > { %3813 = vmatpush3.bf16.msra.mxu1 %v4481_v28  ;;  %v4498_v35 = vld [vmem:[#allocation5 + $0x158] sm:$0xff]  }
  0x8e   : > { %1115 = vxpose.xlu0.c.b16.end [8/8] %v683_v53, 128  ;;  %4022 = vmatprep.subr.bf16.mxu1 %v4484_v30  ;;  %v304_v53 = vld [vmem:[%s4994_s21 + $0x218] sm:$0xff]  ;;  %v322_v30 = vld [vmem:[%s4994_s21 + $0x2a8] sm:$0xff] }
  0x8f   : > { %1083 = vxpose.xlu1.c.b16.end [8/8] %v667_v55, 128  ;;  %v338_v55 = vld [vmem:[%s4994_s21 + $0x328] sm:$0xff]  ;;  %v654_v56 = vpack.c.bf16 %v304_v53, %v302_v52  ;;  %v664_v38 = vpack.c.bf16 %v324_v32, %v322_v30  ;;  %v360_v39 = vld [vmem:[%s4994_s21 + $0x3d8] sm:$0xff]  ;;  %v4502_v53 = vld [vmem:[#allocation5 + $0x150] sm:$0xff]  }
  0x90   : > { %v328_v41 = vld [vmem:[%s4994_s21 + $0x2d8] sm:$0xff]  ;;  %v4492_v30 = vld [vmem:[#allocation5 + $0x1e8] sm:$0xff]  }
  0x91   : > { %v666_v46 = vpack.c.bf16 %v328_v41, %v326_v40  ;;  %v332_v51 = vld [vmem:[%s4994_s21 + $0x2f8] sm:$0xff]  ;;  %v4496_v41 = vld [vmem:[#allocation5 + $0x1e0] sm:$0xff]  }
  0x92   : > { %1060 = vxpose.xlu0.c.b16.start [1/8] %v638_v60, 128  ;;  %v672_v60 = vpack.c.bf16 %v340_v57, %v338_v55  ;;  %v397_v55 = vld [vmem:[%s4994_s21 + $0x500] sm:$0xff]  ;;  %v668_v57 = vpack.c.bf16 %v332_v51, %v330_v50  ;;  %v4485_v9 = vld [vmem:[#allocation5 + $0x1b8] sm:$0xff]  }
  0x93   : > { %1028 = vxpose.xlu1.c.b16.start [1/8] %v622_v62, 128  ;;  %v342_v62 = vld [vmem:[%s4994_s21 + $0x348] sm:$0xff] }
  0x94   : > { %v674_v7 = vpack.c.bf16 %v344_v63, %v342_v62 }
  0x96   : > { %1061 = vxpose.xlu0.c.b16.cont [2/8] %v640_v4, 128  ;;  %v4486_v4 = vld [vmem:[#allocation5 + $0x170] sm:$0xff]  }
  0x97   : > { %1029 = vxpose.xlu1.c.b16.cont [2/8] %v624_v6, 128  ;;  %v346_v6 = vld [vmem:[%s4994_s21 + $0x368] sm:$0xff] }
  0x98   : > { %v676_v16 = vpack.c.bf16 %v348_v8, %v346_v6 }
  0x9a   : > { %1062 = vxpose.xlu0.c.b16.cont [3/8] %v642_v12, 128  ;;  %v4487_v12 = vld [vmem:[#allocation5 + $0x130] sm:$0xff]  }
  0x9b   : > { %1030 = vxpose.xlu1.c.b16.cont [3/8] %v626_v15, 128 }
  0x9e   : > { %1063 = vxpose.xlu0.c.b16.cont [4/8] %v644_v21, 128  ;;  %v318_v21 = vld [vmem:[%s4994_s21 + $0x288] sm:$0xff] }
  0x9f   : > { %1031 = vxpose.xlu1.c.b16.cont [4/8] %v628_v23, 128  ;;  %v4491_v23 = vld [vmem:[#allocation5 + $0x128] sm:$0xff]   ;;  %v662_v28 = vpack.c.bf16 %v320_v22, %v318_v21  ;;  %v411_v21 = vld [vmem:[%s4994_s21 + $0x570] sm:$0xff]  ;;  %v377_v22 = vld [vmem:[%s4994_s21 + $0x460] sm:$0xff] }
  0xa2   : > { %1064 = vxpose.xlu0.c.b16.cont [5/8] %v646_v29, 128  ;;  %v356_v29 = vld [vmem:[%s4994_s21 + $0x3b8] sm:$0xff] }
  0xa3   : > { %1032 = vxpose.xlu1.c.b16.cont [5/8] %v630_v31, 128 }
  0xa6   : > { %1065 = vxpose.xlu0.c.b16.cont [6/8] %v648_v36, 128  ;;  %v680_v36 = vpack.c.bf16 %v356_v29, %v354_v27  ;;  %v379_v27 = vld [vmem:[%s4994_s21 + $0x470] sm:$0xff] }
  0xa7   : > { %1033 = vxpose.xlu1.c.b16.cont [6/8] %v632_v37, 128  ;;  %v358_v37 = vld [vmem:[%s4994_s21 + $0x3c8] sm:$0xff]  ;;  %v691_v32 = vpack.c.bf16 %v379_v27, %v377_v22  ;;  %v435_v22 = vld [vmem:[%s4994_s21 + $0x630] sm:$0xff] }
  0xa8   : > { %v682_v45 = vpack.c.bf16 %v360_v39, %v358_v37  ;;  %v383_v37 = vld [vmem:[%s4994_s21 + $0x490] sm:$0xff]  ;;  %v4493_v39 = vld [vmem:[#allocation5 + $0x1a8] sm:$0xff]  }
  0xaa   : > { %1066 = vxpose.xlu0.c.b16.cont [7/8] %v650_v42, 128 }
  0xab   : > { %1034 = vxpose.xlu1.c.b16.cont [7/8] %v634_v43, 128  ;;  %v4499_v43 = vld [vmem:[#allocation5 + $0x118] sm:$0xff]  }
  0xae   : > { %1067 = vxpose.xlu0.c.b16.end [8/8] %v652_v48, 128  ;;  %v364_v48 = vld [vmem:[%s4994_s21 + $0x3f8] sm:$0xff] }
  0xaf   : > { %1035 = vxpose.xlu1.c.b16.end [8/8] %v636_v49, 128 }
  0xb2   : > { %1124 = vxpose.xlu0.c.b16.start [1/8] %v670_v54, 128  ;;  %v684_v54 = vpack.c.bf16 %v364_v48, %v362_v47  ;;  %v387_v47 = vld [vmem:[%s4994_s21 + $0x4b0] sm:$0xff] }
  0xb3   : > { %1092 = vxpose.xlu1.c.b16.start [1/8] %v654_v56, 128  ;;  %v399_v56 = vld [vmem:[%s4994_s21 + $0x510] sm:$0xff] }
  0xb4   : > { %v1052_v1 = vpop.trf.xlu0  ;;  %v701_v63 = vpack.c.bf16 %v399_v56, %v397_v55  ;;  %v389_v55 = vld [vmem:[%s4994_s21 + $0x4c0] sm:$0xff]  ;;  %v391_v56 = vld [vmem:[%s4994_s21 + $0x4d0] sm:$0xff] }
  0xb5   : > { %2004 = vmatprep.mubr.bf16.mxu0 %v1052_v1  ;;  %v1020_v5 = vpop.trf.xlu1  ;;  %v401_v1 = vld [vmem:[%s4994_s21 + $0x520] sm:$0xff] }
  0xb6   : > { %1125 = vxpose.xlu0.c.b16.cont [2/8] %v672_v60, 128  ;;  %2005 = vmatmul.mubr.bf16.vlgmr.msra.gmra.mxu0 %v1020_v5  ;;  %v365_v60 = vld [vmem:[%s4994_s21 + $0x400] sm:$0xff]  ;;  %v371_v5 = vld [vmem:[%s4994_s21 + $0x430] sm:$0xff]  ;;  %v703_v8 = vpack.c.bf16 %v403_v2, %v401_v1  ;;  %v697_v1 = vpack.c.bf16 %v391_v56, %v389_v55 }
  0xb7   : > { %1093 = vxpose.xlu1.c.b16.cont [2/8] %v656_v61, 128  ;;  %3911 = vmatpush3.bf16.msra.mxu0 %v4483_v0  ;;  %v367_v61 = vld [vmem:[%s4994_s21 + $0x410] sm:$0xff] }
  0xb8   : > { %v1053_v13 = vpop.trf.xlu0  ;;  %3912 = vmatprep.subr.bf16.mxu0 %v4486_v4  ;;  %v685_v0 = vpack.c.bf16 %v367_v61, %v365_v60  ;;  %v369_v4 = vld [vmem:[%s4994_s21 + $0x420] sm:$0xff]  ;;  %v4514_v60 = vld [vmem:[#allocation5 + $0x278] sm:$0xff]   ;;  %v4504_v2 = vld [vmem:[#allocation5 + $0x1d0] sm:$0xff]  }
  0xb9   : > { %2012 = vmatprep.mubr.bf16.mxu0 %v1053_v13  ;;  %v1021_v15 = vpop.trf.xlu1  ;;  %v407_v13 = vld [vmem:[%s4994_s21 + $0x550] sm:$0xff] }
  0xba   : > { %1126 = vxpose.xlu0.c.b16.cont [3/8] %v674_v7, 128  ;;  %v4506_v7 = vld [vmem:[#allocation5 + $0x148] sm:$0xff]   ;;  %v483_v55 = vld [vmem:[%s4994_s21 + $0x7b0] sm:$0xff] }
  0xbb   : > { %1094 = vxpose.xlu1.c.b16.cont [3/8] %v658_v11, 128  ;;  %3913 = vmatpush3.bf16.msra.mxu0 %v4487_v12  ;;  %v687_v11 = vpack.c.bf16 %v371_v5, %v369_v4  ;;  %v405_v12 = vld [vmem:[%s4994_s21 + $0x540] sm:$0xff] }
  0xbc   : > { %v1054_v20 = vpop.trf.xlu0  ;;  %3914 = vmatprep.subr.bf16.mxu0 %v4490_v14  ;;  %v373_v14 = vld [vmem:[%s4994_s21 + $0x440] sm:$0xff] }
  0xbd   : > { %v1022_v24 = vpop.trf.xlu1  ;;  %v393_v5 = vld [vmem:[%s4994_s21 + $0x4e0] sm:$0xff] }
  0xbe   : > { %1127 = vxpose.xlu0.c.b16.cont [4/8] %v676_v16, 128  ;;  %2013 = vmatmul.mubr.bf16.gmra.mxu0 %v1021_v15  ;;  %v375_v16 = vld [vmem:[%s4994_s21 + $0x450] sm:$0xff] }
  0xbf   : > { %1095 = vxpose.xlu1.c.b16.cont [4/8] %v660_v17, 128  ;;  %2020 = vmatprep.mubr.bf16.mxu0 %v1054_v20  ;;  %v705_v20 = vpack.c.bf16 %v407_v13, %v405_v12  ;;  %v429_v12 = vld [vmem:[%s4994_s21 + $0x600] sm:$0xff]  ;;  %v431_v13 = vld [vmem:[%s4994_s21 + $0x610] sm:$0xff] }
  0xc0   : > { %v1055_v31 = vpop.trf.xlu0  ;;  %3915 = vmatpush3.bf16.msra.mxu0 %v4491_v23  ;;  %v4508_v23 = vld [vmem:[#allocation5 + $0x140] sm:$0xff]  }
  0xc1   : > { %v1023_v34 = vpop.trf.xlu1  ;;  %3916 = vmatprep.subr.bf16.mxu0 %v4494_v25  ;;  %v4509_v25 = vld [vmem:[#allocation5 + $0x100] sm:$0xff]  }
  0xc2   : > { %1128 = vxpose.xlu0.c.b16.cont [5/8] %v678_v26, 128 }
  0xc3   : > { %1096 = vxpose.xlu1.c.b16.cont [5/8] %v662_v28, 128  ;;  %v4489_v28 = vld [vmem:[#allocation5 + $0x1b0] sm:$0xff]  }
  0xc4   : > { %v1056_v42 = vpop.trf.xlu0  ;;  %3917 = vmatpush3.bf16.msra.mxu0 %v4495_v33  ;;  %v413_v33 = vld [vmem:[%s4994_s21 + $0x580] sm:$0xff] }
  0xc5   : > { %v1024_v44 = vpop.trf.xlu1  ;;  %3918 = vmatprep.subr.bf16.mxu0 %v4498_v35 }
  0xc6   : > { %1129 = vxpose.xlu0.c.b16.cont [6/8] %v680_v36, 128  ;;  %2021 = vmatmul.mubr.bf16.gmra.mxu0 %v1022_v24  ;;  %v689_v24 = vpack.c.bf16 %v375_v16, %v373_v14  ;;  %v381_v36 = vld [vmem:[%s4994_s21 + $0x480] sm:$0xff]  ;;  %v4505_v14 = vld [vmem:[#allocation5 + $0x190] sm:$0xff]   ;;  %v4510_v16 = vld [vmem:[#allocation5 + $0x1c8] sm:$0xff]  }
  0xc7   : > { %1097 = vxpose.xlu1.c.b16.cont [6/8] %v664_v38, 128  ;;  %2028 = vmatprep.mubr.bf16.mxu0 %v1055_v31  ;;  %v707_v31 = vpack.c.bf16 %v411_v21, %v409_v18  ;;  %v465_v18 = vld [vmem:[%s4994_s21 + $0x720] sm:$0xff]  ;;  %v717_v21 = vpack.c.bf16 %v431_v13, %v429_v12  ;;  %v398_v13 = vld [vmem:[%s4994_s21 + $0x508] sm:$0xff] }
  0xc8   : > { %v1057_v49 = vpop.trf.xlu0  ;;  %3919 = vmatpush3.bf16.msra.mxu0 %v4499_v43  ;;  %v417_v43 = vld [vmem:[%s4994_s21 + $0x5a0] sm:$0xff] }
  0xc9   : > { %v5132_v52 = vpop.trf.xlu1  ;;  %3920 = vmatprep.subr.bf16.mxu0 %v4502_v53  ;;  %v423_v53 = vld [vmem:[%s4994_s21 + $0x5d0] sm:$0xff] }
  0xca   : > { %1130 = vxpose.xlu0.c.b16.cont [7/8] %v682_v45, 128  ;;  %v385_v45 = vld [vmem:[%s4994_s21 + $0x4a0] sm:$0xff] }
  0xcb   : > { %1098 = vxpose.xlu1.c.b16.cont [7/8] %v666_v46, 128  ;;  %v695_v51 = vpack.c.bf16 %v387_v47, %v385_v45  ;;  %v479_v47 = vld [vmem:[%s4994_s21 + $0x790] sm:$0xff] }
  0xcc   : > { %v5136_v59 = vpop.trf.xlu0  ;;  %3921 = vmatpush3.bf16.msra.mxu0 %v4503_v58 }
  0xcd   : > { %v5140_v62 = vpop.trf.xlu1  ;;  %3922 = vmatprep.subr.bf16.mxu0 %v4506_v7  ;;  %v395_v7 = vld [vmem:[%s4994_s21 + $0x4f0] sm:$0xff] }
  0xce   : > { %1131 = vxpose.xlu0.c.b16.end [8/8] %v684_v54, 128  ;;  %2029 = vmatmul.mubr.bf16.gmra.mxu0 %v1023_v34  ;;  %v415_v34 = vld [vmem:[%s4994_s21 + $0x590] sm:$0xff] }
  0xcf   : > { %1099 = vxpose.xlu1.c.b16.end [8/8] %v668_v57, 128  ;;  %2036 = vmatprep.mubr.bf16.mxu0 %v1056_v42  ;;  %v709_v40 = vpack.c.bf16 %v415_v34, %v413_v33  ;;  %v693_v42 = vpack.c.bf16 %v383_v37, %v381_v36  ;;  %v4500_v57 = vld [vmem:[#allocation5 + $0x1d8] sm:$0xff]   ;;  %v4513_v33 = vld [vmem:[#allocation5 + $0x180] sm:$0xff]  }
  0xd0   : > { %v5144_v3 = vpop.trf.xlu0  ;;  %3923 = vmatpush3.bf16.msra.mxu0 %v4507_v10  ;;  %v461_v10 = vld [vmem:[%s4994_s21 + $0x700] sm:$0xff] }
  0xd1   : > { %v5148_v6 = vpop.trf.xlu1  ;;  %3924 = vmatprep.subr.bf16.mxu0 %v4508_v23 }
  0xd2   : > { %1172 = vxpose.xlu0.c.b16.start [1/8] %v701_v63, 128  ;;  %v427_v63 = vld [vmem:[%s4994_s21 + $0x5f0] sm:$0xff] }
  0xd3   : > { %1140 = vxpose.xlu1.c.b16.start [1/8] %v685_v0, 128  ;;  %v4501_v0 = vld [vmem:[#allocation5 + $0x198] sm:$0xff]  }
  0xd4   : > { %v1116_v15 = vpop.trf.xlu0  ;;  %3925 = vmatpush3.bf16.msra.mxu0 %v4509_v25 }
  0xd5   : > { %2165 = vmatprep.mubr.bf16.mxu1 %v1116_v15  ;;  %v1084_v17 = vpop.trf.xlu1  ;;  %4134 = vmatprep.subr.bf16.mxu0 %v4514_v60  ;;  %v485_v60 = vld [vmem:[%s4994_s21 + $0x7c0] sm:$0xff] }
  0xd6   : > { %1173 = vxpose.xlu0.c.b16.cont [2/8] %v703_v8, 128  ;;  %2037 = vmatmul.mubr.bf16.gmra.mxu0 %v1024_v44  ;;  %v419_v44 = vld [vmem:[%s4994_s21 + $0x5b0] sm:$0xff] }
  0xd7   : > { %2166 = vmatmul.mubr.bf16.vlgmr.msra.gmra.mxu1 %v1084_v17  ;;  %1141 = vxpose.xlu1.c.b16.cont [2/8] %v687_v11, 128  ;;  %v711_v50 = vpack.c.bf16 %v419_v44, %v417_v43 }
  0xd8   : > { %4023 = vmatpush3.bf16.msra.mxu1 %v4485_v9  ;;  %2044 = vmatprep.mubr.bf16.mxu0 %v1057_v49  ;;  %v1117_v26 = vpop.trf.xlu0  ;;  %v4497_v49 = vld [vmem:[#allocation5 + $0x1a0] sm:$0xff]   ;;  %v699_v9 = vpack.c.bf16 %v395_v7, %v393_v5 }
  0xd9   : > { %2173 = vmatprep.mubr.bf16.mxu1 %v1117_v26  ;;  %v1085_v29 = vpop.trf.xlu1  ;;  %4024 = vmatprep.subr.bf16.mxu1 %v4488_v19  ;;  %v467_v19 = vld [vmem:[%s4994_s21 + $0x730] sm:$0xff] }
  0xda   : > { %1174 = vxpose.xlu0.c.b16.cont [3/8] %v705_v20, 128  ;;  %v433_v20 = vld [vmem:[%s4994_s21 + $0x620] sm:$0xff]  ;;  %v735_v26 = vpack.c.bf16 %v467_v19, %v465_v18  ;;  %v366_v18 = vld [vmem:[%s4994_s21 + $0x408] sm:$0xff]  ;;  %v368_v19 = vld [vmem:[%s4994_s21 + $0x418] sm:$0xff] }
  0xdb   : > { %1142 = vxpose.xlu1.c.b16.cont [3/8] %v689_v24, 128  ;;  %v4511_v24 = vld [vmem:[#allocation5 + $0x188] sm:$0xff]   ;;  %v719_v27 = vpack.c.bf16 %v435_v22, %v433_v20  ;;  %v404_v22 = vld [vmem:[%s4994_s21 + $0x538] sm:$0xff] }
  0xdc   : > { %v1118_v35 = vpop.trf.xlu0  ;;  %4025 = vmatpush3.bf16.msra.mxu1 %v4489_v28  ;;  %v469_v28 = vld [vmem:[%s4994_s21 + $0x740] sm:$0xff] }
  0xdd   : > { %v1086_v38 = vpop.trf.xlu1  ;;  %4026 = vmatprep.subr.bf16.mxu1 %v4492_v30 }
  0xde   : > { %1175 = vxpose.xlu0.c.b16.cont [4/8] %v707_v31, 128  ;;  %2045 = vmatmul.mubr.bf16.gmra.mxu0 %v5132_v52  ;;  %v421_v52 = vld [vmem:[%s4994_s21 + $0x5c0] sm:$0xff] }
  0xdf   : > { %2174 = vmatmul.mubr.bf16.gmra.mxu1 %v1085_v29  ;;  %1143 = vxpose.xlu1.c.b16.cont [4/8] %v691_v32, 128  ;;  %v713_v61 = vpack.c.bf16 %v423_v53, %v421_v52  ;;  %v471_v29 = vld [vmem:[%s4994_s21 + $0x750] sm:$0xff]  ;;  %v437_v31 = vld [vmem:[%s4994_s21 + $0x640] sm:$0xff] }
  0xe0   : > { %2052 = vmatprep.mubr.bf16.mxu0 %v5136_v59  ;;  %2181 = vmatprep.mubr.bf16.mxu1 %v1118_v35  ;;  %v1119_v46 = vpop.trf.xlu0  ;;  %v425_v59 = vld [vmem:[%s4994_s21 + $0x5e0] sm:$0xff]  ;;  %v439_v32 = vld [vmem:[%s4994_s21 + $0x650] sm:$0xff]  ;;  %v4516_v35 = vld [vmem:[#allocation5 + $0x2f8] sm:$0xff]   ;;  %v737_v36 = vpack.c.bf16 %v471_v29, %v469_v28 }
  0xe1   : > { %v1087_v48 = vpop.trf.xlu1  ;;  %4027 = vmatpush3.bf16.msra.mxu1 %v4493_v39  ;;  %v721_v37 = vpack.c.bf16 %v439_v32, %v437_v31  ;;  %v475_v39 = vld [vmem:[%s4994_s21 + $0x770] sm:$0xff]  ;;  %v406_v29 = vld [vmem:[%s4994_s21 + $0x548] sm:$0xff]  ;;  %v408_v32 = vld [vmem:[%s4994_s21 + $0x558] sm:$0xff] }
  0xe2   : > { %1176 = vxpose.xlu0.c.b16.cont [5/8] %v709_v40, 128  ;;  %4028 = vmatprep.subr.bf16.mxu1 %v4496_v41  ;;  %v441_v40 = vld [vmem:[%s4994_s21 + $0x660] sm:$0xff] }
  0xe3   : > { %1144 = vxpose.xlu1.c.b16.cont [5/8] %v693_v42, 128  ;;  %v443_v42 = vld [vmem:[%s4994_s21 + $0x670] sm:$0xff] }
  0xe4   : > { %v1120_v54 = vpop.trf.xlu0  ;;  %v723_v45 = vpack.c.bf16 %v443_v42, %v441_v40  ;;  %v380_v42 = vld [vmem:[%s4994_s21 + $0x478] sm:$0xff] }
  0xe5   : > { %v5172_v58 = vpop.trf.xlu1  ;;  %4029 = vmatpush3.bf16.msra.mxu1 %v4497_v49 }
  0xe6   : > { %1177 = vxpose.xlu0.c.b16.cont [6/8] %v711_v50, 128  ;;  %2053 = vmatmul.mubr.bf16.gmra.mxu0 %v5140_v62  ;;  %v715_v62 = vpack.c.bf16 %v427_v63, %v425_v59  ;;  %v447_v50 = vld [vmem:[%s4994_s21 + $0x690] sm:$0xff] }
  0xe7   : > { %2182 = vmatmul.mubr.bf16.gmra.mxu1 %v1086_v38  ;;  %1145 = vxpose.xlu1.c.b16.cont [6/8] %v695_v51, 128  ;;  %v473_v38 = vld [vmem:[%s4994_s21 + $0x760] sm:$0xff] }
  0xe8   : > { %2060 = vmatprep.mubr.bf16.mxu0 %v5144_v3  ;;  %2189 = vmatprep.mubr.bf16.mxu1 %v1119_v46  ;;  %v1121_v4 = vpop.trf.xlu0  ;;  %v463_v3 = vld [vmem:[%s4994_s21 + $0x710] sm:$0xff]  ;;  %v739_v44 = vpack.c.bf16 %v475_v39, %v473_v38  ;;  %v477_v46 = vld [vmem:[%s4994_s21 + $0x780] sm:$0xff]  ;;  %v410_v38 = vld [vmem:[%s4994_s21 + $0x568] sm:$0xff] }
  0xe9   : > { %v5180_v8 = vpop.trf.xlu1  ;;  %4030 = vmatprep.subr.bf16.mxu1 %v4500_v57  ;;  %v733_v17 = vpack.c.bf16 %v463_v3, %v461_v10  ;;  %v741_v52 = vpack.c.bf16 %v479_v47, %v477_v46  ;;  %v449_v57 = vld [vmem:[%s4994_s21 + $0x6a0] sm:$0xff]  ;;  %v412_v39 = vld [vmem:[%s4994_s21 + $0x578] sm:$0xff]  ;;  %v414_v46 = vld [vmem:[%s4994_s21 + $0x588] sm:$0xff] }
  0xea   : > { %1178 = vxpose.xlu0.c.b16.cont [7/8] %v713_v61, 128  ;;  %4031 = vmatpush3.bf16.msra.mxu1 %v4501_v0  ;;  %v487_v0 = vld [vmem:[%s4994_s21 + $0x7d0] sm:$0xff]  ;;  %v457_v3 = vld [vmem:[%s4994_s21 + $0x6e0] sm:$0xff]  ;;  %v416_v47 = vld [vmem:[%s4994_s21 + $0x598] sm:$0xff] }
  0xeb   : > { %1146 = vxpose.xlu1.c.b16.cont [7/8] %v697_v1, 128  ;;  %4032 = vmatprep.subr.bf16.mxu1 %v4504_v2  ;;  %v453_v2 = vld [vmem:[%s4994_s21 + $0x6c0] sm:$0xff]  ;;  %v745_v7 = vpack.c.bf16 %v487_v0, %v485_v60  ;;  %v424_v0 = vld [vmem:[%s4994_s21 + $0x5d8] sm:$0xff] }
  0xec   : > { %v5184_v11 = vpop.trf.xlu0 }
  0xed   : > { %v5188_v15 = vpop.trf.xlu1 }
  0xee   : > { %1179 = vxpose.xlu0.c.b16.end [8/8] %v715_v62, 128  ;;  %2061 = vmatmul.mubr.bf16.gmra.mxu0 %v5148_v6  ;;  %v4512_v6 = vld [vmem:[#allocation5 + $0x1c0] sm:$0xff]  }
  0xef   : > { %2190 = vmatmul.mubr.bf16.gmra.mxu1 %v1087_v48  ;;  %1147 = vxpose.xlu1.c.b16.end [8/8] %v699_v9, 128  ;;  %v445_v48 = vld [vmem:[%s4994_s21 + $0x680] sm:$0xff]  ;;  %v491_v9 = vld [vmem:[%s4994_s21 + $0x7f0] sm:$0xff] }
  0xf0   : > { %2197 = vmatprep.mubr.bf16.mxu1 %v1120_v54  ;;  %v5195_v23 = vpop.trf.xlu0  ;;  %4033 = vmatpush3.bf16.msra.mxu1 %v4505_v14  ;;  %v725_v53 = vpack.c.bf16 %v447_v50, %v445_v48  ;;  %v481_v54 = vld [vmem:[%s4994_s21 + $0x7a0] sm:$0xff]  ;;  %v400_v14 = vld [vmem:[%s4994_s21 + $0x518] sm:$0xff] }
  0xf1   : > { %v5197_v25 = vpop.trf.xlu1  ;;  %4034 = vmatprep.subr.bf16.mxu1 %v4510_v16  ;;  %v743_v61 = vpack.c.bf16 %v483_v55, %v481_v54  ;;  %v489_v62 = vld [vmem:[%s4994_s21 + $0x7e0] sm:$0xff]  ;;  %v384_v50 = vld [vmem:[%s4994_s21 + $0x498] sm:$0xff]  ;;  %v418_v54 = vld [vmem:[%s4994_s21 + $0x5a8] sm:$0xff] }
  0xf2   : > { %1236 = vxpose.xlu0.c.b16.start [1/8] %v733_v17, 128  ;;  %v747_v16 = vpack.c.bf16 %v491_v9, %v489_v62  ;;  %v420_v55 = vld [vmem:[%s4994_s21 + $0x5b8] sm:$0xff]  ;;  %v426_v62 = vld [vmem:[%s4994_s21 + $0x5e8] sm:$0xff] }
  0xf3   : > { %1204 = vxpose.xlu1.c.b16.start [1/8] %v717_v21, 128  ;;  %v402_v21 = vld [vmem:[%s4994_s21 + $0x528] sm:$0xff]  ;;  %v712_v60 = vpack.c.bf16 %v420_v55, %v418_v54  ;;  %v428_v9 = vld [vmem:[%s4994_s21 + $0x5f8] sm:$0xff] }
  0xf4   : > { %v1068_v30 = vpop.trf.xlu0  ;;  %4035 = vmatpush3.bf16.msra.mxu1 %v4511_v24  ;;  %v686_v24 = vpack.c.bf16 %v368_v19, %v366_v18  ;;  %v430_v18 = vld [vmem:[%s4994_s21 + $0x608] sm:$0xff]  ;;  %v432_v19 = vld [vmem:[%s4994_s21 + $0x618] sm:$0xff] }
  0xf5   : > { %2068 = vmatprep.mubr.bf16.mxu0 %v1068_v30  ;;  %v1036_v34 = vpop.trf.xlu1  ;;  %4036 = vmatprep.subr.bf16.mxu1 %v4512_v6  ;;  %v704_v30 = vpack.c.bf16 %v404_v22, %v402_v21  ;;  %v718_v22 = vpack.c.bf16 %v432_v19, %v430_v18  ;;  %v448_v54 = vld [vmem:[%s4994_s21 + $0x698] sm:$0xff]  ;;  %v4534_v18 = vld [vmem:[#allocation5 + $0x250] sm:$0xff]  }
  0xf6   : > { %1237 = vxpose.xlu0.c.b16.cont [2/8] %v735_v26, 128  ;;  %2069 = vmatmul.mubr.bf16.gmra.mxu0 %v1036_v34  ;;  %v370_v26 = vld [vmem:[%s4994_s21 + $0x428] sm:$0xff]  ;;  %v376_v34 = vld [vmem:[%s4994_s21 + $0x458] sm:$0xff] }
  0xf7   : > { %2198 = vmatmul.mubr.bf16.gmra.mxu1 %v5172_v58  ;;  %1205 = vxpose.xlu1.c.b16.cont [2/8] %v719_v27, 128  ;;  %v451_v58 = vld [vmem:[%s4994_s21 + $0x6b0] sm:$0xff]  ;;  %v372_v27 = vld [vmem:[%s4994_s21 + $0x438] sm:$0xff] }
  0xf8   : > { %2205 = vmatprep.mubr.bf16.mxu1 %v1121_v4  ;;  %v1069_v41 = vpop.trf.xlu0  ;;  %4037 = vmatpush3.bf16.msra.mxu1 %v4513_v33  ;;  %v727_v63 = vpack.c.bf16 %v451_v58, %v449_v57  ;;  %v455_v4 = vld [vmem:[%s4994_s21 + $0x6d0] sm:$0xff]  ;;  %v688_v31 = vpack.c.bf16 %v372_v27, %v370_v26  ;;  %v374_v33 = vld [vmem:[%s4994_s21 + $0x448] sm:$0xff]  ;;  %v388_v58 = vld [vmem:[%s4994_s21 + $0x4b8] sm:$0xff] }
  0xf9   : > { %2076 = vmatprep.mubr.bf16.mxu0 %v1069_v41  ;;  %v1037_v43 = vpop.trf.xlu1  ;;  %4246 = vmatprep.subr.bf16.mxu1 %v4516_v35  ;;  %v378_v41 = vld [vmem:[%s4994_s21 + $0x468] sm:$0xff]  ;;  %v436_v27 = vld [vmem:[%s4994_s21 + $0x638] sm:$0xff] }
  0xfa   : > { %1238 = vxpose.xlu0.c.b16.cont [3/8] %v737_v36, 128  ;;  %v706_v36 = vpack.c.bf16 %v408_v32, %v406_v29  ;;  %v386_v57 = vld [vmem:[%s4994_s21 + $0x4a8] sm:$0xff]  ;;  %v472_v32 = vld [vmem:[%s4994_s21 + $0x758] sm:$0xff] }
  0xfb   : > { %1206 = vxpose.xlu1.c.b16.cont [3/8] %v721_v37, 128  ;;  %v690_v37 = vpack.c.bf16 %v376_v34, %v374_v33  ;;  %v434_v26 = vld [vmem:[%s4994_s21 + $0x628] sm:$0xff]  ;;  %v440_v34 = vld [vmem:[%s4994_s21 + $0x658] sm:$0xff] }
  0xfc   : > { %v1070_v49 = vpop.trf.xlu0  ;;  %v438_v33 = vld [vmem:[%s4994_s21 + $0x648] sm:$0xff] }
  0xfd   : > { %v1038_v51 = vpop.trf.xlu1 }
  0xfe   : > { %1239 = vxpose.xlu0.c.b16.cont [4/8] %v739_v44, 128  ;;  %2077 = vmatmul.mubr.bf16.gmra.mxu0 %v1037_v43  ;;  %v708_v44 = vpack.c.bf16 %v412_v39, %v410_v38  ;;  %v722_v39 = vpack.c.bf16 %v440_v34, %v438_v33 }
  0xff   : > { %2206 = vmatmul.mubr.bf16.gmra.mxu1 %v5180_v8  ;;  %1207 = vxpose.xlu1.c.b16.cont [4/8] %v723_v45, 128  ;;  %v729_v8 = vpack.c.bf16 %v455_v4, %v453_v2  ;;  %v692_v45 = vpack.c.bf16 %v380_v42, %v378_v41  ;;  %v390_v2 = vld [vmem:[%s4994_s21 + $0x4c8] sm:$0xff]  ;;  %v392_v4 = vld [vmem:[%s4994_s21 + $0x4d8] sm:$0xff] }
 0x100   : > { %2084 = vmatprep.mubr.bf16.mxu0 %v1070_v49  ;;  %2213 = vmatprep.mubr.bf16.mxu1 %v5184_v11  ;;  %v1071_v56 = vpop.trf.xlu0  ;;  %v459_v11 = vld [vmem:[%s4994_s21 + $0x6f0] sm:$0xff]  ;;  %v382_v49 = vld [vmem:[%s4994_s21 + $0x488] sm:$0xff]  ;;  %v476_v41 = vld [vmem:[%s4994_s21 + $0x778] sm:$0xff] }
 0x101   : > { %v1039_v59 = vpop.trf.xlu1 }
 0x102   : > { %1240 = vxpose.xlu0.c.b16.cont [5/8] %v741_v52, 128  ;;  %v710_v52 = vpack.c.bf16 %v416_v47, %v414_v46  ;;  %v4522_v47 = vld [vmem:[#allocation5 + $0x268] sm:$0xff]  }
 0x103   : > { %1208 = vxpose.xlu1.c.b16.cont [5/8] %v725_v53, 128  ;;  %v694_v53 = vpack.c.bf16 %v384_v50, %v382_v49  ;;  %v478_v50 = vld [vmem:[%s4994_s21 + $0x788] sm:$0xff] }
 0x104   : > { %v1072_v1 = vpop.trf.xlu0 }
 0x105   : > { %v1040_v5 = vpop.trf.xlu1 }
 0x106   : > { %1241 = vxpose.xlu0.c.b16.cont [6/8] %v743_v61, 128  ;;  %2085 = vmatmul.mubr.bf16.gmra.mxu0 %v1038_v51  ;;  %v696_v61 = vpack.c.bf16 %v388_v58, %v386_v57  ;;  %v4526_v58 = vld [vmem:[#allocation5 + $0x260] sm:$0xff]  }
 0x107   : > { %2214 = vmatmul.mubr.bf16.gmra.mxu1 %v5188_v15  ;;  %1209 = vxpose.xlu1.c.b16.cont [6/8] %v727_v63, 128  ;;  %v731_v15 = vpack.c.bf16 %v459_v11, %v457_v3  ;;  %v422_v63 = vld [vmem:[%s4994_s21 + $0x5c8] sm:$0xff]  ;;  %v396_v11 = vld [vmem:[%s4994_s21 + $0x4f8] sm:$0xff] }
 0x108   : > { %2092 = vmatprep.mubr.bf16.mxu0 %v1071_v56  ;;  %2221 = vmatprep.mubr.bf16.mxu1 %v5195_v23  ;;  %v1073_v10 = vpop.trf.xlu0  ;;  %v702_v23 = vpack.c.bf16 %v400_v14, %v398_v13  ;;  %v394_v3 = vld [vmem:[%s4994_s21 + $0x4e8] sm:$0xff]  ;;  %v716_v13 = vpack.c.bf16 %v428_v9, %v426_v62  ;;  %v488_v62 = vld [vmem:[%s4994_s21 + $0x7d8] sm:$0xff] }
 0x109   : > { %v1041_v12 = vpop.trf.xlu1  ;;  %v700_v14 = vpack.c.bf16 %v396_v11, %v394_v3  ;;  %v456_v3 = vld [vmem:[%s4994_s21 + $0x6d8] sm:$0xff] }
 0x10a   : > { %1242 = vxpose.xlu0.c.b16.cont [7/8] %v745_v7, 128  ;;  %v714_v7 = vpack.c.bf16 %v424_v0, %v422_v63  ;;  %v450_v0 = vld [vmem:[%s4994_s21 + $0x6a8] sm:$0xff] }
 0x10b   : > { %1210 = vxpose.xlu1.c.b16.cont [7/8] %v729_v8, 128  ;;  %v698_v8 = vpack.c.bf16 %v392_v4, %v390_v2  ;;  %v4527_v4 = vld [vmem:[#allocation5 + $0x220] sm:$0xff]  }
 0x10c   : > { %v1074_v17 = vpop.trf.xlu0 }
 0x10d   : > { %v5232_v20 = vpop.trf.xlu1 }
 0x10e   : > { %1243 = vxpose.xlu0.c.b16.end [8/8] %v747_v16, 128  ;;  %2093 = vmatmul.mubr.bf16.gmra.mxu0 %v1039_v59  ;;  %v462_v16 = vld [vmem:[%s4994_s21 + $0x708] sm:$0xff] }
 0x10f   : > { %2222 = vmatmul.mubr.bf16.gmra.mxu1 %v5197_v25  ;;  %1211 = vxpose.xlu1.c.b16.end [8/8] %v731_v15, 128  ;;  %v464_v15 = vld [vmem:[%s4994_s21 + $0x718] sm:$0xff] }
 0x110   : > { %2100 = vmatprep.mubr.bf16.mxu0 %v1072_v1  ;;  %v5237_v6 = vpop.trf.xlu0  ;;  %v734_v21 = vpack.c.bf16 %v464_v15, %v462_v16  ;;  %v490_v15 = vld [vmem:[%s4994_s21 + $0x7e8] sm:$0xff] }
 0x111   : > { %v5241_v28 = vpop.trf.xlu1 }
 0x112   : > { %1188 = vxpose.xlu0.c.b16.start [1/8] %v702_v23, 128  ;;  %v466_v23 = vld [vmem:[%s4994_s21 + $0x728] sm:$0xff] }
 0x113   : > { %1156 = vxpose.xlu1.c.b16.start [1/8] %v686_v24, 128  ;;  %v468_v24 = vld [vmem:[%s4994_s21 + $0x738] sm:$0xff] }
 0x114   : > { %v1132_v25 = vpop.trf.xlu0 }
 0x115   : > { %2229 = vmatprep.mubr.bf16.mxu1 %v1132_v25  ;;  %v1100_v35 = vpop.trf.xlu1 }
 0x116   : > { %1189 = vxpose.xlu0.c.b16.cont [2/8] %v704_v30, 128  ;;  %2101 = vmatmul.mubr.bf16.gmra.mxu0 %v1040_v5  ;;  %v736_v30 = vpack.c.bf16 %v468_v24, %v466_v23 }
 0x117   : > { %2230 = vmatmul.mubr.bf16.gmra.mxu1 %v1100_v35  ;;  %1157 = vxpose.xlu1.c.b16.cont [2/8] %v688_v31, 128  ;;  %v470_v31 = vld [vmem:[%s4994_s21 + $0x748] sm:$0xff]  ;;  %v4515_v35 = vld [vmem:[#allocation5 + $0x238] sm:$0xff]  }
 0x118   : > { %2108 = vmatprep.mubr.bf16.mxu0 %v1073_v10  ;;  %v1133_v40 = vpop.trf.xlu0  ;;  %v738_v38 = vpack.c.bf16 %v472_v32, %v470_v31  ;;  %v4535_v31 = vld [vmem:[#allocation5 + $0x210] sm:$0xff]  }
 0x119   : > { %2237 = vmatprep.mubr.bf16.mxu1 %v1133_v40  ;;  %v1101_v43 = vpop.trf.xlu1  ;;  %v474_v40 = vld [vmem:[%s4994_s21 + $0x768] sm:$0xff] }
 0x11a   : > { %1190 = vxpose.xlu0.c.b16.cont [3/8] %v706_v36, 128 }
 0x11b   : > { %1158 = vxpose.xlu1.c.b16.cont [3/8] %v690_v37, 128  ;;  %v4518_v37 = vld [vmem:[#allocation5 + $0x270] sm:$0xff]  }
 0x11c   : > { %v1134_v48 = vpop.trf.xlu0 }
 0x11d   : > { %v1102_v51 = vpop.trf.xlu1 }
 0x11e   : > { %1191 = vxpose.xlu0.c.b16.cont [4/8] %v708_v44, 128  ;;  %2109 = vmatmul.mubr.bf16.gmra.mxu0 %v1041_v12  ;;  %v444_v44 = vld [vmem:[%s4994_s21 + $0x678] sm:$0xff] }
 0x11f   : > { %2238 = vmatmul.mubr.bf16.gmra.mxu1 %v1101_v43  ;;  %1159 = vxpose.xlu1.c.b16.cont [4/8] %v692_v45, 128  ;;  %v442_v43 = vld [vmem:[%s4994_s21 + $0x668] sm:$0xff]  ;;  %v4519_v45 = vld [vmem:[#allocation5 + $0x230] sm:$0xff]  }
 0x120   : > { %2116 = vmatprep.mubr.bf16.mxu0 %v1074_v17  ;;  %2245 = vmatprep.mubr.bf16.mxu1 %v1134_v48  ;;  %v1135_v56 = vpop.trf.xlu0  ;;  %v740_v48 = vpack.c.bf16 %v476_v41, %v474_v40  ;;  %v724_v49 = vpack.c.bf16 %v444_v44, %v442_v43  ;;  %v4539_v40 = vld [vmem:[#allocation5 + $0x208] sm:$0xff]   ;;  %v533_v44 = vld [vmem:[%s4994_s21 + $0x940] sm:$0xff] }
 0x121   : > { %v1103_v59 = vpop.trf.xlu1 }
 0x122   : > { %1192 = vxpose.xlu0.c.b16.cont [5/8] %v710_v52, 128 }
 0x123   : > { %1160 = vxpose.xlu1.c.b16.cont [5/8] %v694_v53, 128  ;;  %v446_v53 = vld [vmem:[%s4994_s21 + $0x688] sm:$0xff] }
 0x124   : > { %v1136_v1 = vpop.trf.xlu0 }
 0x125   : > { %v1104_v5 = vpop.trf.xlu1 }
 0x126   : > { %1193 = vxpose.xlu0.c.b16.cont [6/8] %v712_v60, 128  ;;  %2117 = vmatmul.mubr.bf16.gmra.mxu0 %v5232_v20  ;;  %v482_v60 = vld [vmem:[%s4994_s21 + $0x7a8] sm:$0xff] }
 0x127   : > { %2246 = vmatmul.mubr.bf16.gmra.mxu1 %v1102_v51  ;;  %1161 = vxpose.xlu1.c.b16.cont [6/8] %v696_v61, 128  ;;  %v480_v51 = vld [vmem:[%s4994_s21 + $0x798] sm:$0xff] }
 0x128   : > { %2124 = vmatprep.mubr.bf16.mxu0 %v5237_v6  ;;  %2253 = vmatprep.mubr.bf16.mxu1 %v1135_v56  ;;  %v1137_v10 = vpop.trf.xlu0  ;;  %v4523_v56 = vld [vmem:[#allocation5 + $0x228] sm:$0xff]   ;;  %v742_v57 = vpack.c.bf16 %v480_v51, %v478_v50  ;;  %v484_v61 = vld [vmem:[%s4994_s21 + $0x7b8] sm:$0xff]  ;;  %v4520_v51 = vld [vmem:[#allocation5 + $0x2f0] sm:$0xff]  }
 0x129   : > { %v5269_v12 = vpop.trf.xlu1 }
 0x12a   : > { %1194 = vxpose.xlu0.c.b16.cont [7/8] %v714_v7, 128 }
 0x12b   : > { %1162 = vxpose.xlu1.c.b16.cont [7/8] %v698_v8, 128  ;;  %v486_v8 = vld [vmem:[%s4994_s21 + $0x7c8] sm:$0xff] }
 0x12c   : > { %v5273_v17 = vpop.trf.xlu0 }
 0x12d   : > { %v5277_v20 = vpop.trf.xlu1 }
 0x12e   : > { %1195 = vxpose.xlu0.c.b16.end [8/8] %v716_v13, 128  ;;  %2125 = vmatmul.mubr.bf16.gmra.mxu0 %v5241_v28  ;;  %v720_v28 = vpack.c.bf16 %v436_v27, %v434_v26  ;;  %v746_v13 = vpack.c.bf16 %v488_v62, %v486_v8  ;;  %v525_v26 = vld [vmem:[%s4994_s21 + $0x900] sm:$0xff]  ;;  %v527_v27 = vld [vmem:[%s4994_s21 + $0x910] sm:$0xff] }
 0x12f   : > { %2254 = vmatmul.mubr.bf16.gmra.mxu1 %v1103_v59  ;;  %1163 = vxpose.xlu1.c.b16.end [8/8] %v700_v14, 128  ;;  %v726_v59 = vpack.c.bf16 %v448_v54, %v446_v53  ;;  %v4531_v14 = vld [vmem:[#allocation5 + $0x218] sm:$0xff]   ;;  %v765_v33 = vpack.c.bf16 %v527_v27, %v525_v26  ;;  %v4541_v53 = vld [vmem:[#allocation5 + $0x200] sm:$0xff]   ;;  %v511_v8 = vld [vmem:[%s4994_s21 + $0x890] sm:$0xff] }
 0x130   : > { %2261 = vmatprep.mubr.bf16.mxu1 %v1136_v1  ;;  %v5282_v6 = vpop.trf.xlu0  ;;  %v452_v1 = vld [vmem:[%s4994_s21 + $0x6b8] sm:$0xff]  ;;  %v519_v26 = vld [vmem:[%s4994_s21 + $0x8d0] sm:$0xff] }
 0x131   : > { %v5286_v29 = vpop.trf.xlu1  ;;  %v728_v7 = vpack.c.bf16 %v452_v1, %v450_v0 }
 0x132   : > { %1252 = vxpose.xlu0.c.b16.start [1/8] %v734_v21, 128  ;;  %v458_v21 = vld [vmem:[%s4994_s21 + $0x6e8] sm:$0xff] }
 0x133   : > { %1220 = vxpose.xlu1.c.b16.start [1/8] %v718_v22, 128  ;;  %v460_v22 = vld [vmem:[%s4994_s21 + $0x6f8] sm:$0xff] }
 0x134   : > { %v1180_v25 = vpop.trf.xlu0  ;;  %v732_v24 = vpack.c.bf16 %v460_v22, %v458_v21  ;;  %v549_v22 = vld [vmem:[%s4994_s21 + $0x9c0] sm:$0xff] }
 0x135   : > { %2326 = vmatprep.mubr.bf16.mxu0 %v1180_v25  ;;  %v1148_v36 = vpop.trf.xlu1  ;;  %v4538_v25 = vld [vmem:[#allocation5 + $0x248] sm:$0xff]  }
 0x136   : > { %1253 = vxpose.xlu0.c.b16.cont [2/8] %v736_v30, 128  ;;  %2327 = vmatmul.mubr.bf16.vlgmr.msra.gmra.mxu0 %v1148_v36  ;;  %v493_v30 = vld [vmem:[%s4994_s21 + $0x800] sm:$0xff]  ;;  %v531_v36 = vld [vmem:[%s4994_s21 + $0x930] sm:$0xff] }
 0x137   : > { %2262 = vmatmul.mubr.bf16.gmra.mxu1 %v1104_v5  ;;  %1221 = vxpose.xlu1.c.b16.cont [2/8] %v720_v28, 128  ;;  %v744_v5 = vpack.c.bf16 %v484_v61, %v482_v60  ;;  %v495_v28 = vld [vmem:[%s4994_s21 + $0x810] sm:$0xff] }
 0x138   : > { %2269 = vmatprep.mubr.bf16.mxu1 %v1137_v10  ;;  %v1181_v42 = vpop.trf.xlu0  ;;  %4135 = vmatpush3.bf16.msra.mxu0 %v4515_v35  ;;  %v454_v10 = vld [vmem:[%s4994_s21 + $0x6c8] sm:$0xff]  ;;  %v749_v34 = vpack.c.bf16 %v495_v28, %v493_v30  ;;  %v529_v35 = vld [vmem:[%s4994_s21 + $0x920] sm:$0xff]  ;;  %v4521_v60 = vld [vmem:[#allocation5 + $0x2b0] sm:$0xff]  }
 0x139   : > { %2334 = vmatprep.mubr.bf16.mxu0 %v1181_v42  ;;  %v1149_v46 = vpop.trf.xlu1  ;;  %4136 = vmatprep.subr.bf16.mxu0 %v4518_v37  ;;  %v730_v16 = vpack.c.bf16 %v456_v3, %v454_v10  ;;  %v4540_v42 = vld [vmem:[#allocation5 + $0x240] sm:$0xff]   ;;  %v4533_v28 = vld [vmem:[#allocation5 + $0x298] sm:$0xff]  }
 0x13a   : > { %1254 = vxpose.xlu0.c.b16.cont [3/8] %v738_v38, 128  ;;  %v497_v38 = vld [vmem:[%s4994_s21 + $0x820] sm:$0xff] }
 0x13b   : > { %1222 = vxpose.xlu1.c.b16.cont [3/8] %v722_v39, 128  ;;  %v499_v39 = vld [vmem:[%s4994_s21 + $0x830] sm:$0xff]  ;;  %v4528_v3 = vld [vmem:[#allocation5 + $0x2e0] sm:$0xff]  }
 0x13c   : > { %v1182_v52 = vpop.trf.xlu0  ;;  %4137 = vmatpush3.bf16.msra.mxu0 %v4519_v45  ;;  %v751_v43 = vpack.c.bf16 %v499_v39, %v497_v38  ;;  %v535_v45 = vld [vmem:[%s4994_s21 + $0x950] sm:$0xff] }
 0x13d   : > { %v1150_v55 = vpop.trf.xlu1  ;;  %4138 = vmatprep.subr.bf16.mxu0 %v4522_v47  ;;  %v4517_v47 = vld [vmem:[#allocation5 + $0x2b8] sm:$0xff]   ;;  %v523_v38 = vld [vmem:[%s4994_s21 + $0x8f0] sm:$0xff] }
 0x13e   : > { %1255 = vxpose.xlu0.c.b16.cont [4/8] %v740_v48, 128  ;;  %2335 = vmatmul.mubr.bf16.gmra.mxu0 %v1149_v46  ;;  %v501_v48 = vld [vmem:[%s4994_s21 + $0x840] sm:$0xff] }
 0x13f   : > { %2270 = vmatmul.mubr.bf16.gmra.mxu1 %v5269_v12  ;;  %1223 = vxpose.xlu1.c.b16.cont [4/8] %v724_v49, 128  ;;  %v4530_v12 = vld [vmem:[#allocation5 + $0x258] sm:$0xff]   ;;  %v503_v49 = vld [vmem:[%s4994_s21 + $0x850] sm:$0xff] }
 0x140   : > { %2277 = vmatprep.mubr.bf16.mxu1 %v5273_v17  ;;  %2342 = vmatprep.mubr.bf16.mxu0 %v1182_v52  ;;  %v1183_v63 = vpop.trf.xlu0  ;;  %v492_v17 = vld [vmem:[%s4994_s21 + $0x7f8] sm:$0xff]  ;;  %v769_v52 = vpack.c.bf16 %v535_v45, %v533_v44  ;;  %v753_v54 = vpack.c.bf16 %v503_v49, %v501_v48  ;;  %v559_v44 = vld [vmem:[%s4994_s21 + $0xa10] sm:$0xff] }
 0x141   : > { %v1151_v2 = vpop.trf.xlu1  ;;  %4139 = vmatpush3.bf16.msra.mxu0 %v4523_v56  ;;  %v539_v56 = vld [vmem:[%s4994_s21 + $0x970] sm:$0xff] }
 0x142   : > { %1256 = vxpose.xlu0.c.b16.cont [5/8] %v742_v57, 128  ;;  %4140 = vmatprep.subr.bf16.mxu0 %v4526_v58  ;;  %v505_v58 = vld [vmem:[%s4994_s21 + $0x860] sm:$0xff]  ;;  %v4537_v45 = vld [vmem:[#allocation5 + $0x290] sm:$0xff]  }
 0x143   : > { %1224 = vxpose.xlu1.c.b16.cont [5/8] %v726_v59, 128  ;;  %v507_v59 = vld [vmem:[%s4994_s21 + $0x870] sm:$0xff] }
 0x144   : > { %v1184_v9 = vpop.trf.xlu0  ;;  %v755_v1 = vpack.c.bf16 %v507_v59, %v505_v58  ;;  %v597_v59 = vld [vmem:[%s4994_s21 + $0xb40] sm:$0xff] }
 0x145   : > { %v5310_v11 = vpop.trf.xlu1  ;;  %4141 = vmatpush3.bf16.msra.mxu0 %v4527_v4  ;;  %v543_v4 = vld [vmem:[%s4994_s21 + $0x990] sm:$0xff] }
 0x146   : > { %1257 = vxpose.xlu0.c.b16.cont [6/8] %v744_v5, 128  ;;  %2343 = vmatmul.mubr.bf16.gmra.mxu0 %v1150_v55  ;;  %v537_v55 = vld [vmem:[%s4994_s21 + $0x960] sm:$0xff] }
 0x147   : > { %2278 = vmatmul.mubr.bf16.gmra.mxu1 %v5277_v20  ;;  %1225 = vxpose.xlu1.c.b16.cont [6/8] %v728_v7, 128  ;;  %v748_v20 = vpack.c.bf16 %v492_v17, %v490_v15  ;;  %v771_v0 = vpack.c.bf16 %v539_v56, %v537_v55  ;;  %v509_v7 = vld [vmem:[%s4994_s21 + $0x880] sm:$0xff]  ;;  %v515_v15 = vld [vmem:[%s4994_s21 + $0x8b0] sm:$0xff]  ;;  %v4543_v55 = vld [vmem:[#allocation5 + $0x288] sm:$0xff]  }
 0x148   : > { %2285 = vmatprep.mubr.bf16.mxu1 %v5282_v6  ;;  %2350 = vmatprep.mubr.bf16.mxu0 %v1183_v63  ;;  %v1185_v19 = vpop.trf.xlu0  ;;  %v4524_v63 = vld [vmem:[#allocation5 + $0x2e8] sm:$0xff]  }
 0x149   : > { %v5318_v23 = vpop.trf.xlu1  ;;  %4142 = vmatprep.subr.bf16.mxu0 %v4530_v12  ;;  %v545_v12 = vld [vmem:[%s4994_s21 + $0x9a0] sm:$0xff] }
 0x14a   : > { %1258 = vxpose.xlu0.c.b16.cont [7/8] %v746_v13, 128  ;;  %4143 = vmatpush3.bf16.msra.mxu0 %v4531_v14  ;;  %v547_v13 = vld [vmem:[%s4994_s21 + $0x9b0] sm:$0xff] }
 0x14b   : > { %1226 = vxpose.xlu1.c.b16.cont [7/8] %v730_v16, 128  ;;  %4144 = vmatprep.subr.bf16.mxu0 %v4534_v18  ;;  %v513_v16 = vld [vmem:[%s4994_s21 + $0x8a0] sm:$0xff] }
 0x14c   : > { %v5322_v6 = vpop.trf.xlu0  ;;  %v4529_v18 = vld [vmem:[#allocation5 + $0x2a0] sm:$0xff]   ;;  %v759_v21 = vpack.c.bf16 %v515_v15, %v513_v16 }
 0x14d   : > { %v5326_v32 = vpop.trf.xlu1 }
 0x14e   : > { %1259 = vxpose.xlu0.c.b16.end [8/8] %v748_v20, 128  ;;  %2351 = vmatmul.mubr.bf16.gmra.mxu0 %v1151_v2  ;;  %v541_v2 = vld [vmem:[%s4994_s21 + $0x980] sm:$0xff] }
 0x14f   : > { %2286 = vmatmul.mubr.bf16.gmra.mxu1 %v5286_v29  ;;  %1227 = vxpose.xlu1.c.b16.end [8/8] %v732_v24, 128  ;;  %v767_v29 = vpack.c.bf16 %v531_v36, %v529_v35  ;;  %v773_v10 = vpack.c.bf16 %v543_v4, %v541_v2  ;;  %v517_v24 = vld [vmem:[%s4994_s21 + $0x8c0] sm:$0xff] }
 0x150   : > { %2358 = vmatprep.mubr.bf16.mxu0 %v1184_v9  ;;  %v5331_v37 = vpop.trf.xlu0  ;;  %4145 = vmatpush3.bf16.msra.mxu0 %v4535_v31  ;;  %v4525_v9 = vld [vmem:[#allocation5 + $0x2a8] sm:$0xff]   ;;  %v761_v31 = vpack.c.bf16 %v519_v26, %v517_v24  ;;  %v521_v36 = vld [vmem:[%s4994_s21 + $0x8e0] sm:$0xff] }
 0x151   : > { %v5335_v41 = vpop.trf.xlu1  ;;  %4146 = vmatprep.subr.bf16.mxu0 %v4538_v25  ;;  %v553_v25 = vld [vmem:[%s4994_s21 + $0x9e0] sm:$0xff] }
 0x152   : > { %1300 = vxpose.xlu0.c.b16.start [1/8] %v765_v33, 128  ;;  %v555_v33 = vld [vmem:[%s4994_s21 + $0x9f0] sm:$0xff] }
 0x153   : > { %1268 = vxpose.xlu1.c.b16.start [1/8] %v749_v34, 128  ;;  %v4536_v34 = vld [vmem:[#allocation5 + $0x2d0] sm:$0xff]  }
 0x154   : > { %v1244_v46 = vpop.trf.xlu0  ;;  %4147 = vmatpush3.bf16.msra.mxu0 %v4539_v40  ;;  %v763_v40 = vpack.c.bf16 %v523_v38, %v521_v36 }
 0x155   : > { %2487 = vmatprep.mubr.bf16.mxu1 %v1244_v46  ;;  %v1212_v50 = vpop.trf.xlu1  ;;  %4148 = vmatprep.subr.bf16.mxu0 %v4540_v42  ;;  %v589_v42 = vld [vmem:[%s4994_s21 + $0xb00] sm:$0xff] }
 0x156   : > { %1301 = vxpose.xlu0.c.b16.cont [2/8] %v767_v29, 128  ;;  %2359 = vmatmul.mubr.bf16.gmra.mxu0 %v5310_v11  ;;  %v757_v11 = vpack.c.bf16 %v511_v8, %v509_v7  ;;  %v591_v29 = vld [vmem:[%s4994_s21 + $0xb10] sm:$0xff]  ;;  %v601_v8 = vld [vmem:[%s4994_s21 + $0xb60] sm:$0xff] }
 0x157   : > { %2488 = vmatmul.mubr.bf16.vlgmr.msra.gmra.mxu1 %v1212_v50  ;;  %1269 = vxpose.xlu1.c.b16.cont [2/8] %v751_v43, 128  ;;  %v557_v43 = vld [vmem:[%s4994_s21 + $0xa00] sm:$0xff]  ;;  %v797_v48 = vpack.c.bf16 %v591_v29, %v589_v42  ;;  %v615_v42 = vld [vmem:[%s4994_s21 + $0xbd0] sm:$0xff] }
 0x158   : > { %4247 = vmatpush3.bf16.msra.mxu1 %v4517_v47  ;;  %2366 = vmatprep.mubr.bf16.mxu0 %v1185_v19  ;;  %v1245_v57 = vpop.trf.xlu0  ;;  %v775_v19 = vpack.c.bf16 %v547_v13, %v545_v12  ;;  %v4542_v47 = vld [vmem:[#allocation5 + $0x2c8] sm:$0xff]   ;;  %v781_v49 = vpack.c.bf16 %v559_v44, %v557_v43  ;;  %v593_v50 = vld [vmem:[%s4994_s21 + $0xb20] sm:$0xff]  ;;  %v583_v44 = vld [vmem:[%s4994_s21 + $0xad0] sm:$0xff] }
 0x159   : > { %2495 = vmatprep.mubr.bf16.mxu1 %v1245_v57  ;;  %v1213_v61 = vpop.trf.xlu1  ;;  %4248 = vmatprep.subr.bf16.mxu1 %v4520_v51  ;;  %v595_v51 = vld [vmem:[%s4994_s21 + $0xb30] sm:$0xff]  ;;  %v581_v43 = vld [vmem:[%s4994_s21 + $0xac0] sm:$0xff] }
 0x15a   : > { %1302 = vxpose.xlu0.c.b16.cont [3/8] %v769_v52, 128  ;;  %4149 = vmatpush3.bf16.msra.mxu0 %v4541_v53  ;;  %v561_v53 = vld [vmem:[%s4994_s21 + $0xa20] sm:$0xff]  ;;  %v799_v57 = vpack.c.bf16 %v595_v51, %v593_v50  ;;  %v793_v50 = vpack.c.bf16 %v583_v44, %v581_v43 }
 0x15b   : > { %1270 = vxpose.xlu1.c.b16.cont [3/8] %v753_v54, 128  ;;  %v563_v54 = vld [vmem:[%s4994_s21 + $0xa30] sm:$0xff]  ;;  %v617_v51 = vld [vmem:[%s4994_s21 + $0xbe0] sm:$0xff] }
 0x15c   : > { %v1246_v5 = vpop.trf.xlu0  ;;  %4249 = vmatpush3.bf16.msra.mxu1 %v4521_v60  ;;  %v783_v58 = vpack.c.bf16 %v563_v54, %v561_v53  ;;  %v599_v60 = vld [vmem:[%s4994_s21 + $0xb50] sm:$0xff] }
 0x15d   : > { %v1214_v62 = vpop.trf.xlu1  ;;  %4250 = vmatprep.subr.bf16.mxu1 %v4524_v63  ;;  %v565_v63 = vld [vmem:[%s4994_s21 + $0xa40] sm:$0xff]  ;;  %v619_v53 = vld [vmem:[%s4994_s21 + $0xbf0] sm:$0xff] }
 0x15e   : > { %1303 = vxpose.xlu0.c.b16.cont [4/8] %v771_v0, 128  ;;  %2367 = vmatmul.mubr.bf16.gmra.mxu0 %v5318_v23  ;;  %v551_v23 = vld [vmem:[%s4994_s21 + $0x9d0] sm:$0xff] }
 0x15f   : > { %2496 = vmatmul.mubr.bf16.gmra.mxu1 %v1213_v61  ;;  %1271 = vxpose.xlu1.c.b16.cont [4/8] %v755_v1, 128  ;;  %v777_v30 = vpack.c.bf16 %v551_v23, %v549_v22  ;;  %v567_v0 = vld [vmem:[%s4994_s21 + $0xa50] sm:$0xff]  ;;  %v4545_v1 = vld [vmem:[#allocation5 + $0x280] sm:$0xff]  }
 0x160   : > { %2374 = vmatprep.mubr.bf16.mxu0 %v5322_v6  ;;  %2503 = vmatprep.mubr.bf16.mxu1 %v1246_v5  ;;  %v1247_v14 = vpop.trf.xlu0  ;;  %v4532_v6 = vld [vmem:[#allocation5 + $0x2d8] sm:$0xff]   ;;  %v801_v5 = vpack.c.bf16 %v599_v60, %v597_v59  ;;  %v785_v7 = vpack.c.bf16 %v567_v0, %v565_v63  ;;  %v573_v22 = vld [vmem:[%s4994_s21 + $0xa80] sm:$0xff]  ;;  %v575_v23 = vld [vmem:[%s4994_s21 + $0xa90] sm:$0xff]  ;;  %v811_v60 = vpack.c.bf16 %v619_v53, %v617_v51 }
 0x161   : > { %v1215_v17 = vpop.trf.xlu1  ;;  %4251 = vmatpush3.bf16.msra.mxu1 %v4525_v9  ;;  %v526_v63 = vld [vmem:[%s4994_s21 + $0x908] sm:$0xff]  ;;  %v528_v0 = vld [vmem:[%s4994_s21 + $0x918] sm:$0xff] }
 0x162   : > { %1304 = vxpose.xlu0.c.b16.cont [5/8] %v773_v10, 128  ;;  %4252 = vmatprep.subr.bf16.mxu1 %v4528_v3  ;;  %v569_v3 = vld [vmem:[%s4994_s21 + $0xa60] sm:$0xff]  ;;  %v542_v53 = vld [vmem:[%s4994_s21 + $0x988] sm:$0xff] }
 0x163   : > { %1272 = vxpose.xlu1.c.b16.cont [5/8] %v757_v11, 128  ;;  %v571_v11 = vld [vmem:[%s4994_s21 + $0xa70] sm:$0xff] }
 0x164   : > { %v1248_v20 = vpop.trf.xlu0  ;;  %v787_v15 = vpack.c.bf16 %v571_v11, %v569_v3  ;;  %v532_v3 = vld [vmem:[%s4994_s21 + $0x938] sm:$0xff] }
 0x165   : > { %v5360_v27 = vpop.trf.xlu1  ;;  %4253 = vmatpush3.bf16.msra.mxu1 %v4529_v18  ;;  %v607_v18 = vld [vmem:[%s4994_s21 + $0xb90] sm:$0xff] }
 0x166   : > { %1305 = vxpose.xlu0.c.b16.cont [6/8] %v775_v19, 128  ;;  %2375 = vmatmul.mubr.bf16.gmra.mxu0 %v5326_v32  ;;  %v779_v32 = vpack.c.bf16 %v555_v33, %v553_v25  ;;  %v577_v33 = vld [vmem:[%s4994_s21 + $0xaa0] sm:$0xff] }
 0x167   : > { %2504 = vmatmul.mubr.bf16.gmra.mxu1 %v1214_v62  ;;  %1273 = vxpose.xlu1.c.b16.cont [6/8] %v759_v21, 128  ;;  %v603_v62 = vld [vmem:[%s4994_s21 + $0xb70] sm:$0xff] }
 0x168   : > { %2382 = vmatprep.mubr.bf16.mxu0 %v5331_v37  ;;  %2511 = vmatprep.mubr.bf16.mxu1 %v1247_v14  ;;  %v1249_v35 = vpop.trf.xlu0  ;;  %v803_v16 = vpack.c.bf16 %v603_v62, %v601_v8  ;;  %v766_v62 = vpack.c.bf16 %v528_v0, %v526_v63 }
 0x169   : > { %v5368_v39 = vpop.trf.xlu1  ;;  %4254 = vmatprep.subr.bf16.mxu1 %v4532_v6  ;;  %v789_v6 = vpack.c.bf16 %v575_v23, %v573_v22  ;;  %v536_v22 = vld [vmem:[%s4994_s21 + $0x958] sm:$0xff] }
 0x16a   : > { %1306 = vxpose.xlu0.c.b16.cont [7/8] %v777_v30, 128  ;;  %4255 = vmatpush3.bf16.msra.mxu1 %v4533_v28  ;;  %v609_v30 = vld [vmem:[%s4994_s21 + $0xba0] sm:$0xff]  ;;  %v611_v28 = vld [vmem:[%s4994_s21 + $0xbb0] sm:$0xff] }
 0x16b   : > { %1274 = vxpose.xlu1.c.b16.cont [7/8] %v761_v31, 128  ;;  %4256 = vmatprep.subr.bf16.mxu1 %v4536_v34  ;;  %v579_v34 = vld [vmem:[%s4994_s21 + $0xab0] sm:$0xff] }
 0x16c   : > { %v5372_v37 = vpop.trf.xlu0 }
 0x16d   : > { %v5376_v46 = vpop.trf.xlu1 }
 0x16e   : > { %1307 = vxpose.xlu0.c.b16.end [8/8] %v779_v32, 128  ;;  %2383 = vmatmul.mubr.bf16.gmra.mxu0 %v5335_v41  ;;  %v4544_v41 = vld [vmem:[#allocation5 + $0x2c0] sm:$0xff]   ;;  %v791_v32 = vpack.c.bf16 %v579_v34, %v577_v33 }
 0x16f   : > { %2512 = vmatmul.mubr.bf16.gmra.mxu1 %v1215_v17  ;;  %1275 = vxpose.xlu1.c.b16.end [8/8] %v763_v40, 128  ;;  %v605_v17 = vld [vmem:[%s4994_s21 + $0xb80] sm:$0xff] }
 0x170   : > { %2519 = vmatprep.mubr.bf16.mxu1 %v1248_v20  ;;  %v5381_v52 = vpop.trf.xlu0  ;;  %4257 = vmatpush3.bf16.msra.mxu1 %v4537_v45  ;;  %v613_v40 = vld [vmem:[%s4994_s21 + $0xbc0] sm:$0xff] }
 0x171   : > { %v5385_v56 = vpop.trf.xlu1  ;;  %4258 = vmatprep.subr.bf16.mxu1 %v4542_v47 }
 0x172   : > { %1364 = vxpose.xlu0.c.b16.start [1/8] %v797_v48, 128 }
 0x173   : > { %1332 = vxpose.xlu1.c.b16.start [1/8] %v781_v49, 128  ;;  %v809_v49 = vpack.c.bf16 %v615_v42, %v613_v40  ;;  %v506_v40 = vld [vmem:[%s4994_s21 + $0x868] sm:$0xff]  ;;  %v508_v42 = vld [vmem:[%s4994_s21 + $0x878] sm:$0xff] }
 0x174   : > { %v1196_v61 = vpop.trf.xlu0  ;;  %4259 = vmatpush3.bf16.msra.mxu1 %v4543_v55  ;;  %v756_v51 = vpack.c.bf16 %v508_v42, %v506_v40 }
 0x175   : > { %2390 = vmatprep.mubr.bf16.mxu0 %v1196_v61  ;;  %v1164_v2 = vpop.trf.xlu1  ;;  %4260 = vmatprep.subr.bf16.mxu1 %v4544_v41  ;;  %v585_v41 = vld [vmem:[%s4994_s21 + $0xae0] sm:$0xff] }
 0x176   : > { %1365 = vxpose.xlu0.c.b16.cont [2/8] %v799_v57, 128  ;;  %v3702_v4 = vpop.f32.mrf.mxu0  ;;  %2391 = vmatmul.mubr.bf16.gmra.mxu0 %v1164_v2  ;;  %v587_v57 = vld [vmem:[%s4994_s21 + $0xaf0] sm:$0xff]  ;;  %v494_v2 = vld [vmem:[%s4994_s21 + $0x808] sm:$0xff] }
 0x177   : > { %2520 = vmatmul.mubr.bf16.gmra.mxu1 %v5360_v27  ;;  %1333 = vxpose.xlu1.c.b16.cont [2/8] %v783_v58, 128  ;;  %v805_v27 = vpack.c.bf16 %v607_v18, %v605_v17  ;;  %v795_v61 = vpack.c.bf16 %v587_v57, %v585_v41 }
 0x178   : > { %2527 = vmatprep.mubr.bf16.mxu1 %v1249_v35  ;;  %v1197_v9 = vpop.trf.xlu0  ;;  %v3703_v10 = vpop.f32.mrf.mxu0  ;;  %4261 = vmatpush3.bf16.msra.mxu1 %v4545_v1 }
 0x179   : > { %v5396_v12 = vadd.f32 %v3703_v10, %v3702_v4  ;;  %2398 = vmatprep.mubr.bf16.mxu0 %v1197_v9  ;;  %v1165_v13 = vpop.trf.xlu1  ;;  %v496_v4 = vld [vmem:[%s4994_s21 + $0x818] sm:$0xff]  ;;  %v530_v10 = vld [vmem:[%s4994_s21 + $0x928] sm:$0xff] }
 0x17a   : > { %1366 = vxpose.xlu0.c.b16.cont [3/8] %v801_v5, 128  ;;  %v3705_v14 = vpop.f32.mrf.mxu0  ;;  %v750_v9 = vpack.c.bf16 %v496_v4, %v494_v2  ;;  %v768_v18 = vpack.c.bf16 %v532_v3, %v530_v10  ;;  %v548_v10 = vld [vmem:[%s4994_s21 + $0x9b8] sm:$0xff] }
 0x17b   : > { %1334 = vxpose.xlu1.c.b16.cont [3/8] %v785_v7, 128 }
 0x17c   : > { %v1198_v19 = vpop.trf.xlu0  ;;  %v3706_v21 = vpop.f32.mrf.mxu0 }
 0x17d   : > { %v5402_v20 = vadd.f32 %v3706_v21, %v3705_v14  ;;  %v1166_v24 = vpop.trf.xlu1  ;;  %v498_v14 = vld [vmem:[%s4994_s21 + $0x828] sm:$0xff] }
 0x17e   : > { %1367 = vxpose.xlu0.c.b16.cont [4/8] %v803_v16, 128  ;;  %v3708_v26 = vpop.f32.mrf.mxu0  ;;  %2399 = vmatmul.mubr.bf16.gmra.mxu0 %v1165_v13  ;;  %v500_v16 = vld [vmem:[%s4994_s21 + $0x838] sm:$0xff]  ;;  %v534_v21 = vld [vmem:[%s4994_s21 + $0x948] sm:$0xff] }
 0x17f   : > { %2528 = vmatmul.mubr.bf16.gmra.mxu1 %v5368_v39  ;;  %1335 = vxpose.xlu1.c.b16.cont [4/8] %v787_v15, 128  ;;  %v807_v39 = vpack.c.bf16 %v611_v28, %v609_v30 }
 0x180   : > { %2406 = vmatprep.mubr.bf16.mxu0 %v1198_v19  ;;  %2535 = vmatprep.mubr.bf16.mxu1 %v5372_v37  ;;  %v1199_v31 = vpop.trf.xlu0  ;;  %v3709_v25 = vpop.f32.mrf.mxu0  ;;  %v752_v19 = vpack.c.bf16 %v500_v16, %v498_v14  ;;  %v514_v14 = vld [vmem:[%s4994_s21 + $0x8a8] sm:$0xff]  ;;  %v516_v16 = vld [vmem:[%s4994_s21 + $0x8b8] sm:$0xff] }
 0x181   : > { %v5410_v35 = vadd.f32 %v3709_v25, %v3708_v26  ;;  %v1167_v36 = vpop.trf.xlu1  ;;  %v502_v26 = vld [vmem:[%s4994_s21 + $0x848] sm:$0xff]  ;;  %v5455_v25 = vld [vmem:[#allocation7] ss:$0 sm:$0xff] }
 0x182   : > { %1368 = vxpose.xlu0.c.b16.cont [5/8] %v805_v27, 128  ;;  %v3711_v38 = vpop.f32.mrf.mxu0  ;;  %v504_v27 = vld [vmem:[%s4994_s21 + $0x858] sm:$0xff]  ;;  %v2007_v44 = vadd.f32 %v5396_v12, %v5455_v25  ;;  %v2010_v0 = vadd.f32 %v5402_v20, %v5455_v25 }
 0x183   : > { %1336 = vxpose.xlu1.c.b16.cont [5/8] %v789_v6, 128  ;;  %v754_v34 = vpack.c.bf16 %v504_v27, %v502_v26  ;;  %v550_v26 = vld [vmem:[%s4994_s21 + $0x9c8] sm:$0xff]  ;;  %v552_v27 = vld [vmem:[%s4994_s21 + $0x9d8] sm:$0xff] }
 0x184   : > { %v1200_v29 = vpop.trf.xlu0  ;;  %v3712_v37 = vpop.f32.mrf.mxu0  ;;  %v778_v42 = vpack.c.bf16 %v552_v27, %v550_v26  ;;  %v564_v26 = vld [vmem:[%s4994_s21 + $0xa38] sm:$0xff] }
 0x185   : > { %v5416_v45 = vadd.f32 %v3712_v37, %v3711_v38  ;;  %v1168_v47 = vpop.trf.xlu1  ;;  %v540_v38 = vld [vmem:[%s4994_s21 + $0x978] sm:$0xff] }
 0x186   : > { %1369 = vxpose.xlu0.c.b16.cont [6/8] %v807_v39, 128  ;;  %v3714_v48 = vpop.f32.mrf.mxu0  ;;  %2407 = vmatmul.mubr.bf16.gmra.mxu0 %v1166_v24 }
 0x187   : > { %2536 = vmatmul.mubr.bf16.gmra.mxu1 %v5376_v46  ;;  %1337 = vxpose.xlu1.c.b16.cont [6/8] %v791_v32, 128 }
 0x188   : > { %2414 = vmatprep.mubr.bf16.mxu0 %v1199_v31  ;;  %2543 = vmatprep.mubr.bf16.mxu1 %v5381_v52  ;;  %v1201_v54 = vpop.trf.xlu0  ;;  %v3715_v55 = vpop.f32.mrf.mxu0  ;;  %v770_v31 = vpack.c.bf16 %v536_v22, %v534_v21 }
 0x189   : > { %v5424_v58 = vadd.f32 %v3715_v55, %v3714_v48  ;;  %v5426_v59 = vpop.trf.xlu1 }
 0x18a   : > { %1370 = vxpose.xlu0.c.b16.cont [7/8] %v809_v49, 128  ;;  %v3717_v46 = vpop.f32.mrf.mxu0 }
 0x18b   : > { %1338 = vxpose.xlu1.c.b16.cont [7/8] %v793_v50, 128 }
 0x18c   : > { %v5430_v52 = vpop.trf.xlu0  ;;  %v3718_v1 = vpop.f32.mrf.mxu0 }
 0x18d   : > { %v5434_v5 = vadd.f32 %v3718_v1, %v3717_v46  ;;  %v5436_v7 = vpop.trf.xlu1  ;;  %v510_v46 = vld [vmem:[%s4994_s21 + $0x888] sm:$0xff] }
 0x18e   : > { %1371 = vxpose.xlu0.c.b16.end [8/8] %v811_v60, 128  ;;  %v3720_v8 = vpop.f32.mrf.mxu0  ;;  %2415 = vmatmul.mubr.bf16.gmra.mxu0 %v1167_v36  ;;  %v538_v36 = vld [vmem:[%s4994_s21 + $0x968] sm:$0xff]  ;;  %v512_v60 = vld [vmem:[%s4994_s21 + $0x898] sm:$0xff] }
 0x18f   : > { %2544 = vmatmul.mubr.bf16.gmra.mxu1 %v5385_v56  ;;  %1339 = vxpose.xlu1.c.b16.end [8/8] %v795_v61, 128  ;;  %v772_v49 = vpack.c.bf16 %v540_v38, %v538_v36 }
 0x190   : > { %2422 = vmatprep.mubr.bf16.mxu0 %v1200_v29  ;;  %v5441_v11 = vpop.trf.xlu0  ;;  %v3721_v13 = vpop.f32.mrf.mxu0 }
 0x191   : > { %v5445_v15 = vadd.f32 %v3721_v13, %v3720_v8  ;;  %v5447_v17 = vpop.trf.xlu1 }
 0x192   : > { %1316 = vxpose.xlu0.c.b16.start [1/8] %v766_v62, 128  ;;  %v3723_v56 = vpop.f32.mrf.mxu0  ;;  %v758_v62 = vpack.c.bf16 %v512_v60, %v510_v46 }
 0x193   : > { %1284 = vxpose.xlu1.c.b16.start [1/8] %v750_v9, 128  ;;  %v546_v9 = vld [vmem:[%s4994_s21 + $0x9a8] sm:$0xff] }
 0x194   : > { %v1260_v23 = vpop.trf.xlu0  ;;  %v3724_v24 = vpop.f32.mrf.mxu0  ;;  %v776_v22 = vpack.c.bf16 %v548_v10, %v546_v9 }
 0x195   : > { %v5453_v6 = vadd.f32 %v3724_v24, %v3723_v56  ;;  %2551 = vmatprep.mubr.bf16.mxu1 %v1260_v23  ;;  %v1228_v30 = vpop.trf.xlu1  ;;  %v760_v24 = vpack.c.bf16 %v516_v16, %v514_v14 }
 0x196   : > { %1317 = vxpose.xlu0.c.b16.cont [2/8] %v768_v18, 128  ;;  %v3726_v28 = vpop.f32.mrf.mxu0  ;;  %2423 = vmatmul.mubr.bf16.gmra.mxu0 %v1168_v47 }
 0x197   : > { %v3814_v33 = vpop.f32.mrf.mxu1  ;;  %2552 = vmatmul.mubr.bf16.gmra.mxu1 %v1228_v30  ;;  %1285 = vxpose.xlu1.c.b16.cont [2/8] %v752_v19, 128  ;;  %v2015_v19 = vadd.f32 %v5410_v35, %v5455_v25 }
 0x198   : > { %2430 = vmatprep.mubr.bf16.mxu0 %v1201_v54  ;;  %v1261_v39 = vpop.trf.xlu0  ;;  %v3727_v32 = vpop.f32.mrf.mxu0  ;;  %v544_v54 = vld [vmem:[%s4994_s21 + $0x998] sm:$0xff] }
 0x199   : > { %v5461_v29 = vadd.f32 %v3727_v32, %v3726_v28  ;;  %v3815_v37 = vpop.f32.mrf.mxu1  ;;  %2559 = vmatprep.mubr.bf16.mxu1 %v1261_v39  ;;  %v1229_v43 = vpop.trf.xlu1  ;;  %v774_v4 = vpack.c.bf16 %v544_v54, %v542_v53  ;;  %v2018_v39 = vadd.f32 %v5416_v45, %v5455_v25 }
 0x19a   : > { %v3816_v47 = vadd.f32 %v3815_v37, %v3814_v33  ;;  %1318 = vxpose.xlu0.c.b16.cont [3/8] %v770_v31, 128  ;;  %v3729_v48 = vpop.f32.mrf.mxu0  ;;  %v518_v33 = vld [vmem:[%s4994_s21 + $0x8c8] sm:$0xff] }
 0x19b   : > { %v3817_v50 = vpop.f32.mrf.mxu1  ;;  %1286 = vxpose.xlu1.c.b16.cont [3/8] %v754_v34, 128  ;;  %v520_v34 = vld [vmem:[%s4994_s21 + $0x8d8] sm:$0xff] }
 0x19c   : > { %v5467_v55 = vadd.f32 %v3816_v47, %v2007_v44  ;;  %v1262_v41 = vpop.trf.xlu0  ;;  %v3730_v57 = vpop.f32.mrf.mxu0  ;;  %v554_v44 = vld [vmem:[%s4994_s21 + $0x9e8] sm:$0xff]  ;;  %v556_v47 = vld [vmem:[%s4994_s21 + $0x9f8] sm:$0xff] }
 0x19d   : > { %v5471_v61 = vadd.f32 %v3730_v57, %v3729_v48  ;;  %v3818_v12 = vpop.f32.mrf.mxu1  ;;  %v1230_v63 = vpop.trf.xlu1  ;;  %v780_v46 = vpack.c.bf16 %v556_v47, %v554_v44  ;;  %v566_v44 = vld [vmem:[%s4994_s21 + $0xa48] sm:$0xff]  ;;  %v568_v47 = vld [vmem:[%s4994_s21 + $0xa58] sm:$0xff] }
 0x19e   : > { %v3819_v1 = vadd.f32 %v3818_v12, %v3817_v50  ;;  %1319 = vxpose.xlu0.c.b16.cont [4/8] %v772_v49, 128  ;;  %v3732_v2 = vpop.f32.mrf.mxu0  ;;  %2431 = vmatmul.mubr.bf16.gmra.mxu0 %v5426_v59  ;;  %v522_v50 = vld [vmem:[%s4994_s21 + $0x8e8] sm:$0xff] }
 0x19f   : > { %v3820_v8 = vpop.f32.mrf.mxu1  ;;  %2560 = vmatmul.mubr.bf16.gmra.mxu1 %v1229_v43  ;;  %1287 = vxpose.xlu1.c.b16.cont [4/8] %v756_v51, 128  ;;  %v762_v43 = vpack.c.bf16 %v520_v34, %v518_v33  ;;  %v524_v51 = vld [vmem:[%s4994_s21 + $0x8f8] sm:$0xff] }
 0x1a0   : > { %v5478_v3 = vadd.f32 %v3819_v1, %v2010_v0  ;;  %2438 = vmatprep.mubr.bf16.mxu0 %v5430_v52  ;;  %2567 = vmatprep.mubr.bf16.mxu1 %v1262_v41  ;;  %v1263_v20 = vpop.trf.xlu0  ;;  %v3733_v13 = vpop.f32.mrf.mxu0  ;;  %v2023_v41 = vadd.f32 %v5424_v58, %v5455_v25  ;;  %v764_v12 = vpack.c.bf16 %v524_v51, %v522_v50  ;;  %v592_v0 = vld [vmem:[%s4994_s21 + $0xb18] sm:$0xff] }
 0x1a1   : > { %v5483_v56 = vadd.f32 %v3733_v13, %v3732_v2  ;;  %v3821_v59 = vpop.f32.mrf.mxu1  ;;  %v5485_v18 = vpop.trf.xlu1  ;;  %v2034_v51 = vadd.f32 %v5453_v6, %v5455_v25 }
 0x1a2   : > { %v3822_v21 = vadd.f32 %v3821_v59, %v3820_v8  ;;  %1320 = vxpose.xlu0.c.b16.cont [5/8] %v774_v4, 128  ;;  %v3735_v52 = vpop.f32.mrf.mxu0  ;;  %v558_v8 = vld [vmem:[%s4994_s21 + $0xa08] sm:$0xff] }
 0x1a3   : > { %v3823_v23 = vpop.f32.mrf.mxu1  ;;  %1288 = vxpose.xlu1.c.b16.cont [5/8] %v758_v62, 128  ;;  %v560_v62 = vld [vmem:[%s4994_s21 + $0xa18] sm:$0xff] }
 0x1a4   : > { %v5491_v30 = vadd.f32 %v3822_v21, %v2015_v19  ;;  %v1264_v28 = vpop.trf.xlu0  ;;  %v3736_v31 = vpop.f32.mrf.mxu0  ;;  %v782_v19 = vpack.c.bf16 %v560_v62, %v558_v8  ;;  %v594_v21 = vld [vmem:[%s4994_s21 + $0xb28] sm:$0xff]  ;;  %v572_v8 = vld [vmem:[%s4994_s21 + $0xa78] sm:$0xff] }
 0x1a5   : > { %v5495_v36 = vadd.f32 %v3736_v31, %v3735_v52  ;;  %v3824_v35 = vpop.f32.mrf.mxu1  ;;  %v5497_v38 = vpop.trf.xlu1  ;;  %v596_v52 = vld [vmem:[%s4994_s21 + $0xb38] sm:$0xff]  ;;  %v2031_v31 = vadd.f32 %v5445_v15, %v5455_v25 }
 0x1a6   : > { %v3825_v32 = vadd.f32 %v3824_v35, %v3823_v23  ;;  %1321 = vxpose.xlu0.c.b16.cont [6/8] %v776_v22, 128  ;;  %v3738_v40 = vpop.f32.mrf.mxu0  ;;  %2439 = vmatmul.mubr.bf16.gmra.mxu0 %v5436_v7  ;;  %v800_v34 = vpack.c.bf16 %v596_v52, %v594_v21  ;;  %v608_v21 = vld [vmem:[%s4994_s21 + $0xb98] sm:$0xff] }
 0x1a7   : > { %v3826_v37 = vpop.f32.mrf.mxu1  ;;  %2568 = vmatmul.mubr.bf16.gmra.mxu1 %v1230_v63  ;;  %1289 = vxpose.xlu1.c.b16.cont [6/8] %v760_v24, 128  ;;  %v590_v63 = vld [vmem:[%s4994_s21 + $0xb08] sm:$0xff] }
 0x1a8   : > { %v5504_v48 = vadd.f32 %v3825_v32, %v2018_v39  ;;  %2446 = vmatprep.mubr.bf16.mxu0 %v5441_v11  ;;  %2575 = vmatprep.mubr.bf16.mxu1 %v1263_v20  ;;  %v5507_v45 = vpop.trf.xlu0  ;;  %v3739_v49 = vpop.f32.mrf.mxu0  ;;  %v2026_v20 = vadd.f32 %v5434_v5, %v5455_v25  ;;  %v798_v16 = vpack.c.bf16 %v592_v0, %v590_v63  ;;  %v562_v24 = vld [vmem:[%s4994_s21 + $0xa28] sm:$0xff] }
 0x1a9   : > { %v5511_v7 = vadd.f32 %v3739_v49, %v3738_v40  ;;  %v3827_v53 = vpop.f32.mrf.mxu1  ;;  %v5513_v54 = vpop.trf.xlu1  ;;  %v784_v39 = vpack.c.bf16 %v564_v26, %v562_v24  ;;  %v598_v32 = vld [vmem:[%s4994_s21 + $0xb48] sm:$0xff]  ;;  %v600_v40 = vld [vmem:[%s4994_s21 + $0xb58] sm:$0xff] }
 0x1aa   : > { %v3828_v57 = vadd.f32 %v3827_v53, %v3826_v37  ;;  %1322 = vxpose.xlu0.c.b16.cont [7/8] %v778_v42, 128  ;;  %v3741_v11 = vpop.f32.mrf.mxu0  ;;  %v574_v26 = vld [vmem:[%s4994_s21 + $0xa88] sm:$0xff] }
 0x1ab   : > { %v3829_v60 = vpop.f32.mrf.mxu1  ;;  %1290 = vxpose.xlu1.c.b16.cont [7/8] %v762_v43, 128 }
 0x1ac   : > { %v5519_v1 = vadd.f32 %v3828_v57, %v2023_v41  ;;  %v5521_v2 = vpop.trf.xlu0  ;;  %v3742_v4 = vpop.f32.mrf.mxu0  ;;  %v802_v57 = vpack.c.bf16 %v600_v40, %v598_v32 }
 0x1ad   : > { %v5525_v9 = vadd.f32 %v3742_v4, %v3741_v11  ;;  %v3830_v58 = vpop.f32.mrf.mxu1  ;;  %v5527_v10 = vpop.trf.xlu1  ;;  %v570_v4 = vld [vmem:[%s4994_s21 + $0xa68] sm:$0xff] }
 0x1ae   : > { %v3831_v13 = vadd.f32 %v3830_v58, %v3829_v60  ;;  %1323 = vxpose.xlu0.c.b16.end [8/8] %v780_v46, 128  ;;  %v3744_v14 = vpop.f32.mrf.mxu0  ;;  %2447 = vmatmul.mubr.bf16.gmra.mxu0 %v5447_v17  ;;  %v786_v46 = vpack.c.bf16 %v568_v47, %v566_v44  ;;  %v602_v60 = vld [vmem:[%s4994_s21 + $0xb68] sm:$0xff] }
 0x1af   : > { %v3832_v59 = vpop.f32.mrf.mxu1  ;;  %2576 = vmatmul.mubr.bf16.gmra.mxu1 %v5485_v18  ;;  %1291 = vxpose.xlu1.c.b16.end [8/8] %v764_v12, 128  ;;  %v604_v12 = vld [vmem:[%s4994_s21 + $0xb78] sm:$0xff] }
 0x1b0   : > { %v5535_v22 = vadd.f32 %v3831_v13, %v2026_v20  ;;  %2583 = vmatprep.mubr.bf16.mxu1 %v1264_v28  ;;  %v5537_v5 = vpop.trf.xlu0  ;;  %v3745_v23 = vpop.f32.mrf.mxu0  ;;  %v2039_v20 = vadd.f32 %v5461_v29, %v5455_v25 }
 0x1b1   : > { %v5541_v27 = vadd.f32 %v3745_v23, %v3744_v14  ;;  %v3833_v17 = vpop.f32.mrf.mxu1  ;;  %v5543_v18 = vpop.trf.xlu1 }
 0x1b2   : > { %v3834_v33 = vadd.f32 %v3833_v17, %v3832_v59  ;;  %1380 = vxpose.xlu0.c.b16.start [1/8] %v798_v16, 128  ;;  %v3747_v28 = vpop.f32.mrf.mxu0  ;;  %v788_v59 = vpack.c.bf16 %v572_v8, %v570_v4  ;;  %v576_v17 = vld [vmem:[%s4994_s21 + $0xa98] sm:$0xff] }
 0x1b3   : > { %v3835_v35 = vpop.f32.mrf.mxu1  ;;  %1348 = vxpose.xlu1.c.b16.start [1/8] %v782_v19, 128  ;;  %v606_v19 = vld [vmem:[%s4994_s21 + $0xb88] sm:$0xff]  ;;  %v790_v40 = vpack.c.bf16 %v576_v17, %v574_v26 }
 0x1b4   : > { %v5549_v42 = vadd.f32 %v3834_v33, %v2031_v31  ;;  %v1308_v37 = vpop.trf.xlu0  ;;  %v3748_v43 = vpop.f32.mrf.mxu0 }
 0x1b5   : > { %v5553_v49 = vadd.f32 %v3748_v43, %v3747_v28  ;;  %v3836_v15 = vpop.f32.mrf.mxu1  ;;  %2648 = vmatprep.mubr.bf16.mxu0 %v1308_v37  ;;  %v1276_v50 = vpop.trf.xlu1  ;;  %v2042_v28 = vadd.f32 %v5471_v61, %v5455_v25  ;;  %v610_v37 = vld [vmem:[%s4994_s21 + $0xba8] sm:$0xff]  ;;  %v612_v43 = vld [vmem:[%s4994_s21 + $0xbb8] sm:$0xff] }
 0x1b6   : > { %v3837_v53 = vadd.f32 %v3836_v15, %v3835_v35  ;;  %1381 = vxpose.xlu0.c.b16.cont [2/8] %v800_v34, 128  ;;  %v3750_v41 = vpop.f32.mrf.mxu0  ;;  %2649 = vmatmul.mubr.bf16.vlgmr.msra.gmra.mxu0 %v1276_v50  ;;  %v578_v15 = vld [vmem:[%s4994_s21 + $0xaa8] sm:$0xff]  ;;  %v580_v50 = vld [vmem:[%s4994_s21 + $0xab8] sm:$0xff] }
 0x1b7   : > { %v3838_v11 = vpop.f32.mrf.mxu1  ;;  %2584 = vmatmul.mubr.bf16.gmra.mxu1 %v5497_v38  ;;  %1349 = vxpose.xlu1.c.b16.cont [2/8] %v784_v39, 128  ;;  %v806_v39 = vpack.c.bf16 %v608_v21, %v606_v19 }
 0x1b8   : > { %v5560_v63 = vadd.f32 %v3837_v53, %v2034_v51  ;;  %2591 = vmatprep.mubr.bf16.mxu1 %v5507_v45  ;;  %v1309_v0 = vpop.trf.xlu0  ;;  %v3751_v6 = vpop.f32.mrf.mxu0  ;;  %v804_v45 = vpack.c.bf16 %v604_v12, %v602_v60  ;;  %v792_v60 = vpack.c.bf16 %v580_v50, %v578_v15  ;;  %v614_v12 = vld [vmem:[%s4994_s21 + $0xbc8] sm:$0xff] }
 0x1b9   : > { %v5565_v62 = vadd.f32 %v3751_v6, %v3750_v41  ;;  %v3839_v58 = vpop.f32.mrf.mxu1  ;;  %2656 = vmatprep.mubr.bf16.mxu0 %v1309_v0  ;;  %v1277_v38 = vpop.trf.xlu1  ;;  %v2047_v41 = vadd.f32 %v5483_v56, %v5455_v25  ;;  %v616_v0 = vld [vmem:[%s4994_s21 + $0xbd8] sm:$0xff] }
 0x1ba   : > { %v3840_v13 = vadd.f32 %v3839_v58, %v3838_v11  ;;  %1382 = vxpose.xlu0.c.b16.cont [3/8] %v802_v57, 128  ;;  %v3753_v14 = vpop.f32.mrf.mxu0  ;;  %v582_v58 = vld [vmem:[%s4994_s21 + $0xac8] sm:$0xff] }
 0x1bb   : > { %v3841_v16 = vpop.f32.mrf.mxu1  ;;  %1350 = vxpose.xlu1.c.b16.cont [3/8] %v786_v46, 128 }
 0x1bc   : > { %v5571_v52 = vadd.f32 %v3840_v13, %v2039_v20  ;;  %v1310_v23 = vpop.trf.xlu0  ;;  %v3754_v24 = vpop.f32.mrf.mxu0 }
 0x1bd   : > { %v5575_v31 = vadd.f32 %v3754_v24, %v3753_v14  ;;  %v3842_v29 = vpop.f32.mrf.mxu1  ;;  %v1278_v33 = vpop.trf.xlu1  ;;  %v2050_v14 = vadd.f32 %v5495_v36, %v5455_v25  ;;  %v620_v24 = vld [vmem:[%s4994_s21 + $0xbf8] sm:$0xff] }
 0x1be   : > { %v3843_v34 = vadd.f32 %v3842_v29, %v3841_v16  ;;  %1383 = vxpose.xlu0.c.b16.cont [4/8] %v804_v45, 128  ;;  %v3756_v35 = vpop.f32.mrf.mxu0  ;;  %2657 = vmatmul.mubr.bf16.gmra.mxu0 %v1277_v38  ;;  %v584_v38 = vld [vmem:[%s4994_s21 + $0xad8] sm:$0xff]  ;;  %v586_v29 = vld [vmem:[%s4994_s21 + $0xae8] sm:$0xff] }
 0x1bf   : > { %v3844_v32 = vpop.f32.mrf.mxu1  ;;  %2592 = vmatmul.mubr.bf16.gmra.mxu1 %v5513_v54  ;;  %1351 = vxpose.xlu1.c.b16.cont [4/8] %v788_v59, 128  ;;  %v810_v59 = vpack.c.bf16 %v616_v0, %v614_v12  ;;  %v794_v21 = vpack.c.bf16 %v584_v38, %v582_v58 }
 0x1c0   : > { %v5582_v44 = vadd.f32 %v3843_v34, %v2042_v28  ;;  %2599 = vmatprep.mubr.bf16.mxu1 %v5521_v2  ;;  %2664 = vmatprep.mubr.bf16.mxu0 %v1310_v23  ;;  %v1311_v61 = vpop.trf.xlu0  ;;  %v3757_v47 = vpop.f32.mrf.mxu0  ;;  %v808_v2 = vpack.c.bf16 %v612_v43, %v610_v37  ;;  %v618_v23 = vld [vmem:[%s4994_s21 + $0xbe8] sm:$0xff]  ;;  %v588_v28 = vld [vmem:[%s4994_s21 + $0xaf8] sm:$0xff] }
 0x1c1   : > { %v5587_v51 = vadd.f32 %v3757_v47, %v3756_v35  ;;  %v3845_v53 = vpop.f32.mrf.mxu1  ;;  %v1279_v54 = vpop.trf.xlu1 }
 0x1c2   : > { %v3846_v57 = vadd.f32 %v3845_v53, %v3844_v32  ;;  %1384 = vxpose.xlu0.c.b16.cont [5/8] %v806_v39, 128  ;;  %v3759_v11 = vpop.f32.mrf.mxu0 }
 0x1c3   : > { %v3847_v46 = vpop.f32.mrf.mxu1  ;;  %1352 = vxpose.xlu1.c.b16.cont [5/8] %v790_v40, 128  ;;  %v812_v40 = vpack.c.bf16 %v620_v24, %v618_v23 }
 0x1c4   : > { %v5593_v6 = vadd.f32 %v3846_v57, %v2047_v41  ;;  %v1312_v4 = vpop.trf.xlu0  ;;  %v3760_v8 = vpop.f32.mrf.mxu0  ;;  %v2058_v41 = vadd.f32 %v5525_v9, %v5455_v25  ;;  %v2063_v9 = vadd.f32 %v5541_v27, %v5455_v25 }
 0x1c5   : > { %v5597_v20 = vadd.f32 %v3760_v8, %v3759_v11  ;;  %v3848_v56 = vpop.f32.mrf.mxu1  ;;  %v5599_v13 = vpop.trf.xlu1 }
 0x1c6   : > { %v3849_v45 = vadd.f32 %v3848_v56, %v3847_v46  ;;  %1385 = vxpose.xlu0.c.b16.cont [6/8] %v808_v2, 128  ;;  %v3762_v16 = vpop.f32.mrf.mxu0  ;;  %2665 = vmatmul.mubr.bf16.gmra.mxu0 %v1278_v33 }
 0x1c7   : > { %v3850_v19 = vpop.f32.mrf.mxu1  ;;  %2600 = vmatmul.mubr.bf16.gmra.mxu1 %v5527_v10  ;;  %1353 = vxpose.xlu1.c.b16.cont [6/8] %v792_v60, 128  ;;  %v2055_v10 = vadd.f32 %v5511_v7, %v5455_v25 }
 0x1c8   : > { %v5606_v26 = vadd.f32 %v3849_v45, %v2050_v14  ;;  %2607 = vmatprep.mubr.bf16.mxu1 %v5537_v5  ;;  %2672 = vmatprep.mubr.bf16.mxu0 %v1311_v61  ;;  %v1313_v36 = vpop.trf.xlu0  ;;  %v3763_v17 = vpop.f32.mrf.mxu0  ;;  %v796_v5 = vpack.c.bf16 %v588_v28, %v586_v29 }
 0x1c9   : > { %v5611_v34 = vadd.f32 %v3763_v17, %v3762_v16  ;;  %v3851_v33 = vpop.f32.mrf.mxu1  ;;  %v5613_v35 = vpop.trf.xlu1 }
 0x1ca   : > { %v3852_v39 = vadd.f32 %v3851_v33, %v3850_v19  ;;  %1386 = vxpose.xlu0.c.b16.cont [7/8] %v810_v59, 128  ;;  %v3765_v32 = vpop.f32.mrf.mxu0  ;;  %v2066_v59 = vadd.f32 %v5553_v49, %v5455_v25 }
 0x1cb   : > { %v3853_v37 = vpop.f32.mrf.mxu1  ;;  %1354 = vxpose.xlu1.c.b16.cont [7/8] %v794_v21, 128 }
 0x1cc   : > { %v5617_v43 = vadd.f32 %v3852_v39, %v2055_v10  ;;  %v1314_v61 = vpop.trf.xlu0  ;;  %v3766_v47 = vpop.f32.mrf.mxu0  ;;  %v2071_v10 = vadd.f32 %v5565_v62, %v5455_v25 }
 0x1cd   : > { %v5619_v15 = vadd.f32 %v3766_v47, %v3765_v32  ;;  %v3854_v50 = vpop.f32.mrf.mxu1  ;;  %v5621_v53 = vpop.trf.xlu1 }
 0x1ce   : > { %v3855_v7 = vadd.f32 %v3854_v50, %v3853_v37  ;;  %1387 = vxpose.xlu0.c.b16.end [8/8] %v812_v40, 128  ;;  %v3768_v57 = vpop.f32.mrf.mxu0  ;;  %2673 = vmatmul.mubr.bf16.gmra.mxu0 %v1279_v54  ;;  %v2074_v50 = vadd.f32 %v5575_v31, %v5455_v25 }
 0x1cf   : > { %v3856_v11 = vpop.f32.mrf.mxu1  ;;  %2608 = vmatmul.mubr.bf16.gmra.mxu1 %v5543_v18  ;;  %1355 = vxpose.xlu1.c.b16.end [8/8] %v796_v5, 128 }
 0x1d0   : > { %v5626_v2 = vadd.f32 %v3855_v7, %v2058_v41  ;;  %2680 = vmatprep.mubr.bf16.mxu0 %v1312_v4  ;;  %v5628_v46 = vpop.trf.xlu0  ;;  %v3769_v60 = vpop.f32.mrf.mxu0 }
 0x1d1   : > { %v5630_v12 = vadd.f32 %v3769_v60, %v3768_v57  ;;  %v3857_v0 = vpop.f32.mrf.mxu1  ;;  %v5632_v8 = vpop.trf.xlu1 }
 0x1d2   : > { %v3858_v58 = vadd.f32 %v3857_v0, %v3856_v11  ;;  %v3771_v54 = vpop.f32.mrf.mxu0 }
 0x1d3   : > { %v3859_v38 = vpop.f32.mrf.mxu1 }
 0x1d4   : > { %v5636_v56 = vadd.f32 %v3858_v58, %v2063_v9  ;;  %v1372_v18 = vpop.trf.xlu0  ;;  %v3772_v14 = vpop.f32.mrf.mxu0 }
 0x1d5   : > { %v5638_v45 = vadd.f32 %v3772_v14, %v3771_v54  ;;  %v3860_v4 = vpop.f32.mrf.mxu1  ;;  %2809 = vmatprep.mubr.bf16.mxu1 %v1372_v18  ;;  %v1340_v16 = vpop.trf.xlu1  ;;  %v2079_v54 = vadd.f32 %v5587_v51, %v5455_v25 }
 0x1d6   : > { %v3861_v19 = vadd.f32 %v3860_v4, %v3859_v38  ;;  %v3774_v21 = vpop.f32.mrf.mxu0  ;;  %2681 = vmatmul.mubr.bf16.gmra.mxu0 %v5599_v13 }
 0x1d7   : > { %v3862_v27 = vpop.f32.mrf.mxu1  ;;  %2810 = vmatmul.mubr.bf16.vlgmr.msra.gmra.mxu1 %v1340_v16  ;;  %2688 = vmatprep.mubr.bf16.mxu0 %v1313_v36 }
 0x1d8   : > { %v5643_v23 = vadd.f32 %v3861_v19, %v2066_v59  ;;  %v1373_v24 = vpop.trf.xlu0  ;;  %v3775_v17 = vpop.f32.mrf.mxu0  ;;  %v2082_v19 = vadd.f32 %v5597_v20, %v5455_v25  ;;  %v2087_v20 = vadd.f32 %v5611_v34, %v5455_v25 }
 0x1d9   : > { %v5645_v29 = vadd.f32 %v3775_v17, %v3774_v21  ;;  %v3863_v28 = vpop.f32.mrf.mxu1  ;;  %2817 = vmatprep.mubr.bf16.mxu1 %v1373_v24  ;;  %v1341_v33 = vpop.trf.xlu1 }
 0x1da   : > { %v3864_v49 = vadd.f32 %v3863_v28, %v3862_v27  ;;  %v3777_v39 = vpop.f32.mrf.mxu0 }
 0x1db   : > { %v3865_v32 = vpop.f32.mrf.mxu1 }
 0x1dc   : > { %v5649_v40 = vadd.f32 %v3864_v49, %v2071_v10  ;;  %v1374_v13 = vpop.trf.xlu0  ;;  %v3778_v37 = vpop.f32.mrf.mxu0 }
 0x1dd   : > { %v5651_v36 = vadd.f32 %v3778_v37, %v3777_v39  ;;  %v3866_v5 = vpop.f32.mrf.mxu1  ;;  %v1342_v47 = vpop.trf.xlu1 }
 0x1de   : > { %v3867_v41 = vadd.f32 %v3866_v5, %v3865_v32  ;;  %v3780_v7 = vpop.f32.mrf.mxu0  ;;  %2689 = vmatmul.mubr.bf16.gmra.mxu0 %v5613_v35 }
 0x1df   : > { %v3868_v57 = vpop.f32.mrf.mxu1  ;;  %2818 = vmatmul.mubr.bf16.gmra.mxu1 %v1341_v33  ;;  %2696 = vmatprep.mubr.bf16.mxu0 %v1314_v61 }
 0x1e0   : > { %v5656_v62 = vadd.f32 %v3867_v41, %v2074_v50  ;;  %2825 = vmatprep.mubr.bf16.mxu1 %v1374_v13  ;;  %v1375_v11 = vpop.trf.xlu0  ;;  %v3781_v60 = vpop.f32.mrf.mxu0  ;;  %v2090_v41 = vadd.f32 %v5619_v15, %v5455_v25  ;;  %v2095_v15 = vadd.f32 %v5630_v12, %v5455_v25 }
 0x1e1   : > { %v5658_v0 = vadd.f32 %v3781_v60, %v3780_v7  ;;  %v3869_v9 = vpop.f32.mrf.mxu1  ;;  %v1343_v58 = vpop.trf.xlu1 }
 0x1e2   : > { %v3870_v31 = vadd.f32 %v3869_v9, %v3868_v57  ;;  %v3783_v38 = vpop.f32.mrf.mxu0 }
 0x1e3   : > { %v3871_v18 = vpop.f32.mrf.mxu1 }
 0x1e4   : > { %v5662_v14 = vadd.f32 %v3870_v31, %v2079_v54  ;;  %v1376_v35 = vpop.trf.xlu0  ;;  %v3784_v4 = vpop.f32.mrf.mxu0 }
 0x1e5   : > { %v5664_v61 = vadd.f32 %v3784_v4, %v3783_v38  ;;  %v3872_v16 = vpop.f32.mrf.mxu1  ;;  %v1344_v59 = vpop.trf.xlu1 }
 0x1e6   : > { %v3873_v21 = vadd.f32 %v3872_v16, %v3871_v18  ;;  %v3786_v27 = vpop.f32.mrf.mxu0  ;;  %2697 = vmatmul.mubr.bf16.gmra.mxu0 %v5621_v53 }
 0x1e7   : > { %v3874_v24 = vpop.f32.mrf.mxu1  ;;  %2826 = vmatmul.mubr.bf16.gmra.mxu1 %v1342_v47  ;;  %2704 = vmatprep.mubr.bf16.mxu0 %v5628_v46 }
 0x1e8   : > { %v5670_v51 = vadd.f32 %v3873_v21, %v2082_v19  ;;  %2833 = vmatprep.mubr.bf16.mxu1 %v1375_v11  ;;  %v1377_v17 = vpop.trf.xlu0  ;;  %v3787_v28 = vpop.f32.mrf.mxu0 }
 0x1e9   : > { %v5672_v33 = vadd.f32 %v3787_v28, %v3786_v27  ;;  %v3875_v10 = vpop.f32.mrf.mxu1  ;;  %v5674_v49 = vpop.trf.xlu1 }
 0x1ea   : > { %v3876_v39 = vadd.f32 %v3875_v10, %v3874_v24  ;;  %v3789_v32 = vpop.f32.mrf.mxu0  ;;  %v2098_v24 = vadd.f32 %v5638_v45, %v5455_v25 }
 0x1eb   : > { %v3877_v53 = vpop.f32.mrf.mxu1 }
 0x1ec   : > { %v5678_v13 = vadd.f32 %v3876_v39, %v2087_v20  ;;  %v5680_v37 = vpop.trf.xlu0  ;;  %v3790_v46 = vpop.f32.mrf.mxu0 }
 0x1ed   : > { %v5682_v5 = vadd.f32 %v3790_v46, %v3789_v32  ;;  %v3878_v47 = vpop.f32.mrf.mxu1  ;;  %v5684_v50 = vpop.trf.xlu1 }
 0x1ee   : > { %v3879_v7 = vadd.f32 %v3878_v47, %v3877_v53  ;;  %v3792_v57 = vpop.f32.mrf.mxu0  ;;  %2705 = vmatmul.mubr.bf16.gmra.mxu0 %v5632_v8 }
 0x1ef   : > { %v3880_v34 = vpop.f32.mrf.mxu1  ;;  %2834 = vmatmul.mubr.bf16.gmra.mxu1 %v1343_v58 }
 0x1f0   : > { %v5689_v11 = vadd.f32 %v3879_v7, %v2090_v41  ;;  %2841 = vmatprep.mubr.bf16.mxu1 %v1376_v35  ;;  %v5691_v60 = vpop.trf.xlu0  ;;  %v3793_v9 = vpop.f32.mrf.mxu0  ;;  %v2103_v41 = vadd.f32 %v5645_v29, %v5455_v25 }
 0x1f1   : > { %v5693_v54 = vadd.f32 %v3793_v9, %v3792_v57  ;;  %v3881_v31 = vpop.f32.mrf.mxu1  ;;  %v5695_v38 = vpop.trf.xlu1 }
 0x1f2   : > { %v3882_v18 = vadd.f32 %v3881_v31, %v3880_v34  ;;  %v3795_v4 = vpop.f32.mrf.mxu0 }
 0x1f3   : > { %v3883_v16 = vpop.f32.mrf.mxu1 }
 0x1f4   : > { %v5699_v8 = vadd.f32 %v3882_v18, %v2095_v15  ;;  %v1324_v58 = vpop.trf.xlu0  ;;  %v3796_v19 = vpop.f32.mrf.mxu0 }
 0x1f5   : > { %v5701_v21 = vadd.f32 %v3796_v19, %v3795_v4  ;;  %v3884_v35 = vpop.f32.mrf.mxu1  ;;  %2712 = vmatprep.mubr.bf16.mxu0 %v1324_v58  ;;  %v1292_v27 = vpop.trf.xlu1  ;;  %v2106_v4 = vadd.f32 %v5651_v36, %v5455_v25  ;;  %v2111_v36 = vadd.f32 %v5658_v0, %v5455_v25 }
 0x1f6   : > { %v3885_v28 = vadd.f32 %v3884_v35, %v3883_v16  ;;  %v3926_v10 = vpop.f32.mrf.mxu0  ;;  %2713 = vmatmul.mubr.bf16.gmra.mxu0 %v1292_v27 }
 0x1f7   : > { %v3886_v20 = vpop.f32.mrf.mxu1  ;;  %2842 = vmatmul.mubr.bf16.gmra.mxu1 %v1344_v59 }
 0x1f8   : > { %v5705_v12 = vadd.f32 %v3885_v28, %v2098_v24  ;;  %2849 = vmatprep.mubr.bf16.mxu1 %v1377_v17  ;;  %v1325_v39 = vpop.trf.xlu0  ;;  %v3927_v32 = vpop.f32.mrf.mxu0 }
 0x1f9   : > { %v3887_v53 = vpop.f32.mrf.mxu1  ;;  %v3928_v46 = vadd.f32 %v3927_v32, %v3926_v10  ;;  %2720 = vmatprep.mubr.bf16.mxu0 %v1325_v39  ;;  %v1293_v47 = vpop.trf.xlu1 }
 0x1fa   : > { %v3888_v7 = vadd.f32 %v3887_v53, %v3886_v20  ;;  %v3929_v57 = vpop.f32.mrf.mxu0 }
 0x1fb   : > { %v5710_v45 = vadd.f32 %v3928_v46, %v5467_v55  ;;  %v3889_v34 = vpop.f32.mrf.mxu1 }
 0x1fc   : > { %v5712_v9 = vadd.f32 %v3888_v7, %v2103_v41  ;;  %v1326_v59 = vpop.trf.xlu0  ;;  %v3930_v31 = vpop.f32.mrf.mxu0  ;;  %v2114_v7 = vadd.f32 %v5664_v61, %v5455_v25  ;;  %v2119_v61 = vadd.f32 %v5672_v33, %v5455_v25 }
 0x1fd   : > { %v3890_v17 = vpop.f32.mrf.mxu1  ;;  %v3931_v15 = vadd.f32 %v3930_v31, %v3929_v57  ;;  %v1294_v18 = vpop.trf.xlu1 }
 0x1fe   : > { %v3891_v16 = vadd.f32 %v3890_v17, %v3889_v34  ;;  %v3932_v58 = vpop.f32.mrf.mxu0  ;;  %2721 = vmatmul.mubr.bf16.gmra.mxu0 %v1293_v47 }
 0x1ff   : > { %v5717_v29 = vadd.f32 %v3931_v15, %v5478_v3  ;;  %v3892_v19 = vpop.f32.mrf.mxu1  ;;  %2850 = vmatmul.mubr.bf16.gmra.mxu1 %v5674_v49  ;;  %2728 = vmatprep.mubr.bf16.mxu0 %v1326_v59 }
 0x200   : > { %v5720_v55 = vadd.f32 %v3891_v16, %v2106_v4  ;;  %2857 = vmatprep.mubr.bf16.mxu1 %v5680_v37  ;;  %v1327_v35 = vpop.trf.xlu0  ;;  %v3933_v27 = vpop.f32.mrf.mxu0 }
 0x201   : > { %v3893_v24 = vpop.f32.mrf.mxu1  ;;  %v3934_v28 = vadd.f32 %v3933_v27, %v3932_v58  ;;  %v1295_v10 = vpop.trf.xlu1 }
 0x202   : > { %v3894_v20 = vadd.f32 %v3893_v24, %v3892_v19  ;;  %v3935_v39 = vpop.f32.mrf.mxu0 }
 0x203   : > { %v5726_v3 = vadd.f32 %v3934_v28, %v5491_v30  ;;  %v3895_v32 = vpop.f32.mrf.mxu1 }
 0x204   : > { %v5728_v49 = vadd.f32 %v3894_v20, %v2111_v36  ;;  %v1328_v53 = vpop.trf.xlu0  ;;  %v3936_v46 = vpop.f32.mrf.mxu0  ;;  %v2122_v36 = vadd.f32 %v5682_v5, %v5455_v25  ;;  %v2127_v5 = vadd.f32 %v5693_v54, %v5455_v25 }
 0x205   : > { %v3896_v47 = vpop.f32.mrf.mxu1  ;;  %v3937_v37 = vadd.f32 %v3936_v46, %v3935_v39  ;;  %v1296_v41 = vpop.trf.xlu1 }
 0x206   : > { %v3897_v57 = vadd.f32 %v3896_v47, %v3895_v32  ;;  %v3938_v34 = vpop.f32.mrf.mxu0  ;;  %2729 = vmatmul.mubr.bf16.gmra.mxu0 %v1294_v18 }
 0x207   : > { %v5733_v0 = vadd.f32 %v3937_v37, %v5504_v48  ;;  %v3898_v59 = vpop.f32.mrf.mxu1  ;;  %2858 = vmatmul.mubr.bf16.gmra.mxu1 %v5684_v50  ;;  %2736 = vmatprep.mubr.bf16.mxu0 %v1327_v35 }
 0x208   : > { %v5736_v30 = vadd.f32 %v3897_v57, %v2114_v7  ;;  %2865 = vmatprep.mubr.bf16.mxu1 %v5691_v60  ;;  %v1329_v31 = vpop.trf.xlu0  ;;  %v3939_v17 = vpop.f32.mrf.mxu0 }
 0x209   : > { %v3899_v15 = vpop.f32.mrf.mxu1  ;;  %v3940_v4 = vadd.f32 %v3939_v17, %v3938_v34  ;;  %v5739_v16 = vpop.trf.xlu1 }
 0x20a   : > { %v3900_v18 = vadd.f32 %v3899_v15, %v3898_v59  ;;  %v3941_v48 = vpop.f32.mrf.mxu0 }
 0x20b   : > { %v5744_v58 = vadd.f32 %v3940_v4, %v5519_v1  ;;  %v3901_v50 = vpop.f32.mrf.mxu1 }
 0x20c   : > { %v5746_v19 = vadd.f32 %v3900_v18, %v2119_v61  ;;  %v1330_v35 = vpop.trf.xlu0  ;;  %v3942_v27 = vpop.f32.mrf.mxu0  ;;  %v2130_v18 = vadd.f32 %v5701_v21, %v5455_v25 }
 0x20d   : > { %v3902_v60 = vpop.f32.mrf.mxu1  ;;  %v3943_v24 = vadd.f32 %v3942_v27, %v3941_v48  ;;  %v5748_v28 = vpop.trf.xlu1 }
 0x20e   : > { %v3903_v20 = vadd.f32 %v3902_v60, %v3901_v50  ;;  %v3944_v39 = vpop.f32.mrf.mxu0  ;;  %2737 = vmatmul.mubr.bf16.gmra.mxu0 %v1295_v10 }
 0x20f   : > { %v5753_v33 = vadd.f32 %v3943_v24, %v5535_v22  ;;  %v3904_v1 = vpop.f32.mrf.mxu1  ;;  %2866 = vmatmul.mubr.bf16.gmra.mxu1 %v5695_v38  ;;  %2744 = vmatprep.mubr.bf16.mxu0 %v1328_v53 }
 0x210   : > { %v5756_v32 = vadd.f32 %v3903_v20, %v2122_v36  ;;  %v5758_v46 = vpop.trf.xlu0  ;;  %v3945_v47 = vpop.f32.mrf.mxu0 }
 0x211   : > { %v3905_v37 = vpop.f32.mrf.mxu1  ;;  %v3946_v7 = vadd.f32 %v3945_v47, %v3944_v39  ;;  %v5760_v57 = vpop.trf.xlu1 }
 0x212   : > { %v3906_v10 = vadd.f32 %v3905_v37, %v3904_v1  ;;  %v3947_v34 = vpop.f32.mrf.mxu0 }
 0x213   : > { %v5765_v22 = vadd.f32 %v3946_v7, %v5549_v42  ;;  %v3907_v59 = vpop.f32.mrf.mxu1 }
 0x214   : > { %v5767_v38 = vadd.f32 %v3906_v10, %v2127_v5  ;;  %v1388_v53 = vpop.trf.xlu0  ;;  %v3948_v17 = vpop.f32.mrf.mxu0 }
 0x215   : > { %v3908_v15 = vpop.f32.mrf.mxu1  ;;  %v3949_v4 = vadd.f32 %v3948_v17, %v3947_v34  ;;  %2873 = vmatprep.mubr.bf16.mxu1 %v1388_v53  ;;  %v1356_v61 = vpop.trf.xlu1 }
 0x216   : > { %v3909_v48 = vadd.f32 %v3908_v15, %v3907_v59  ;;  %v3950_v50 = vpop.f32.mrf.mxu0  ;;  %2745 = vmatmul.mubr.bf16.gmra.mxu0 %v1296_v41 }
 0x217   : > { %v5772_v54 = vadd.f32 %v3949_v4, %v5560_v63  ;;  %v4038_v42 = vpop.f32.mrf.mxu1  ;;  %2874 = vmatmul.mubr.bf16.gmra.mxu1 %v1356_v61  ;;  %2752 = vmatprep.mubr.bf16.mxu0 %v1329_v31 }
 0x218   : > { %v5774_v27 = vadd.f32 %v3909_v48, %v2130_v18  ;;  %v3951_v60 = vpop.f32.mrf.mxu0  ;;  %v1389_v24 = vpop.trf.xlu0 }
 0x219   : > { %v3952_v36 = vadd.f32 %v3951_v60, %v3950_v50  ;;  %v4039_v20 = vpop.f32.mrf.mxu1  ;;  %2881 = vmatprep.mubr.bf16.mxu1 %v1389_v24  ;;  %v1357_v47 = vpop.trf.xlu1 }
 0x21a   : > { %v4040_v39 = vadd.f32 %v4039_v20, %v4038_v42  ;;  %v3953_v1 = vpop.f32.mrf.mxu0 }
 0x21b   : > { %v5777_v25 = vadd.f32 %v3952_v36, %v5571_v52  ;;  %v4041_v21 = vpop.f32.mrf.mxu1 }
 0x21c   : > { %v5780_v41 = vadd.f32 %v4040_v39, %v5710_v45  ;;  %v3954_v63 = vpop.f32.mrf.mxu0  ;;  %v1390_v7 = vpop.trf.xlu0 }
 0x21d   : > { %v3955_v37 = vadd.f32 %v3954_v63, %v3953_v1  ;;  %v4042_v31 = vpop.f32.mrf.mxu1  ;;  %v1358_v48 = vpop.trf.xlu1 }
 0x21e   : > { %v4043_v5 = vadd.f32 %v4042_v31, %v4041_v21  ;;  %v3956_v10 = vpop.f32.mrf.mxu0  ;;  %2753 = vmatmul.mubr.bf16.gmra.mxu0 %v5739_v16 }
 0x21f   : > { %v5784_v34 = vadd.f32 %v3955_v37, %v5582_v44  ;;  %v4044_v59 = vpop.f32.mrf.mxu1  ;;  %2882 = vmatmul.mubr.bf16.gmra.mxu1 %v1357_v47  ;;  %2760 = vmatprep.mubr.bf16.mxu0 %v1330_v35 }
 0x220   : > { %v5787_v52 = vadd.f32 %v4043_v5, %v5717_v29  ;;  %v3957_v45 = vpop.f32.mrf.mxu0  ;;  %2889 = vmatprep.mubr.bf16.mxu1 %v1390_v7  ;;  %v1391_v42 = vpop.trf.xlu0 }
 0x221   : > { %v3958_v53 = vadd.f32 %v3957_v45, %v3956_v10  ;;  %v4045_v17 = vpop.f32.mrf.mxu1  ;;  %v1359_v37 = vpop.trf.xlu1 }
 0x222   : > { %v4046_v15 = vadd.f32 %v4045_v17, %v4044_v59  ;;  %v3959_v4 = vpop.f32.mrf.mxu0 }
 0x223   : > { %v5790_v61 = vadd.f32 %v3958_v53, %v5593_v6  ;;  %v4047_v18 = vpop.f32.mrf.mxu1 }
 0x224   : > { %v5793_v16 = vadd.f32 %v4046_v15, %v5726_v3  ;;  %v3960_v44 = vpop.f32.mrf.mxu0  ;;  %v1392_v7 = vpop.trf.xlu0 }
 0x225   : > { %v3961_v50 = vadd.f32 %v3960_v44, %v3959_v4  ;;  %v4048_v35 = vpop.f32.mrf.mxu1  ;;  %v1360_v44 = vpop.trf.xlu1 }
 0x226   : > { %v4049_v29 = vadd.f32 %v4048_v35, %v4047_v18  ;;  %v3962_v60 = vpop.f32.mrf.mxu0  ;;  %2761 = vmatmul.mubr.bf16.gmra.mxu0 %v5748_v28 }
 0x227   : > { %v5797_v24 = vadd.f32 %v3961_v50, %v5606_v26  ;;  %v4050_v36 = vpop.f32.mrf.mxu1  ;;  %2890 = vmatmul.mubr.bf16.gmra.mxu1 %v1358_v48  ;;  %2768 = vmatprep.mubr.bf16.mxu0 %v5758_v46 }
 0x228   : > { %v5801_v6 = vadd.f32 %v4049_v29, %v5733_v0  ;;  %v3963_v3 = vpop.f32.mrf.mxu0  ;;  %2897 = vmatprep.mubr.bf16.mxu1 %v1391_v42  ;;  %v1393_v35 = vpop.trf.xlu0 }
 0x229   : > { %v3964_v20 = vadd.f32 %v3963_v3, %v3962_v60  ;;  %v4051_v39 = vpop.f32.mrf.mxu1 }
 0x22a   : > { %v4052_v1 = vadd.f32 %v4051_v39, %v4050_v36  ;;  %v3965_v21 = vpop.f32.mrf.mxu0 }
 0x22b   : > { %v5804_v63 = vadd.f32 %v3964_v20, %v5617_v43  ;;  %v4053_v28 = vpop.f32.mrf.mxu1 }
 0x22c   : > { %v5807_v26 = vadd.f32 %v4052_v1, %v5744_v58  ;;  %v3966_v47 = vpop.f32.mrf.mxu0 }
 0x22d   : > { %v3967_v31 = vadd.f32 %v3966_v47, %v3965_v21  ;;  %v4054_v46 = vpop.f32.mrf.mxu1  ;;  %v1361_v47 = vpop.trf.xlu1 }
 0x22e   : > { %v4055_v0 = vadd.f32 %v4054_v46, %v4053_v28  ;;  %v3968_v5 = vpop.f32.mrf.mxu0  ;;  %2769 = vmatmul.mubr.bf16.gmra.mxu0 %v5760_v57  ;;  %v1394_v46 = vpop.trf.xlu0 }
 0x22f   : > { %v5811_v10 = vadd.f32 %v3967_v31, %v5626_v2  ;;  %v4056_v59 = vpop.f32.mrf.mxu1  ;;  %2898 = vmatmul.mubr.bf16.gmra.mxu1 %v1359_v37 }
 0x230   : > { %v5814_v43 = vadd.f32 %v4055_v0, %v5753_v33  ;;  %v3969_v45 = vpop.f32.mrf.mxu0  ;;  %2905 = vmatprep.mubr.bf16.mxu1 %v1392_v7 }
 0x231   : > { %v3970_v58 = vadd.f32 %v3969_v45, %v3968_v5  ;;  %v4057_v53 = vpop.f32.mrf.mxu1 }
 0x232   : > { %v4058_v17 = vadd.f32 %v4057_v53, %v4056_v59  ;;  %v3971_v15 = vpop.f32.mrf.mxu0 }
 0x233   : > { %v5817_v4 = vadd.f32 %v3970_v58, %v5636_v56  ;;  %v4059_v18 = vpop.f32.mrf.mxu1 }
 0x234   : > { %v5820_v57 = vadd.f32 %v4058_v17, %v5765_v22  ;;  %v3972_v2 = vpop.f32.mrf.mxu0 }
 0x235   : > { %v3973_v48 = vadd.f32 %v3972_v2, %v3971_v15  ;;  %v4060_v50 = vpop.f32.mrf.mxu1  ;;  %v1362_v2 = vpop.trf.xlu1 }
 0x236   : > { %v4061_v33 = vadd.f32 %v4060_v50, %v4059_v18  ;;  %v3974_v42 = vpop.f32.mrf.mxu0  ;;  %v1395_v50 = vpop.trf.xlu0 }
 0x237   : > { %v5823_v29 = vadd.f32 %v3973_v48, %v5643_v23  ;;  %v4062_v60 = vpop.f32.mrf.mxu1  ;;  %2906 = vmatmul.mubr.bf16.gmra.mxu1 %v1360_v44 }
 0x238   : > { %v5826_v36 = vadd.f32 %v4061_v33, %v5772_v54  ;;  %v3975_v56 = vpop.f32.mrf.mxu0  ;;  %2913 = vmatprep.mubr.bf16.mxu1 %v1393_v35 }
 0x239   : > { %v3976_v3 = vadd.f32 %v3975_v56, %v3974_v42  ;;  %v4063_v22 = vpop.f32.mrf.mxu1 }
 0x23a   : > { %v4064_v20 = vadd.f32 %v4063_v22, %v4062_v60  ;;  %v3977_v39 = vpop.f32.mrf.mxu0 }
 0x23b   : > { %v5829_v1 = vadd.f32 %v3976_v3, %v5649_v40  ;;  %v4065_v21 = vpop.f32.mrf.mxu1 }
 0x23c   : > { %v5832_v28 = vadd.f32 %v4064_v20, %v5777_v25  ;;  %v3978_v23 = vpop.f32.mrf.mxu0 }
 0x23d   : > { %v3979_v37 = vadd.f32 %v3978_v23, %v3977_v39  ;;  %v4066_v31 = vpop.f32.mrf.mxu1  ;;  %v1363_v23 = vpop.trf.xlu1 }
 0x23e   : > { %v4067_v54 = vadd.f32 %v4066_v31, %v4065_v21  ;;  %v3980_v7 = vpop.f32.mrf.mxu0 }
 0x23f   : > { %v5835_v0 = vadd.f32 %v3979_v37, %v5656_v62  ;;  %v4068_v5 = vpop.f32.mrf.mxu1  ;;  %2914 = vmatmul.mubr.bf16.gmra.mxu1 %v1361_v47 }
 0x240   : > { %v5838_v59 = vadd.f32 %v4067_v54, %v5784_v34  ;;  %v3981_v40 = vpop.f32.mrf.mxu0  ;;  %2921 = vmatprep.mubr.bf16.mxu1 %v1394_v46 }
 0x241   : > { %v3982_v45 = vadd.f32 %v3981_v40, %v3980_v7  ;;  %v4069_v25 = vpop.f32.mrf.mxu1 }
 0x242   : > { %v4070_v58 = vadd.f32 %v4069_v25, %v4068_v5  ;;  %v3983_v53 = vpop.f32.mrf.mxu0 }
 0x243   : > { %v5841_v17 = vadd.f32 %v3982_v45, %v5662_v14  ;;  %v4071_v15 = vpop.f32.mrf.mxu1 }
 0x244   : > { %v5844_v18 = vadd.f32 %v4070_v58, %v5790_v61  ;;  %v3984_v62 = vpop.f32.mrf.mxu0 }
 0x245   : > { %v3985_v44 = vadd.f32 %v3984_v62, %v3983_v53  ;;  %v4072_v48 = vpop.f32.mrf.mxu1 }
 0x246   : > { %v4073_v34 = vadd.f32 %v4072_v48, %v4071_v15  ;;  %v3986_v35 = vpop.f32.mrf.mxu0 }
 0x247   : > { %v5847_v33 = vadd.f32 %v3985_v44, %v5670_v51  ;;  %v4074_v42 = vpop.f32.mrf.mxu1  ;;  %2922 = vmatmul.mubr.bf16.gmra.mxu1 %v1362_v2 }
 0x248   : > { %v5850_v60 = vadd.f32 %v4073_v34, %v5797_v24  ;;  %v3987_v14 = vpop.f32.mrf.mxu0  ;;  %2929 = vmatprep.mubr.bf16.mxu1 %v1395_v50 }
 0x249   : > { %v3988_v56 = vadd.f32 %v3987_v14, %v3986_v35  ;;  %v4075_v61 = vpop.f32.mrf.mxu1 }
 0x24a   : > { %v4076_v3 = vadd.f32 %v4075_v61, %v4074_v42  ;;  %v3989_v22 = vpop.f32.mrf.mxu0 }
 0x24b   : > { %v5853_v20 = vadd.f32 %v3988_v56, %v5678_v13  ;;  %v4077_v39 = vpop.f32.mrf.mxu1 }
 0x24c   : > { %v5856_v21 = vadd.f32 %v4076_v3, %v5804_v63  ;;  %v3990_v51 = vpop.f32.mrf.mxu0 }
 0x24d   : > { %v3991_v47 = vadd.f32 %v3990_v51, %v3989_v22  ;;  %v4078_v37 = vpop.f32.mrf.mxu1 }
 0x24e   : > { %v4079_v31 = vadd.f32 %v4078_v37, %v4077_v39  ;;  %v3992_v24 = vpop.f32.mrf.mxu0 }
 0x24f   : > { %v5859_v46 = vadd.f32 %v3991_v47, %v5689_v11  ;;  %v4080_v54 = vpop.f32.mrf.mxu1  ;;  %2930 = vmatmul.mubr.bf16.gmra.mxu1 %v1363_v23 }
 0x250   : > { %v5862_v7 = vadd.f32 %v4079_v31, %v5811_v10  ;;  %v3993_v13 = vpop.f32.mrf.mxu0 }
 0x251   : > { %v3994_v5 = vadd.f32 %v3993_v13, %v3992_v24  ;;  %v4081_v40 = vpop.f32.mrf.mxu1 }
 0x252   : > { %v4082_v45 = vadd.f32 %v4081_v40, %v4080_v54  ;;  %v3995_v63 = vpop.f32.mrf.mxu0 }
 0x253   : > { %v5865_v25 = vadd.f32 %v3994_v5, %v5699_v8  ;;  %v4083_v58 = vpop.f32.mrf.mxu1 }
 0x254   : > { %v5868_v53 = vadd.f32 %v4082_v45, %v5817_v4  ;;  %v3996_v15 = vpop.f32.mrf.mxu0 }
 0x255   : > { %v3997_v11 = vadd.f32 %v3996_v15, %v3995_v63  ;;  %v4084_v62 = vpop.f32.mrf.mxu1 }
 0x256   : > { %v4085_v2 = vadd.f32 %v4084_v62, %v4083_v58  ;;  %v3998_v44 = vpop.f32.mrf.mxu0 }
 0x257   : > { %v5871_v10 = vadd.f32 %v3997_v11, %v5705_v12  ;;  %v4086_v48 = vpop.f32.mrf.mxu1 }
 0x258   : > { %v5874_v50 = vadd.f32 %v4085_v2, %v5823_v29  ;;  %v3999_v34 = vpop.f32.mrf.mxu0 }
 0x259   : > { %v4000_v35 = vadd.f32 %v3999_v34, %v3998_v44  ;;  %v4087_v8 = vpop.f32.mrf.mxu1 }
 0x25a   : > { %v4088_v42 = vadd.f32 %v4087_v8, %v4086_v48  ;;  %v4001_v14 = vpop.f32.mrf.mxu0 }
 0x25b   : > { %v5877_v4 = vadd.f32 %v4000_v35, %v5712_v9  ;;  %v4089_v56 = vpop.f32.mrf.mxu1 }
 0x25c   : > { %v5880_v61 = vadd.f32 %v4088_v42, %v5829_v1  ;;  %v4002_v3 = vpop.f32.mrf.mxu0 }
 0x25d   : > { %v4003_v22 = vadd.f32 %v4002_v3, %v4001_v14  ;;  %v4090_v12 = vpop.f32.mrf.mxu1 }
 0x25e   : > { %v4091_v39 = vadd.f32 %v4090_v12, %v4089_v56  ;;  %v4004_v51 = vpop.f32.mrf.mxu0 }
 0x25f   : > { %v2428_v29 = vadd.f32 %v4003_v22, %v5720_v55  ;;  %v4092_v23 = vpop.f32.mrf.mxu1 }
 0x260   : > { %v5884_v47 = vadd.f32 %v4091_v39, %v5835_v0  ;;  %v4005_v37 = vpop.f32.mrf.mxu0 }
 0x261   : > { %v4006_v31 = vadd.f32 %v4005_v37, %v4004_v51  ;;  %v4093_v24 = vpop.f32.mrf.mxu1 }
 0x262   : > { %v4094_v9 = vadd.f32 %v4093_v24, %v4092_v23  ;;  %v4007_v54 = vpop.f32.mrf.mxu0 }
 0x263   : > { %v2433_v13 = vadd.f32 %v4006_v31, %v5728_v49  ;;  %v4095_v1 = vpop.f32.mrf.mxu1 }
 0x264   : > { %v5888_v5 = vadd.f32 %v4094_v9, %v5841_v17  ;;  %v4008_v40 = vpop.f32.mrf.mxu0 }
 0x265   : > { %v4009_v45 = vadd.f32 %v4008_v40, %v4007_v54  ;;  %v4096_v63 = vpop.f32.mrf.mxu1 }
 0x266   : > { %v4097_v58 = vadd.f32 %v4096_v63, %v4095_v1  ;;  %v4010_v55 = vpop.f32.mrf.mxu0 }
 0x267   : > { %v2436_v15 = vadd.f32 %v4009_v45, %v5736_v30  ;;  %v4098_v0 = vpop.f32.mrf.mxu1 }
 0x268   : > { %v5892_v11 = vadd.f32 %v4097_v58, %v5847_v33  ;;  %v4011_v62 = vpop.f32.mrf.mxu0 }
 0x269   : > { %v4012_v2 = vadd.f32 %v4011_v62, %v4010_v55  ;;  %v4099_v44 = vpop.f32.mrf.mxu1 }
 0x26a   : > { %v4100_v48 = vadd.f32 %v4099_v44, %v4098_v0  ;;  %v4013_v49 = vpop.f32.mrf.mxu0 }
 0x26b   : > { %v2441_v34 = vadd.f32 %v4012_v2, %v5746_v19  ;;  %v4101_v17 = vpop.f32.mrf.mxu1 }
 0x26c   : > { %v5896_v35 = vadd.f32 %v4100_v48, %v5853_v20  ;;  %v4014_v8 = vpop.f32.mrf.mxu0 }
 0x26d   : > { %v4015_v42 = vadd.f32 %v4014_v8, %v4013_v49  ;;  %v4102_v14 = vpop.f32.mrf.mxu1 }
 0x26e   : > { %v4103_v56 = vadd.f32 %v4102_v14, %v4101_v17  ;;  %v4016_v30 = vpop.f32.mrf.mxu0 }
 0x26f   : > { %v2444_v3 = vadd.f32 %v4015_v42, %v5756_v32  ;;  %v4104_v33 = vpop.f32.mrf.mxu1 }
 0x270   : > { %v5900_v22 = vadd.f32 %v4103_v56, %v5859_v46  ;;  %v4017_v12 = vpop.f32.mrf.mxu0 }
 0x271   : > { %v4018_v39 = vadd.f32 %v4017_v12, %v4016_v30  ;;  %v4105_v51 = vpop.f32.mrf.mxu1 }
 0x272   : > { %v4106_v23 = vadd.f32 %v4105_v51, %v4104_v33  ;;  %v4019_v19 = vpop.f32.mrf.mxu0 }
 0x273   : > { %v2449_v37 = vadd.f32 %v4018_v39, %v5767_v38  ;;  %v4107_v20 = vpop.f32.mrf.mxu1 }
 0x274   : > { %v5904_v31 = vadd.f32 %v4106_v23, %v5865_v25  ;;  %v4020_v24 = vpop.f32.mrf.mxu0 }
 0x275   : > { %v4021_v9 = vadd.f32 %v4020_v24, %v4019_v19  ;;  %v4108_v54 = vpop.f32.mrf.mxu1 }
 0x276   : > { %v4109_v1 = vadd.f32 %v4108_v54, %v4107_v20  ;;  %v4150_v32 = vpop.f32.mrf.mxu0 }
 0x277   : > { %v2452_v40 = vadd.f32 %v4021_v9, %v5774_v27  ;;  %v4110_v46 = vpop.f32.mrf.mxu1 }
 0x278   : > { %v5908_v45 = vadd.f32 %v4109_v1, %v5871_v10  ;;  %v4151_v63 = vpop.f32.mrf.mxu0 }
 0x279   : > { %v4111_v58 = vpop.f32.mrf.mxu1 }
 0x27a   : > { %v4112_v55 = vadd.f32 %v4111_v58, %v4110_v46  ;;  %v4153_v0 = vpop.f32.mrf.mxu0 }
 0x27b   : > { %v4113_v38 = vpop.f32.mrf.mxu1 }
 0x27c   : > { %v5911_v62 = vadd.f32 %v4112_v55, %v5877_v4  ;;  %v4154_v25 = vpop.f32.mrf.mxu0 }
 0x27d   : > { %v4114_v2 = vpop.f32.mrf.mxu1 }
 0x27e   : > { %v4115_v44 = vadd.f32 %v4114_v2, %v4113_v38  ;;  %v4156_v48 = vpop.f32.mrf.mxu0 }
 0x27f   : > { %v4116_v49 = vpop.f32.mrf.mxu1 }
 0x280   : > { %v5913_v17 = vadd.f32 %v4115_v44, %v2428_v29  ;;  %v4157_v27 = vpop.f32.mrf.mxu0 }
 0x281   : > { %v4117_v8 = vpop.f32.mrf.mxu1 }
 0x282   : > { %v4118_v42 = vadd.f32 %v4117_v8, %v4116_v49  ;;  %v4159_v10 = vpop.f32.mrf.mxu0 }
 0x283   : > { %v4119_v14 = vpop.f32.mrf.mxu1 }
 0x284   : > { %v5915_v56 = vadd.f32 %v4118_v42, %v2433_v13  ;;  %v4160_v30 = vpop.f32.mrf.mxu0 }
 0x285   : > { %v4120_v33 = vpop.f32.mrf.mxu1 }
 0x286   : > { %v4121_v12 = vadd.f32 %v4120_v33, %v4119_v14  ;;  %v4162_v39 = vpop.f32.mrf.mxu0  ;;  %v4152_v14 = vadd.f32 %v4151_v63, %v4150_v32 }
 0x287   : > { %v4122_v4 = vpop.f32.mrf.mxu1 }
 0x288   : > { %v5917_v51 = vadd.f32 %v4121_v12, %v2436_v15  ;;  %v4163_v23 = vpop.f32.mrf.mxu0 }
 0x289   : > { %v4123_v19 = vpop.f32.mrf.mxu1 }
 0x28a   : > { %6687 = vst [vmem:[#allocation12_spill] sm:$0xff] %v5917_v51  ;;  %v4124_v20 = vadd.f32 %v4123_v19, %v4122_v4  ;;  %v5919_v24 = vpop.f32.mrf.mxu0 }
 0x28b   : > { %v4125_v29 = vpop.f32.mrf.mxu1 }
 0x28c   : > { %v5921_v9 = vadd.f32 %v4124_v20, %v2441_v34  ;;  %v4166_v54 = vpop.f32.mrf.mxu0 }
 0x28d   : > { %v4126_v1 = vpop.f32.mrf.mxu1 }
 0x28e   : > { %6688 = vst [vmem:[#allocation13_spill] sm:$0xff] %v5921_v9  ;;  %v4127_v46 = vadd.f32 %v4126_v1, %v4125_v29  ;;  %v5923_v13 = vpop.f32.mrf.mxu0  ;;  %v2651_v29 = vadd.f32 %v4152_v14, %v5780_v41  ;;  %v4155_v1 = vadd.f32 %v4154_v25, %v4153_v0  ;;  %v4161_v14 = vadd.f32 %v4160_v30, %v4159_v10 }
 0x28f   : > { %v4128_v58 = vpop.f32.mrf.mxu1  ;;  %v4164_v10 = vadd.f32 %v4163_v23, %v4162_v39 }
 0x290   : > { %v5925_v55 = vadd.f32 %v4127_v46, %v2444_v3  ;;  %v5927_v38 = vpop.f32.mrf.mxu0  ;;  %v2654_v63 = vadd.f32 %v4155_v1, %v5787_v52 }
 0x291   : > { %v4129_v15 = vpop.f32.mrf.mxu1 }
 0x292   : > { %6689 = vst [vmem:[#allocation14_spill] sm:$0xff] %v5925_v55  ;;  %v4130_v2 = vadd.f32 %v4129_v15, %v4128_v58  ;;  %v5929_v44 = vpop.f32.mrf.mxu0 }
 0x293   : > { %v4131_v49 = vpop.f32.mrf.mxu1 }
 0x294   : > { %v5931_v8 = vadd.f32 %v4130_v2, %v2449_v37  ;;  %v5933_v42 = vpop.f32.mrf.mxu0 }
 0x295   : > { %v4132_v34 = vpop.f32.mrf.mxu1 }
 0x296   : > { %6690 = vst [vmem:[#allocation15_spill] sm:$0xff] %v5931_v8  ;;  %v4133_v33 = vadd.f32 %v4132_v34, %v4131_v49  ;;  %v5935_v12 = vpop.f32.mrf.mxu0  ;;  %v4158_v49 = vadd.f32 %v4157_v27, %v4156_v48 }
 0x297   : > { %v4262_v4 = vpop.f32.mrf.mxu1 }
 0x298   : > { %v5937_v19 = vadd.f32 %v4133_v33, %v2452_v40  ;;  %v5939_v3 = vpop.f32.mrf.mxu0 }
 0x299   : > { %v4263_v20 = vpop.f32.mrf.mxu1 }
 0x29a   : > { %6691 = vst [vmem:[#allocation16_spill] sm:$0xff] %v5937_v19  ;;  %v4264_v46 = vadd.f32 %v4263_v20, %v4262_v4  ;;  %v5942_v58 = vpop.f32.mrf.mxu0  ;;  %v2659_v20 = vadd.f32 %v4158_v49, %v5793_v16 }
 0x29b   : > { %v4265_v37 = vpop.f32.mrf.mxu1 }
 0x29c   : > { %v5944_v15 = vadd.f32 %v4264_v46, %v2651_v29  ;;  %v5946_v2 = vpop.f32.mrf.mxu0 }
 0x29d   : > { %v4266_v32 = vpop.f32.mrf.mxu1 }
 0x29e   : > { %v2970_v40 = vand.u32 2147483647, %v5944_v15  ;;  %v4267_v34 = vadd.f32 %v4266_v32, %v4265_v37  ;;  %v5950_v33 = vpop.f32.mrf.mxu0 }
 0x29f   : > { %v4268_v19 = vpop.f32.mrf.mxu1 }
 0x2a0   : > { %v3002_v41 = vsub.f32 0.0, %v2970_v40  ;;  %v5952_v0 = vadd.f32 %v4267_v34, %v2654_v63  ;;  %v5954_v25 = vpop.f32.mrf.mxu0  ;;  %v2662_v63 = vadd.f32 %v4161_v14, %v5801_v6  ;;  %v2667_v6 = vadd.f32 %v4164_v10, %v5807_v26 }
 0x2a1   : > { %v4269_v4 = vpop.f32.mrf.mxu1 }
 0x2a2   : > { %v3034_v29 = vmul.f32 1.442695, %v3002_v41  ;;  %v2971_v46 = vand.u32 2147483647, %v5952_v0  ;;  %v4270_v52 = vadd.f32 %v4269_v4, %v4268_v19  ;;  %v5958_v48 = vpop.f32.mrf.mxu0 }
 0x2a3   : > { %v4271_v27 = vpop.f32.mrf.mxu1 }
 0x2a4   : > { %4546 = vpow2.f32 %v3034_v29  ;;  %v3003_v1 = vsub.f32 0.0, %v2971_v46  ;;  %v5960_v37 = vadd.f32 %v4270_v52, %v2659_v20  ;;  %v5962_v32 = vpop.f32.mrf.mxu0  ;;  %v4167_v20 = vadd.f32 %v4166_v54, %v5919_v24 }
 0x2a5   : > { %v4272_v40 = vpop.f32.mrf.mxu1  ;;  %v4170_v24 = vadd.f32 %v5927_v38, %v5923_v13  ;;  %v4173_v38 = vadd.f32 %v5933_v42, %v5929_v44 }
 0x2a6   : > { %v3036_v30 = vmul.f32 1.442695, %v3003_v1  ;;  %v2972_v16 = vand.u32 2147483647, %v5960_v37  ;;  %v4273_v49 = vadd.f32 %v4272_v40, %v4271_v27  ;;  %v5966_v34 = vpop.f32.mrf.mxu0 }
 0x2a7   : > { %v4274_v19 = vpop.f32.mrf.mxu1 }
 0x2a8   : > { %4548 = vpow2.f32 %v3036_v30  ;;  %v3004_v41 = vsub.f32 0.0, %v2972_v16  ;;  %v5968_v4 = vadd.f32 %v4273_v49, %v2662_v63  ;;  %v5970_v29 = vpop.f32.mrf.mxu0  ;;  %v2670_v30 = vadd.f32 %v4167_v20, %v5814_v43 }
 0x2a9   : > { %v4275_v46 = vpop.f32.mrf.mxu1  ;;  %v2675_v43 = vadd.f32 %v4170_v24, %v5820_v57  ;;  %v4179_v57 = vadd.f32 %v5946_v2, %v5942_v58 }
 0x2aa   : > { %v3038_v14 = vmul.f32 1.442695, %v3004_v41  ;;  %v2973_v39 = vand.u32 2147483647, %v5968_v4  ;;  %v4276_v23 = vadd.f32 %v4275_v46, %v4274_v19  ;;  %v5975_v52 = vpop.f32.mrf.mxu0 }
 0x2ab   : > { %v4277_v27 = vpop.f32.mrf.mxu1 }
 0x2ac   : > { %4550 = vpow2.f32 %v3038_v14  ;;  %v3005_v1 = vsub.f32 0.0, %v2973_v39  ;;  %v5977_v40 = vadd.f32 %v4276_v23, %v2667_v6  ;;  %v5979_v63 = vpop.f32.mrf.mxu0 }
 0x2ad   : > { %v4278_v16 = vpop.f32.mrf.mxu1 }
 0x2ae   : > { %v3040_v26 = vmul.f32 1.442695, %v3005_v1  ;;  %v2974_v54 = vand.u32 2147483647, %v5977_v40  ;;  %v4279_v10 = vadd.f32 %v4278_v16, %v4277_v27  ;;  %v4192_v49 = vpop.f32.mrf.mxu0  ;;  %v4176_v27 = vadd.f32 %v5939_v3, %v5935_v12 }
 0x2af   : > { %v4280_v19 = vpop.f32.mrf.mxu1  ;;  %v4182_v12 = vadd.f32 %v5954_v25, %v5950_v33  ;;  %v2686_v25 = vadd.f32 %v4179_v57, %v5838_v59 }
 0x2b0   : > { %4552 = vpow2.f32 %v3040_v26  ;;  %v3006_v41 = vsub.f32 0.0, %v2974_v54  ;;  %v5985_v46 = vadd.f32 %v4279_v10, %v2670_v30  ;;  %v4193_v6 = vpop.f32.mrf.mxu0 }
 0x2b1   : > { %v5987_v14 = vpop.eup %4546  ;;  %v4281_v39 = vpop.f32.mrf.mxu1 }
 0x2b2   : > { %v3098_v20 = vadd.f32 1.0, %v5987_v14  ;;  %v3042_v23 = vmul.f32 1.442695, %v3006_v41  ;;  %v5991_v13 = vpop.f32.mrf.mxu0  ;;  %v2975_v1 = vand.u32 2147483647, %v5985_v46  ;;  %v4282_v30 = vadd.f32 %v4281_v39, %v4280_v19 }
 0x2b3   : > { %v4283_v16 = vpop.f32.mrf.mxu1  ;;  %v2678_v19 = vadd.f32 %v4173_v38, %v5826_v36  ;;  %v2683_v41 = vadd.f32 %v4176_v27, %v5832_v28  ;;  %v3101_v27 = vmul.f32 -0.5, %v5987_v14 }
 0x2b4   : > { %4554 = vlog2.f32 %v3098_v20  ;;  %v5998_v26 = vpop.f32.mrf.mxu0  ;;  %v3007_v24 = vsub.f32 0.0, %v2975_v1  ;;  %v6004_v10 = vadd.f32 %v4282_v30, %v2675_v43  ;;  %v4185_v43 = vadd.f32 %v5962_v32, %v5958_v48 }
 0x2b5   : > { %v6000_v54 = vpop.eup %4548  ;;  %4556 = vpow2.f32 %v3042_v23  ;;  %v4284_v44 = vpop.f32.mrf.mxu1  ;;  %v6025_v30 = vadd.f32 %v4182_v12, %v5844_v18  ;;  %v4188_v48 = vadd.f32 %v5970_v29, %v5966_v34  ;;  %v4191_v18 = vadd.f32 %v5979_v63, %v5975_v52 }
 0x2b6   : > { %v3107_v42 = vadd.f32 1.0, %v6000_v54  ;;  %v6009_v3 = vpop.f32.mrf.mxu0  ;;  %v3044_v39 = vmul.f32 1.442695, %v3007_v24  ;;  %v2976_v20 = vand.u32 2147483647, %v6004_v10  ;;  %v4285_v23 = vadd.f32 %v4284_v44, %v4283_v16 }
 0x2b7   : > { %v4286_v58 = vpop.f32.mrf.mxu1  ;;  %v4194_v12 = vadd.f32 %v4193_v6, %v4192_v49  ;;  %v3110_v29 = vmul.f32 -0.5, %v6000_v54  ;;  %v6051_v52 = vadd.f32 %v4188_v48, %v5856_v21  ;;  %v3104_v49 = vand.u32 2147483647, %v5987_v14 }
 0x2b8   : > { %4558 = vlog2.f32 %v3107_v42  ;;  %v6017_v1 = vpop.f32.mrf.mxu0  ;;  %v3008_v28 = vsub.f32 0.0, %v2976_v20  ;;  %v6033_v57 = vadd.f32 %v4285_v23, %v2678_v19 }
 0x2b9   : > { %v6019_v33 = vpop.eup %4550  ;;  %4560 = vpow2.f32 %v3044_v39  ;;  %v4287_v38 = vpop.f32.mrf.mxu1  ;;  %v6036_v39 = vadd.f32 %v4185_v43, %v5850_v60  ;;  %v3111_v48 = vadd.f32 1.0, %v3110_v29  ;;  %v6066_v16 = vadd.f32 %v4194_v12, %v5868_v53 }
 0x2ba   : > { %v3116_v24 = vadd.f32 1.0, %v6019_v33  ;;  %v6030_v32 = vpop.f32.mrf.mxu0  ;;  %v3046_v59 = vmul.f32 1.442695, %v3008_v28  ;;  %v4288_v44 = vadd.f32 %v4287_v38, %v4286_v58  ;;  %v2977_v19 = vand.u32 2147483647, %v6033_v57 }
 0x2bb   : > { %v4289_v42 = vpop.f32.mrf.mxu1  ;;  %v3102_v28 = vadd.f32 1.0, %v3101_v27  ;;  %v6059_v27 = vadd.f32 %v4191_v18, %v5862_v7  ;;  %v3119_v18 = vmul.f32 -0.5, %v6019_v33  ;;  %vm3105_vm0 = vcmp.lt.f32.partialorder %v3104_v49, 0.0004427343 }
 0x2bc   : > { %4562 = vlog2.f32 %v3116_v24  ;;  %v6040_v20 = vpop.f32.mrf.mxu0  ;;  %v6046_v23 = vadd.f32 %v4288_v44, %v2683_v41  ;;  %v3009_v38 = vsub.f32 0.0, %v2977_v19  ;;  %v3113_v29 = vand.u32 2147483647, %v6000_v54 }
 0x2bd   : > { %v6042_v34 = vpop.eup %4552  ;;  %4564 = vpow2.f32 %v3046_v59  ;;  %v4290_v58 = vpop.f32.mrf.mxu1  ;;  %v3103_v7 = vmul.f32 %v5987_v14, %v3102_v28  ;;  %v3112_v49 = vmul.f32 %v6000_v54, %v3111_v48 }
 0x2be   : > { %v3125_v43 = vadd.f32 1.0, %v6042_v34  ;;  %v6053_v63 = vpop.f32.mrf.mxu0  ;;  %v2978_v41 = vand.u32 2147483647, %v6046_v23  ;;  %v4291_v44 = vadd.f32 %v4290_v58, %v4289_v42  ;;  %v3048_v6 = vmul.f32 1.442695, %v3009_v38 }
 0x2bf   : > { %v4292_v24 = vpop.f32.mrf.mxu1  ;;  %v3128_v8 = vmul.f32 -0.5, %v6042_v34  ;;  %vm3114_vm1 = vcmp.lt.f32.partialorder %v3113_v29, 0.0004427343  ;;  %v6693_v29 = vmax.f32 %v5952_v0, 0.0  ;;  %v3131_v0 = vand.u32 2147483647, %v6042_v34 }
 0x2c0   : > { %4566 = vlog2.f32 %v3125_v43  ;;  %v6062_v60 = vpop.f32.mrf.mxu0  ;;  %v3010_v19 = vsub.f32 0.0, %v2978_v41  ;;  %v6072_v59 = vadd.f32 %v4291_v44, %v2686_v25  ;;  %v6692_v25 = vmax.f32 %v5944_v15, 0.0 }
 0x2c1   : > { %v4555_v21 = vpop.eup %4554  ;;  %v4293_v36 = vpop.f32.mrf.mxu1  ;;  %4568 = vpow2.f32 %v3048_v6  ;;  %v3122_v15 = vand.u32 2147483647, %v6019_v33  ;;  %vm3132_vm3 = vcmp.lt.f32.partialorder %v3131_v0, 0.0004427343  ;;  %v6695_v0 = vmax.f32 %v5968_v4, 0.0 }
 0x2c2   : > { %v6068_v2 = vpop.eup %4556  ;;  %v3100_v43 = vmul.f32 0.6931472, %v4555_v21  ;;  %v6074_v42 = vpop.f32.mrf.mxu0  ;;  %v3050_v38 = vmul.f32 1.442695, %v3010_v19  ;;  %v2979_v41 = vand.u32 2147483647, %v6072_v59  ;;  %v4294_v21 = vadd.f32 %v4293_v36, %v4292_v24 }
 0x2c3   : > { %v3134_v53 = vadd.f32 1.0, %v6068_v2  ;;  %v4295_v12 = vpop.f32.mrf.mxu1  ;;  %v3120_v19 = vadd.f32 1.0, %v3119_v18  ;;  %v4197_v36 = vadd.f32 %v5998_v26, %v5991_v13  ;;  %v4200_v13 = vadd.f32 %v6017_v1, %v6009_v3 }
 0x2c4   : > { %v3106_v58 = vsel %vm3105_vm0, %v3103_v7, %v3100_v43  ;;  %v6079_v14 = vpop.f32.mrf.mxu0  ;;  %v3011_v7 = vsub.f32 0.0, %v2979_v41  ;;  %vm3123_vm2 = vcmp.lt.f32.partialorder %v3122_v15, 0.0004427343 }
 0x2c5   : > { %v4559_v28 = vpop.eup %4558  ;;  %v3386_v44 = vadd.f32 %v3106_v58, %v6692_v25  ;;  %4570 = vlog2.f32 %v3134_v53  ;;  %v4296_v55 = vpop.f32.mrf.mxu1  ;;  %v6100_v58 = vadd.f32 %v4294_v21, %v6025_v30  ;;  %v3129_v25 = vadd.f32 1.0, %v3128_v8 }
 0x2c6   : > { %v6085_v6 = vpop.eup %4560  ;;  %v3109_v43 = vmul.f32 0.6931472, %v4559_v28  ;;  %4572 = vpow2.f32 %v3050_v38  ;;  %v6087_v9 = vpop.f32.mrf.mxu0  ;;  %v3052_v53 = vmul.f32 1.442695, %v3011_v7  ;;  %v3137_v8 = vmul.f32 -0.5, %v6068_v2 }
 0x2c7   : > { %3418 = vst [vmem:[%s6091_s22] sm:$0xff] %v3386_v44  ;;  %v3143_v54 = vadd.f32 1.0, %v6085_v6  ;;  %v4298_v24 = vpop.f32.mrf.mxu1  ;;  %v2980_v30 = vand.u32 2147483647, %v6100_v58 }
 0x2c8   : > { %v3115_v48 = vsel %vm3114_vm1, %v3112_v49, %v3109_v43  ;;  %v6102_v38 = vpop.f32.mrf.mxu0  ;;  %v3121_v43 = vmul.f32 %v6019_v33, %v3120_v19  ;;  %v4297_v19 = vadd.f32 %v4296_v55, %v4295_v12  ;;  %v3138_v12 = vadd.f32 1.0, %v3137_v8 }
 0x2c9   : > { %v4563_v41 = vpop.eup %4562  ;;  %v3387_v28 = vadd.f32 %v3115_v48, %v6693_v29  ;;  %4574 = vlog2.f32 %v3143_v54  ;;  %v4299_v26 = vpop.f32.mrf.mxu1  ;;  %v6119_v54 = vadd.f32 %v4197_v36, %v5874_v50  ;;  %v3012_v33 = vsub.f32 0.0, %v2980_v30 }
 0x2ca   : > { %v6108_v44 = vpop.eup %4564  ;;  %v3118_v49 = vmul.f32 0.6931472, %v4563_v41  ;;  %4576 = vpow2.f32 %v3052_v53  ;;  %v6112_v21 = vpop.f32.mrf.mxu0  ;;  %v6694_v41 = vmax.f32 %v5960_v37, 0.0  ;;  %v3130_v29 = vmul.f32 %v6042_v34, %v3129_v25 }
 0x2cb   : > { %3419 = vst [vmem:[%s6091_s22 + $0x8] sm:$0xff] %v3387_v28  ;;  %v3152_v7 = vadd.f32 1.0, %v6108_v44  ;;  %v4301_v3 = vpop.f32.mrf.mxu1  ;;  %v3140_v28 = vand.u32 2147483647, %v6068_v2  ;;  %v6129_v50 = vadd.f32 %v4297_v19, %v6036_v39  ;;  %v6135_v37 = vadd.f32 %v4200_v13, %v5880_v61 }
 0x2cc   : > { %v3124_v1 = vsel %vm3123_vm2, %v3121_v43, %v3118_v49  ;;  %v6121_v48 = vpop.f32.mrf.mxu0  ;;  %v3146_v49 = vmul.f32 -0.5, %v6085_v6  ;;  %v3054_v43 = vmul.f32 1.442695, %v3012_v33  ;;  %v4300_v34 = vadd.f32 %v4299_v26, %v4298_v24 }
 0x2cd   : > { %v4567_v53 = vpop.eup %4566  ;;  %v3388_v15 = vadd.f32 %v3124_v1, %v6694_v41  ;;  %4578 = vlog2.f32 %v3152_v7  ;;  %v4302_v18 = vpop.f32.mrf.mxu1  ;;  %v2945_v7 = vmax.f32 %v6033_v57, 0.0  ;;  %v2981_v39 = vand.u32 2147483647, %v6129_v50 }
 0x2ce   : > { %v3127_v51 = vmul.f32 0.6931472, %v4567_v53  ;;  %v6131_v55 = vpop.f32.mrf.mxu0  ;;  %v6139_v25 = vpop.eup %4568  ;;  %4580 = vpow2.f32 %v3054_v43  ;;  %vm6147_vm4 = vcmp.lt.f32.partialorder %v3140_v28, 0.0004427343  ;;  %v3147_v33 = vadd.f32 1.0, %v3146_v49 }
 0x2cf   : > { %3420 = vst [vmem:[%s6091_s22 + $0x10] sm:$0xff] %v3388_v15  ;;  %v6137_v36 = vpop.f32.mrf.mxu1  ;;  %v3161_v24 = vadd.f32 1.0, %v6139_v25  ;;  %v3155_v19 = vmul.f32 -0.5, %v6108_v44  ;;  %v3013_v53 = vsub.f32 0.0, %v2981_v39  ;;  %v6156_v41 = vadd.f32 %v4300_v34, %v6051_v52 }
 0x2d0   : > { %v3133_v30 = vsel %vm3132_vm3, %v3130_v29, %v3127_v51  ;;  %v6143_v1 = vpop.f32.mrf.mxu0  ;;  %v4203_v51 = vadd.f32 %v6040_v20, %v6030_v32  ;;  %v3139_v28 = vmul.f32 %v6068_v2, %v3138_v12  ;;  %v4303_v43 = vadd.f32 %v4302_v18, %v4301_v3 }
 0x2d1   : > { %v3389_v8 = vadd.f32 %v3133_v30, %v6695_v0  ;;  %v4305_v13 = vpop.f32.mrf.mxu1  ;;  %4582 = vlog2.f32 %v3161_v24  ;;  %v3149_v20 = vand.u32 2147483647, %v6085_v6  ;;  %v2946_v49 = vmax.f32 %v6046_v23, 0.0 }
 0x2d2   : > { %v4571_v26 = vpop.eup %4570  ;;  %v6158_v4 = vpop.f32.mrf.mxu0  ;;  %v3056_v39 = vmul.f32 1.442695, %v3013_v53  ;;  %v6172_v0 = vadd.f32 %v4203_v51, %v5884_v47  ;;  %v4206_v2 = vadd.f32 %v6062_v60, %v6053_v63  ;;  %v2982_v18 = vand.u32 2147483647, %v6156_v41 }
 0x2d3   : > { %v6160_v15 = vpop.eup %4572  ;;  %3421 = vst [vmem:[%s6091_s22 + $0x18] sm:$0xff] %v3389_v8  ;;  %v3136_v29 = vmul.f32 0.6931472, %v4571_v26  ;;  %v4307_v32 = vpop.f32.mrf.mxu1  ;;  %v6698_v8 = vmax.f32 %v5977_v40, 0.0  ;;  %v3148_v26 = vmul.f32 %v6085_v6, %v3147_v33  ;;  %v3156_v53 = vadd.f32 1.0, %v3155_v19 }
 0x2d4   : > { %v3170_v30 = vadd.f32 1.0, %v6160_v15  ;;  %v6167_v52 = vpop.f32.mrf.mxu0  ;;  %v3014_v47 = vsub.f32 0.0, %v2982_v18  ;;  %v6183_v51 = vadd.f32 %v4303_v43, %v6059_v27  ;;  %vm3150_vm5 = vcmp.lt.f32.partialorder %v3149_v20, 0.0004427343 }
 0x2d5   : > { %v3142_v34 = vsel %vm6147_vm4, %v3139_v28, %v3136_v29  ;;  %v4308_v3 = vpop.f32.mrf.mxu1  ;;  %v3158_v63 = vand.u32 2147483647, %v6108_v44  ;;  %v2947_v40 = vmax.f32 %v6072_v59, 0.0  ;;  %v3164_v19 = vmul.f32 -0.5, %v6139_v25 }
 0x2d6   : > { %v4575_v12 = vpop.eup %4574  ;;  %v3390_v24 = vadd.f32 %v3142_v34, %v6698_v8  ;;  %4584 = vlog2.f32 %v3170_v30  ;;  %v6189_v6 = vpop.f32.mrf.mxu0  ;;  %v3058_v30 = vmul.f32 1.442695, %v3014_v47  ;;  %v6699_v34 = vmax.f32 %v5985_v46, 0.0 }
 0x2d7   : > { %v6180_v61 = vpop.eup %4576  ;;  %v3145_v29 = vmul.f32 0.6931472, %v4575_v12  ;;  %4586 = vpow2.f32 %v3056_v39  ;;  %v4310_v60 = vpop.f32.mrf.mxu1  ;;  %v2983_v39 = vand.u32 2147483647, %v6183_v51  ;;  %v3173_v18 = vmul.f32 -0.5, %v6160_v15 }
 0x2d8   : > { %3422 = vst [vmem:[%s6091_s22 + $0x20] sm:$0xff] %v3390_v24  ;;  %v3179_v28 = vadd.f32 1.0, %v6180_v61  ;;  %v6197_v12 = vadd.f32 %v4206_v2, %v5888_v5  ;;  %v3157_v24 = vmul.f32 %v6108_v44, %v3156_v53  ;;  %vm3159_vm6 = vcmp.lt.f32.partialorder %v3158_v63, 0.0004427343 }
 0x2d9   : > { %v3151_v33 = vsel %vm3150_vm5, %v3148_v26, %v3145_v29  ;;  %v4311_v27 = vpop.f32.mrf.mxu1  ;;  %v3015_v26 = vsub.f32 0.0, %v2983_v39  ;;  %v4209_v47 = vadd.f32 %v6079_v14, %v6074_v42  ;;  %v4306_v46 = vadd.f32 %v4305_v13, %v6137_v36 }
 0x2da   : > { %v4579_v43 = vpop.eup %4578  ;;  %v3391_v20 = vadd.f32 %v3151_v33, %v6699_v34  ;;  %4588 = vlog2.f32 %v3179_v28  ;;  %v4309_v33 = vadd.f32 %v4308_v3, %v4307_v32  ;;  %v6204_v34 = vpop.f32.mrf.mxu0  ;;  %v3165_v2 = vadd.f32 1.0, %v3164_v19 }
 0x2db   : > { %v3154_v8 = vmul.f32 0.6931472, %v4579_v43  ;;  %4590 = vpow2.f32 %v3058_v30  ;;  %v4313_v29 = vpop.f32.mrf.mxu1  ;;  %v6206_v28 = vpop.eup %4580  ;;  %v3167_v44 = vand.u32 2147483647, %v6139_v25  ;;  %v3060_v53 = vmul.f32 1.442695, %v3015_v26 }
 0x2dc   : > { %3423 = vst [vmem:[%s6091_s22 + $0x28] sm:$0xff] %v3391_v20  ;;  %v6700_v39 = vmax.f32 %v6004_v10, 0.0  ;;  %v3174_v43 = vadd.f32 1.0, %v3173_v18  ;;  %v3176_v42 = vand.u32 2147483647, %v6160_v15  ;;  %v3188_v14 = vadd.f32 1.0, %v6206_v28 }
 0x2dd   : > { %v3160_v5 = vsel %vm3159_vm6, %v3157_v24, %v3154_v8  ;;  %v4314_v30 = vpop.f32.mrf.mxu1  ;;  %v3182_v36 = vmul.f32 -0.5, %v6180_v61  ;;  %4592 = vpow2.f32 %v3060_v53  ;;  %v6215_v13 = vadd.f32 %v4306_v46, %v6066_v16  ;;  %v6229_v8 = vpop.f32.mrf.mxu0 }
 0x2de   : > { %v3392_v63 = vadd.f32 %v3160_v5, %v6700_v39  ;;  %v6218_v32 = vadd.f32 %v4309_v33, %v6119_v54  ;;  %v4583_v19 = vpop.eup %4582  ;;  %v2948_v10 = vmax.f32 %v6100_v58, 0.0  ;;  %4594 = vlog2.f32 %v3188_v14 }
 0x2df   : > { %v6220_v3 = vpop.f32.mrf.mxu1  ;;  %v6225_v20 = vadd.f32 %v4209_v47, %v5892_v11  ;;  %v4212_v18 = vadd.f32 %v6102_v38, %v6087_v9  ;;  %v3163_v16 = vmul.f32 0.6931472, %v4583_v19  ;;  %v3166_v24 = vmul.f32 %v6139_v25, %v3165_v2 }
 0x2e0   : > { %3424 = vst [vmem:[%s6091_s22 + $0x30] sm:$0xff] %v3392_v63  ;;  %v4215_v54 = vadd.f32 %v6121_v48, %v6112_v21  ;;  %v2984_v26 = vand.u32 2147483647, %v6215_v13  ;;  %vm3168_vm7 = vcmp.lt.f32.partialorder %v3167_v44, 0.0004427343  ;;  %v4312_v9 = vadd.f32 %v4311_v27, %v4310_v60  ;;  %v6252_v60 = vpop.f32.mrf.mxu0 }
 0x2e1   : > { %v6235_v46 = vpop.f32.mrf.mxu1  ;;  %vm6237_vm8 = vcmp.lt.f32.partialorder %v3176_v42, 0.0004427343  ;;  %v2985_v11 = vand.u32 2147483647, %v6218_v32  ;;  %v3169_v47 = vsel %vm3168_vm7, %v3166_v24, %v3163_v16  ;;  %v3175_v25 = vmul.f32 %v6160_v15, %v3174_v43 }
 0x2e2   : > { %v3183_v5 = vadd.f32 1.0, %v3182_v36  ;;  %v3016_v2 = vsub.f32 0.0, %v2984_v26  ;;  %v3393_v44 = vadd.f32 %v3169_v47, %v2945_v7  ;;  %v6250_v63 = vadd.f32 %v4312_v9, %v6135_v37 }
 0x2e3   : > { %v4585_v38 = vpop.eup %4584  ;;  %v6243_v21 = vpop.f32.mrf.mxu1  ;;  %v3017_v39 = vsub.f32 0.0, %v2985_v11  ;;  %v3185_v27 = vand.u32 2147483647, %v6180_v61  ;;  %v3191_v15 = vmul.f32 -0.5, %v6206_v28  ;;  %v4315_v37 = vadd.f32 %v4314_v30, %v4313_v29 }
 0x2e4   : > { %v6245_v48 = vpop.eup %4586  ;;  %v3172_v53 = vmul.f32 0.6931472, %v4585_v38  ;;  %v3062_v42 = vmul.f32 1.442695, %v3016_v2  ;;  %3425 = vst [vmem:[%s6091_s22 + $0x38] sm:$0xff] %v3393_v44  ;;  %v2949_v24 = vmax.f32 %v6129_v50, 0.0  ;;  %v6265_v26 = vadd.f32 %v4212_v18, %v5896_v35 }
 0x2e5   : > { %v3197_v43 = vadd.f32 1.0, %v6245_v48  ;;  %v4320_v14 = vpop.f32.mrf.mxu1  ;;  %v3064_v7 = vmul.f32 1.442695, %v3017_v39  ;;  %v2986_v36 = vand.u32 2147483647, %v6250_v63  ;;  %v3184_v38 = vmul.f32 %v6180_v61, %v3183_v5 }
 0x2e6   : > { %v3178_v57 = vsel %vm6237_vm8, %v3175_v25, %v3172_v53  ;;  %v6270_v25 = vpop.f32.mrf.mxu0  ;;  %vm3186_vm9 = vcmp.lt.f32.partialorder %v3185_v27, 0.0004427343  ;;  %v3192_v23 = vadd.f32 1.0, %v3191_v15  ;;  %v4218_v29 = vadd.f32 %v6143_v1, %v6131_v55 }
 0x2e7   : > { %v4589_v19 = vpop.eup %4588  ;;  %v3394_v16 = vadd.f32 %v3178_v57, %v2946_v49  ;;  %4596 = vlog2.f32 %v3197_v43  ;;  %v4322_v11 = vpop.f32.mrf.mxu1  ;;  %v3018_v47 = vsub.f32 0.0, %v2986_v36  ;;  %v6277_v2 = vadd.f32 %v4315_v37, %v6172_v0 }
 0x2e8   : > { %v6267_v9 = vpop.eup %4590  ;;  %v3181_v33 = vmul.f32 0.6931472, %v4589_v19  ;;  %4598 = vpow2.f32 %v3062_v42  ;;  %v3194_v5 = vand.u32 2147483647, %v6206_v28  ;;  %v6283_v44 = vadd.f32 %v4215_v54, %v5900_v22  ;;  %v4229_v27 = vpop.f32.mrf.mxu0 }
 0x2e9   : > { %3426 = vst [vmem:[%s6091_s22 + $0x40] sm:$0xff] %v3394_v16  ;;  %v3206_v49 = vadd.f32 1.0, %v6267_v9  ;;  %v4323_v35 = vpop.f32.mrf.mxu1  ;;  %4600 = vpow2.f32 %v3064_v7  ;;  %v3066_v18 = vmul.f32 1.442695, %v3018_v47  ;;  %v2950_v1 = vmax.f32 %v6156_v41, 0.0 }
 0x2ea   : > { %v3187_v30 = vsel %vm3186_vm9, %v3184_v38, %v3181_v33  ;;  %v6287_v55 = vpop.eup %4592  ;;  %v2951_v39 = vmax.f32 %v6183_v51, 0.0  ;;  %v2987_v0 = vand.u32 2147483647, %v6277_v2  ;;  %v6296_v22 = vadd.f32 %v4218_v29, %v5904_v31  ;;  %v6314_v33 = vpop.f32.mrf.mxu0 }
 0x2eb   : > { %v3395_v61 = vadd.f32 %v3187_v30, %v2947_v40  ;;  %4602 = vlog2.f32 %v3206_v49  ;;  %v6285_v53 = vpop.f32.mrf.mxu1  ;;  %v4595_v59 = vpop.eup %4594  ;;  %v3200_v40 = vmul.f32 -0.5, %v6245_v48  ;;  %v3215_v15 = vadd.f32 1.0, %v6287_v55 }
 0x2ec   : > { %4604 = vpow2.f32 %v3066_v18  ;;  %v4221_v54 = vadd.f32 %v6167_v52, %v6158_v4  ;;  %v3190_v42 = vmul.f32 0.6931472, %v4595_v59  ;;  %v3193_v57 = vmul.f32 %v6206_v28, %v3192_v23 }
 0x2ed   : > { %3427 = vst [vmem:[%s6091_s22 + $0x48] sm:$0xff] %v3395_v61  ;;  %v6300_v43 = vpop.f32.mrf.mxu1  ;;  %v3019_v7 = vsub.f32 0.0, %v2987_v0  ;;  %v4318_v36 = vadd.f32 %v6235_v46, %v6220_v3  ;;  %vm3195_vm10 = vcmp.lt.f32.partialorder %v3194_v5, 0.0004427343  ;;  %4606 = vlog2.f32 %v3215_v15 }
 0x2ee   : > { %v4224_v37 = vadd.f32 %v6204_v34, %v6189_v6  ;;  %v4321_v31 = vadd.f32 %v4320_v14, %v6243_v21  ;;  %v3196_v4 = vsel %vm3195_vm10, %v3193_v57, %v3190_v42  ;;  %v3209_v52 = vmul.f32 -0.5, %v6267_v9  ;;  %v6705_v42 = vld [vmem:[#allocation12_spill] sm:$0xff] }
 0x2ef   : > { %v6308_v19 = vpop.f32.mrf.mxu1  ;;  %v3068_v16 = vmul.f32 1.442695, %v3019_v7  ;;  %v6312_v28 = vadd.f32 %v4318_v36, %v6197_v12  ;;  %v3396_v3 = vadd.f32 %v3196_v4, %v2948_v10  ;;  %v3201_v46 = vadd.f32 1.0, %v3200_v40 }
 0x2f0   : > { %v6319_v6 = vadd.f32 %v4221_v54, %v5908_v45  ;;  %v6322_v34 = vadd.f32 %v4321_v31, %v6225_v20  ;;  %v3203_v14 = vand.u32 2147483647, %v6245_v48  ;;  %v4324_v12 = vadd.f32 %v4323_v35, %v4322_v11  ;;  %v4232_v35 = vpop.f32.mrf.mxu0 }
 0x2f1   : > { %v4329_v21 = vpop.f32.mrf.mxu1  ;;  %4608 = vpow2.f32 %v3068_v16  ;;  %v2988_v38 = vand.u32 2147483647, %v6312_v28  ;;  %3428 = vst [vmem:[%s6091_s22 + $0x50] sm:$0xff] %v3396_v3  ;;  %v3212_v47 = vand.u32 2147483647, %v6267_v9  ;;  %v6329_v58 = vadd.f32 %v4224_v37, %v5911_v62 }
 0x2f2   : > { %v4227_v45 = vadd.f32 %v6252_v60, %v6229_v8  ;;  %v2989_v10 = vand.u32 2147483647, %v6322_v34  ;;  %v3210_v49 = vadd.f32 1.0, %v3209_v52  ;;  %v2952_v29 = vmax.f32 %v6215_v13, 0.0  ;;  %v4234_v37 = vpop.f32.mrf.mxu0 }
 0x2f3   : > { %v6334_v20 = vpop.f32.mrf.mxu1  ;;  %v2953_v30 = vmax.f32 %v6218_v32, 0.0  ;;  %v3020_v11 = vsub.f32 0.0, %v2988_v38  ;;  %v3202_v62 = vmul.f32 %v6245_v48, %v3201_v46  ;;  %v3218_v5 = vmul.f32 -0.5, %v6287_v55 }
 0x2f4   : > { %v4597_v23 = vpop.eup %4596  ;;  %v6343_v8 = vadd.f32 %v4324_v12, %v6265_v26  ;;  %vm3204_vm11 = vcmp.lt.f32.partialorder %v3203_v14, 0.0004427343  ;;  %v4230_v59 = vadd.f32 %v4229_v27, %v6270_v25  ;;  %v3021_v40 = vsub.f32 0.0, %v2989_v10 }
 0x2f5   : > { %v6338_v18 = vpop.eup %4598  ;;  %v3199_v61 = vmul.f32 0.6931472, %v4597_v23  ;;  %v6345_v60 = vpop.f32.mrf.mxu1  ;;  %vm6351_vm12 = vcmp.lt.f32.partialorder %v3212_v47, 0.0004427343  ;;  %v2954_v48 = vmax.f32 %v6250_v63, 0.0  ;;  %v6357_v26 = vadd.f32 %v4227_v45, %v5913_v17 }
 0x2f6   : > { %v3224_v0 = vadd.f32 1.0, %v6338_v18  ;;  %v6349_v15 = vpop.eup %4600  ;;  %v3211_v27 = vmul.f32 %v6267_v9, %v3210_v49  ;;  %v3070_v36 = vmul.f32 1.442695, %v3020_v11  ;;  %v3219_v52 = vadd.f32 1.0, %v3218_v5 }
 0x2f7   : > { %v3205_v54 = vsel %vm3204_vm11, %v3202_v62, %v3199_v61  ;;  %v6359_v57 = vpop.f32.mrf.mxu1  ;;  %v3233_v16 = vadd.f32 1.0, %v6349_v15  ;;  %v2990_v17 = vand.u32 2147483647, %v6343_v8  ;;  %v3221_v46 = vand.u32 2147483647, %v6287_v55 }
 0x2f8   : > { %v4603_v7 = vpop.eup %4602  ;;  %v3397_v25 = vadd.f32 %v3205_v54, %v2949_v24  ;;  %4610 = vlog2.f32 %v3224_v0  ;;  %v3072_v24 = vmul.f32 1.442695, %v3021_v40  ;;  %v4327_v9 = vadd.f32 %v6300_v43, %v6285_v53  ;;  %v4235_v53 = vpop.f32.mrf.mxu0 }
 0x2f9   : > { %v6364_v31 = vpop.eup %4604  ;;  %v3208_v4 = vmul.f32 0.6931472, %v4603_v7  ;;  %v4335_v3 = vpop.f32.mrf.mxu1  ;;  %4612 = vlog2.f32 %v3233_v16  ;;  %v2955_v38 = vmax.f32 %v6277_v2, 0.0  ;;  %v4330_v12 = vadd.f32 %v4329_v21, %v6308_v19 }
 0x2fa   : > { %3429 = vst [vmem:[%s6091_s22 + $0x58] sm:$0xff] %v3397_v25  ;;  %v3242_v50 = vadd.f32 1.0, %v6364_v31  ;;  %v4607_v45 = vpop.eup %4606  ;;  %v3227_v23 = vmul.f32 -0.5, %v6338_v18  ;;  %v4233_v49 = vadd.f32 %v4232_v35, %v6314_v33  ;;  %v3220_v11 = vmul.f32 %v6287_v55, %v3219_v52  ;;  %v4237_v40 = vpop.f32.mrf.mxu0 }
 0x2fb   : > { %v3214_v14 = vsel %vm6351_vm12, %v3211_v27, %v3208_v4  ;;  %v4337_v47 = vpop.f32.mrf.mxu1  ;;  %v3217_v43 = vmul.f32 0.6931472, %v4607_v45  ;;  %v3022_v61 = vsub.f32 0.0, %v2990_v17  ;;  %vm3222_vm13 = vcmp.lt.f32.partialorder %v3221_v46, 0.0004427343 }
 0x2fc   : > { %v3398_v10 = vadd.f32 %v3214_v14, %v2950_v1  ;;  %4614 = vlog2.f32 %v3242_v50  ;;  %v6384_v19 = vadd.f32 %v4230_v59, %v5915_v56  ;;  %v6387_v41 = vadd.f32 %v4327_v9, %v6283_v44 }
 0x2fd   : > { %4616 = vpow2.f32 %v3070_v36  ;;  %v4338_v62 = vpop.f32.mrf.mxu1  ;;  %v3223_v33 = vsel %vm3222_vm13, %v3220_v11, %v3217_v43  ;;  %v3230_v21 = vand.u32 2147483647, %v6338_v18  ;;  %v3074_v35 = vmul.f32 1.442695, %v3022_v61 }
 0x2fe   : > { %3430 = vst [vmem:[%s6091_s22 + $0x60] sm:$0xff] %v3398_v10  ;;  %4618 = vpow2.f32 %v3072_v24  ;;  %v6389_v1 = vpop.eup %4608  ;;  %v6393_v55 = vadd.f32 %v4330_v12, %v6296_v22  ;;  %v3399_v0 = vadd.f32 %v3223_v33, %v2951_v39  ;;  %v3228_v56 = vadd.f32 1.0, %v3227_v23  ;;  %v4238_v24 = vpop.f32.mrf.mxu0 }
 0x2ff   : > { %v4340_v5 = vpop.f32.mrf.mxu1  ;;  %v3236_v59 = vmul.f32 -0.5, %v6349_v15  ;;  %v3251_v44 = vadd.f32 1.0, %v6389_v1  ;;  %v3245_v54 = vmul.f32 -0.5, %v6364_v31  ;;  %v6401_v7 = vadd.f32 %v4233_v49, %v6705_v42 }
 0x300   : > { %4620 = vpow2.f32 %v3074_v35  ;;  %v2991_v25 = vand.u32 2147483647, %v6387_v41  ;;  %3431 = vst [vmem:[%s6091_s22 + $0x68] sm:$0xff] %v3399_v0  ;;  %v2956_v51 = vmax.f32 %v6312_v28, 0.0  ;;  %v6406_v39 = vadd.f32 %v4235_v53, %v4234_v37 }
 0x301   : > { %v4341_v22 = vpop.f32.mrf.mxu1  ;;  %4622 = vlog2.f32 %v3251_v44  ;;  %v2992_v27 = vand.u32 2147483647, %v6393_v55  ;;  %v3239_v36 = vand.u32 2147483647, %v6349_v15  ;;  %v4333_v52 = vadd.f32 %v6345_v60, %v6334_v20 }
 0x302   : > { %v3023_v4 = vsub.f32 0.0, %v2991_v25  ;;  %v4336_v16 = vadd.f32 %v4335_v3, %v6359_v57  ;;  %v3229_v46 = vmul.f32 %v6338_v18, %v3228_v56  ;;  %vm6416_vm14 = vcmp.lt.f32.partialorder %v3230_v21, 0.0004427343 }
 0x303   : > { %v6413_v17 = vpop.f32.mrf.mxu1  ;;  %v3237_v37 = vadd.f32 1.0, %v3236_v59  ;;  %v3024_v9 = vsub.f32 0.0, %v2992_v27  ;;  %v3246_v12 = vadd.f32 1.0, %v3245_v54  ;;  %v6421_v10 = vadd.f32 %v4333_v52, %v6319_v6 }
 0x304   : > { %v3076_v45 = vmul.f32 1.442695, %v3023_v4  ;;  %v6424_v20 = vadd.f32 %v4336_v16, %v6329_v58  ;;  %v4339_v3 = vadd.f32 %v4338_v62, %v4337_v47  ;;  %v4342_v23 = vadd.f32 %v4341_v22, %v4340_v5  ;;  %v4240_v62 = vpop.f32.mrf.mxu0 }
 0x305   : > { %v4611_v14 = vpop.eup %4610  ;;  %v6426_v60 = vpop.f32.mrf.mxu1  ;;  %v3078_v18 = vmul.f32 1.442695, %v3024_v9  ;;  %vm6428_vm15 = vcmp.lt.f32.partialorder %v3239_v36, 0.0004427343  ;;  %v3248_v53 = vand.u32 2147483647, %v6364_v31  ;;  %v3238_v61 = vmul.f32 %v6349_v15, %v3237_v37 }
 0x306   : > { %v3226_v57 = vmul.f32 0.6931472, %v4611_v14  ;;  %4624 = vpow2.f32 %v3076_v45  ;;  %v2993_v43 = vand.u32 2147483647, %v6421_v10  ;;  %v4613_v11 = vpop.eup %4612  ;;  %v3254_v47 = vmul.f32 -0.5, %v6389_v1  ;;  %v4241_v4 = vpop.f32.mrf.mxu0  ;;  %v6710_v9 = vld [vmem:[#allocation13_spill] sm:$0xff] }
 0x307   : > { %v6434_v6 = vpop.f32.mrf.mxu1  ;;  %4626 = vpow2.f32 %v3078_v18  ;;  %v3235_v35 = vmul.f32 0.6931472, %v4613_v11  ;;  %v3247_v5 = vmul.f32 %v6364_v31, %v3246_v12  ;;  %v2994_v0 = vand.u32 2147483647, %v6424_v20 }
 0x308   : > { %v3232_v58 = vsel %vm6416_vm14, %v3229_v46, %v3226_v57  ;;  %v3025_v54 = vsub.f32 0.0, %v2993_v43  ;;  %v6447_v15 = vadd.f32 %v4339_v3, %v6357_v26  ;;  %v6450_v42 = vadd.f32 %v4342_v23, %v6384_v19  ;;  %v6711_v3 = vld [vmem:[#allocation14_spill] sm:$0xff]  ;;  %v4243_v49 = vpop.f32.mrf.mxu0 }
 0x309   : > { %v4615_v33 = vpop.eup %4614  ;;  %v3400_v21 = vadd.f32 %v3232_v58, %v2952_v29  ;;  %v4347_v56 = vpop.f32.mrf.mxu1  ;;  %v3241_v13 = vsel %vm6428_vm15, %v3238_v61, %v3235_v35  ;;  %vm3249_vm0 = vcmp.lt.f32.partialorder %v3248_v53, 0.0004427343  ;;  %v4239_v31 = vadd.f32 %v4238_v24, %v4237_v40 }
 0x30a   : > { %v6444_v59 = vpop.eup %4616  ;;  %v3244_v44 = vmul.f32 0.6931472, %v4615_v33  ;;  %v3401_v27 = vadd.f32 %v3241_v13, %v2953_v30  ;;  %v3255_v36 = vadd.f32 1.0, %v3254_v47  ;;  %v3257_v16 = vand.u32 2147483647, %v6389_v1 }
 0x30b   : > { %v6452_v25 = vpop.eup %4618  ;;  %3432 = vst [vmem:[%s6091_s22 + $0x70] sm:$0xff] %v3400_v21  ;;  %v3260_v29 = vadd.f32 1.0, %v6444_v59  ;;  %v4349_v22 = vpop.f32.mrf.mxu1  ;;  %v3026_v46 = vsub.f32 0.0, %v2994_v0  ;;  %v3080_v40 = vmul.f32 1.442695, %v3025_v54  ;;  %v2957_v24 = vmax.f32 %v6322_v34, 0.0 }
 0x30c   : > { %v3250_v26 = vsel %vm3249_vm0, %v3247_v5, %v3244_v44  ;;  %v3269_v19 = vadd.f32 1.0, %v6452_v25  ;;  %3433 = vst [vmem:[%s6091_s22 + $0x78] sm:$0xff] %v3401_v27  ;;  %v2995_v32 = vand.u32 2147483647, %v6447_v15  ;;  %v2996_v30 = vand.u32 2147483647, %v6450_v42 }
 0x30d   : > { %v3402_v52 = vadd.f32 %v3250_v26, %v2954_v48  ;;  %4628 = vlog2.f32 %v3260_v29  ;;  %v6464_v50 = vpop.eup %4620  ;;  %v2763_v63 = vadd.f32 %v6406_v39, %v6710_v9  ;;  %v4242_v14 = vadd.f32 %v4241_v4, %v4240_v62  ;;  %v4350_v12 = vpop.f32.mrf.mxu1 }
 0x30e   : > { %4630 = vlog2.f32 %v3269_v19  ;;  %v4623_v37 = vpop.eup %4622  ;;  %v3278_v48 = vadd.f32 1.0, %v6464_v50  ;;  %v3256_v57 = vmul.f32 %v6389_v1, %v3255_v36  ;;  %v3263_v18 = vmul.f32 -0.5, %v6444_v59 }
 0x30f   : > { %3434 = vst [vmem:[%s6091_s22 + $0x80] sm:$0xff] %v3402_v52  ;;  %v3253_v45 = vmul.f32 0.6931472, %v4623_v37  ;;  %4632 = vpow2.f32 %v3080_v40  ;;  %vm3258_vm1 = vcmp.lt.f32.partialorder %v3257_v16, 0.0004427343  ;;  %v2766_v23 = vadd.f32 %v4239_v31, %v6711_v3  ;;  %v4352_v62 = vpop.f32.mrf.mxu1  ;;  %v6712_v31 = vld [vmem:[#allocation15_spill] sm:$0xff] }
 0x310   : > { %4634 = vlog2.f32 %v3278_v48  ;;  %v3082_v53 = vmul.f32 1.442695, %v3026_v46  ;;  %v3027_v11 = vsub.f32 0.0, %v2995_v32  ;;  %v3028_v39 = vsub.f32 0.0, %v2996_v30 }
 0x311   : > { %v3259_v43 = vsel %vm3258_vm1, %v3256_v57, %v3253_v45  ;;  %v4345_v58 = vadd.f32 %v6426_v60, %v6413_v17  ;;  %v3266_v1 = vand.u32 2147483647, %v6444_v59  ;;  %v4348_v47 = vadd.f32 %v4347_v56, %v6434_v6  ;;  %v4244_v17 = vpop.f32.mrf.mxu0  ;;  %v4353_v26 = vpop.f32.mrf.mxu1 }
 0x312   : > { %v3403_v61 = vadd.f32 %v3259_v43, %v2955_v38  ;;  %4636 = vpow2.f32 %v3082_v53  ;;  %v3264_v21 = vadd.f32 1.0, %v3263_v18  ;;  %v3272_v35 = vmul.f32 -0.5, %v6452_v25 }
 0x313   : > { %v6483_v33 = vpop.eup %4624  ;;  %v3084_v5 = vmul.f32 1.442695, %v3027_v11  ;;  %v6487_v0 = vadd.f32 %v4345_v58, %v6401_v7  ;;  %v3281_v2 = vmul.f32 -0.5, %v6464_v50  ;;  %v3086_v60 = vmul.f32 1.442695, %v3028_v39 }
 0x314   : > { %v6489_v44 = vpop.eup %4626  ;;  %3435 = vst [vmem:[%s6091_s22 + $0x88] sm:$0xff] %v3403_v61  ;;  %v3287_v38 = vadd.f32 1.0, %v6483_v33  ;;  %v6494_v6 = vadd.f32 %v4348_v47, %v2763_v63  ;;  %v3275_v56 = vand.u32 2147483647, %v6452_v25  ;;  %v4351_v13 = vadd.f32 %v4350_v12, %v4349_v22  ;;  %v4355_v12 = vpop.f32.mrf.mxu1 }
 0x315   : > { %v3296_v54 = vadd.f32 1.0, %v6489_v44  ;;  %4638 = vpow2.f32 %v3084_v5  ;;  %v2958_v7 = vmax.f32 %v6343_v8, 0.0  ;;  %v3284_v29 = vand.u32 2147483647, %v6464_v50 }
 0x316   : > { %4640 = vlog2.f32 %v3287_v38  ;;  %v2771_v27 = vadd.f32 %v4242_v14, %v6712_v31  ;;  %v3273_v36 = vadd.f32 1.0, %v3272_v35  ;;  %v4245_v19 = vadd.f32 %v4244_v17, %v4243_v49 }
 0x317   : > { %4642 = vlog2.f32 %v3296_v54  ;;  %v2997_v4 = vand.u32 2147483647, %v6487_v0  ;;  %vm6502_vm2 = vcmp.lt.f32.partialorder %v3266_v1, 0.0004427343  ;;  %v3282_v16 = vadd.f32 1.0, %v3281_v2 }
 0x318   : > { %4644 = vpow2.f32 %v3086_v60  ;;  %v2998_v22 = vand.u32 2147483647, %v6494_v6  ;;  %v3265_v46 = vmul.f32 %v6444_v59, %v3264_v21  ;;  %vm6508_vm3 = vcmp.lt.f32.partialorder %v3275_v56, 0.0004427343 }
 0x319   : > { %v3029_v32 = vsub.f32 0.0, %v2997_v4  ;;  %v6512_v30 = vadd.f32 %v4351_v13, %v2766_v23  ;;  %vm6514_vm4 = vcmp.lt.f32.partialorder %v3284_v29, 0.0004427343  ;;  %v4354_v14 = vadd.f32 %v4353_v26, %v4352_v62  ;;  %v4356_v62 = vpop.f32.mrf.mxu1 }
 0x31a   : > { %v4629_v8 = vpop.eup %4628  ;;  %v3030_v48 = vsub.f32 0.0, %v2998_v22  ;;  %v3274_v57 = vmul.f32 %v6452_v25, %v3273_v36  ;;  %v3290_v59 = vmul.f32 -0.5, %v6483_v33  ;;  %v3283_v49 = vmul.f32 %v6464_v50, %v3282_v16 }
 0x31b   : > { %v4631_v37 = vpop.eup %4630  ;;  %v3262_v9 = vmul.f32 0.6931472, %v4629_v8  ;;  %v3088_v18 = vmul.f32 1.442695, %v3029_v32  ;;  %v3299_v53 = vmul.f32 -0.5, %v6489_v44  ;;  %v6534_v50 = vadd.f32 %v4354_v14, %v2771_v27 }
 0x31c   : > { %v3271_v45 = vmul.f32 0.6931472, %v4631_v37  ;;  %v6520_v3 = vpop.eup %4632  ;;  %v2999_v43 = vand.u32 2147483647, %v6512_v30  ;;  %v3090_v61 = vmul.f32 1.442695, %v3030_v48  ;;  %v4357_v17 = vadd.f32 %v4356_v62, %v4355_v12 }
 0x31d   : > { %v3268_v23 = vsel %vm6502_vm2, %v3265_v46, %v3262_v9  ;;  %v4635_v11 = vpop.eup %4634  ;;  %v3305_v58 = vadd.f32 1.0, %v6520_v3  ;;  %4646 = vpow2.f32 %v3088_v18  ;;  %v3291_v28 = vadd.f32 1.0, %v3290_v59 }
 0x31e   : > { %v3404_v25 = vadd.f32 %v3268_v23, %v2956_v51  ;;  %v3277_v39 = vsel %vm6508_vm3, %v3274_v57, %v3271_v45  ;;  %v3280_v47 = vmul.f32 0.6931472, %v4635_v11  ;;  %v3293_v51 = vand.u32 2147483647, %v6483_v33 }
 0x31f   : > { %v3405_v1 = vadd.f32 %v3277_v39, %v2957_v24  ;;  %v6536_v21 = vpop.eup %4636  ;;  %4648 = vlog2.f32 %v3305_v58  ;;  %v3031_v35 = vsub.f32 0.0, %v2999_v43  ;;  %v3300_v34 = vadd.f32 1.0, %v3299_v53 }
 0x320   : > { %3436 = vst [vmem:[%s6091_s22 + $0x90] sm:$0xff] %v3404_v25  ;;  %v3286_v5 = vsel %vm6514_vm4, %v3283_v49, %v3280_v47  ;;  %v3314_v24 = vadd.f32 1.0, %v6536_v21  ;;  %v2959_v38 = vmax.f32 %v6387_v41, 0.0  ;;  %4650 = vpow2.f32 %v3090_v61 }
 0x321   : > { %3437 = vst [vmem:[%s6091_s22 + $0x98] sm:$0xff] %v3405_v1  ;;  %v3406_v2 = vadd.f32 %v3286_v5, %v2958_v7  ;;  %v3302_v56 = vand.u32 2147483647, %v6489_v44  ;;  %v3092_v54 = vmul.f32 1.442695, %v3031_v35  ;;  %v3292_v31 = vmul.f32 %v6483_v33, %v3291_v28  ;;  %v6721_v7 = vld [vmem:[#allocation16_spill] sm:$0xff] }
 0x322   : > { %v6545_v60 = vpop.eup %4638  ;;  %4652 = vlog2.f32 %v3314_v24  ;;  %v3000_v13 = vand.u32 2147483647, %v6534_v50  ;;  %vm6551_vm5 = vcmp.lt.f32.partialorder %v3293_v51, 0.0004427343  ;;  %v2774_v41 = vadd.f32 %v4245_v19, %v6721_v7 }
 0x323   : > { %v4641_v29 = vpop.eup %4640  ;;  %3438 = vst [vmem:[%s6091_s22 + $0xa0] sm:$0xff] %v3406_v2  ;;  %v3323_v26 = vadd.f32 1.0, %v6545_v60  ;;  %v3301_v52 = vmul.f32 %v6489_v44, %v3300_v34  ;;  %4654 = vpow2.f32 %v3092_v54  ;;  %v3308_v33 = vmul.f32 -0.5, %v6520_v3 }
 0x324   : > { %v4643_v36 = vpop.eup %4642  ;;  %v3289_v4 = vmul.f32 0.6931472, %v4641_v29  ;;  %v3032_v16 = vsub.f32 0.0, %v3000_v13  ;;  %v6561_v46 = vadd.f32 %v4357_v17, %v2774_v41  ;;  %v2960_v40 = vmax.f32 %v6393_v55, 0.0 }
 0x325   : > { %v6558_v22 = vpop.eup %4644  ;;  %v3298_v8 = vmul.f32 0.6931472, %v4643_v36  ;;  %4656 = vlog2.f32 %v3323_v26  ;;  %vm3303_vm6 = vcmp.lt.f32.partialorder %v3302_v56, 0.0004427343  ;;  %v3317_v48 = vmul.f32 -0.5, %v6536_v21 }
 0x326   : > { %v3295_v19 = vsel %vm6551_vm5, %v3292_v31, %v3289_v4  ;;  %v3332_v44 = vadd.f32 1.0, %v6558_v22  ;;  %v3094_v9 = vmul.f32 1.442695, %v3032_v16  ;;  %v3309_v14 = vadd.f32 1.0, %v3308_v33 }
 0x327   : > { %v3407_v32 = vadd.f32 %v3295_v19, %v2959_v38  ;;  %v3304_v37 = vsel %vm3303_vm6, %v3301_v52, %v3298_v8  ;;  %v3001_v12 = vand.u32 2147483647, %v6561_v46  ;;  %v3311_v45 = vand.u32 2147483647, %v6520_v3 }
 0x328   : > { %v3408_v63 = vadd.f32 %v3304_v37, %v2960_v40  ;;  %4658 = vlog2.f32 %v3332_v44  ;;  %v3326_v55 = vmul.f32 -0.5, %v6545_v60  ;;  %v3318_v23 = vadd.f32 1.0, %v3317_v48 }
 0x329   : > { %3439 = vst [vmem:[%s6091_s22 + $0xa8] sm:$0xff] %v3407_v32  ;;  %4660 = vpow2.f32 %v3094_v9  ;;  %v3033_v59 = vsub.f32 0.0, %v3001_v12  ;;  %v3310_v43 = vmul.f32 %v6520_v3, %v3309_v14  ;;  %v3320_v11 = vand.u32 2147483647, %v6536_v21 }
 0x32a   : > { %3440 = vst [vmem:[%s6091_s22 + $0xb0] sm:$0xff] %v3408_v63  ;;  %v6572_v57 = vpop.eup %4646  ;;  %v2961_v58 = vmax.f32 %v6421_v10, 0.0  ;;  %vm3312_vm7 = vcmp.lt.f32.partialorder %v3311_v45, 0.0004427343  ;;  %v3335_v61 = vmul.f32 -0.5, %v6558_v22  ;;  %v3327_v62 = vadd.f32 1.0, %v3326_v55 }
 0x32b   : > { %v3341_v49 = vadd.f32 1.0, %v6572_v57  ;;  %v3096_v25 = vmul.f32 1.442695, %v3033_v59  ;;  %v3329_v28 = vand.u32 2147483647, %v6545_v60  ;;  %v3319_v5 = vmul.f32 %v6536_v21, %v3318_v23 }
 0x32c   : > { %v4649_v18 = vpop.eup %4648  ;;  %v2962_v10 = vmax.f32 %v6424_v20, 0.0  ;;  %vm3321_vm8 = vcmp.lt.f32.partialorder %v3320_v11, 0.0004427343  ;;  %v3336_v38 = vadd.f32 1.0, %v3335_v61  ;;  %v3328_v13 = vmul.f32 %v6545_v60, %v3327_v62 }
 0x32d   : > { %v3307_v53 = vmul.f32 0.6931472, %v4649_v18  ;;  %v6578_v39 = vpop.eup %4650  ;;  %4662 = vlog2.f32 %v3341_v49  ;;  %v3338_v21 = vand.u32 2147483647, %v6558_v22  ;;  %v2963_v29 = vmax.f32 %v6447_v15, 0.0 }
 0x32e   : > { %v3350_v51 = vadd.f32 1.0, %v6578_v39  ;;  %4664 = vpow2.f32 %v3096_v25  ;;  %vm3330_vm9 = vcmp.lt.f32.partialorder %v3329_v28, 0.0004427343  ;;  %v3344_v20 = vmul.f32 -0.5, %v6572_v57 }
 0x32f   : > { %v4653_v1 = vpop.eup %4652  ;;  %v3313_v47 = vsel %vm3312_vm7, %v3310_v43, %v3307_v53  ;;  %v3337_v36 = vmul.f32 %v6558_v22, %v3336_v38  ;;  %v2964_v60 = vmax.f32 %v6450_v42, 0.0  ;;  %vm3339_vm10 = vcmp.lt.f32.partialorder %v3338_v21, 0.0004427343 }
 0x330   : > { %v3409_v3 = vadd.f32 %v3313_v47, %v2961_v58  ;;  %v3316_v35 = vmul.f32 0.6931472, %v4653_v1  ;;  %v6585_v34 = vpop.eup %4654  ;;  %4666 = vlog2.f32 %v3350_v51  ;;  %v3353_v4 = vmul.f32 -0.5, %v6578_v39 }
 0x331   : > { %v3359_v17 = vadd.f32 1.0, %v6585_v34  ;;  %v3345_v16 = vadd.f32 1.0, %v3344_v20  ;;  %v3347_v33 = vand.u32 2147483647, %v6572_v57  ;;  %v3362_v19 = vmul.f32 -0.5, %v6585_v34 }
 0x332   : > { %v4657_v24 = vpop.eup %4656  ;;  %3441 = vst [vmem:[%s6091_s22 + $0xb8] sm:$0xff] %v3409_v3  ;;  %v3322_v2 = vsel %vm3321_vm8, %v3319_v5, %v3316_v35  ;;  %v3354_v44 = vadd.f32 1.0, %v3353_v4  ;;  %v3356_v42 = vand.u32 2147483647, %v6578_v39  ;;  %v2965_v9 = vmax.f32 %v6487_v0, 0.0 }
 0x333   : > { %v3410_v56 = vadd.f32 %v3322_v2, %v2962_v10  ;;  %v3325_v54 = vmul.f32 0.6931472, %v4657_v24  ;;  %4668 = vlog2.f32 %v3359_v17  ;;  %v3346_v22 = vmul.f32 %v6572_v57, %v3345_v16 }
 0x334   : > { %vm3348_vm11 = vcmp.lt.f32.partialorder %v3347_v33, 0.0004427343  ;;  %v3363_v14 = vadd.f32 1.0, %v3362_v19  ;;  %v3365_v12 = vand.u32 2147483647, %v6585_v34  ;;  %v3355_v18 = vmul.f32 %v6578_v39, %v3354_v44 }
 0x335   : > { %v4659_v31 = vpop.eup %4658  ;;  %3442 = vst [vmem:[%s6091_s22 + $0xc0] sm:$0xff] %v3410_v56  ;;  %v3331_v27 = vsel %vm3330_vm9, %v3328_v13, %v3325_v54  ;;  %v2966_v57 = vmax.f32 %v6494_v6, 0.0  ;;  %vm3357_vm12 = vcmp.lt.f32.partialorder %v3356_v42, 0.0004427343  ;;  %v2967_v25 = vmax.f32 %v6512_v30, 0.0 }
 0x336   : > { %v4661_v7 = vpop.eup %4660  ;;  %v3411_v41 = vadd.f32 %v3331_v27, %v2963_v29  ;;  %v3334_v26 = vmul.f32 0.6931472, %v4659_v31  ;;  %v3364_v11 = vmul.f32 %v6585_v34, %v3363_v14  ;;  %vm3366_vm13 = vcmp.lt.f32.partialorder %v3365_v12, 0.0004427343 }
 0x337   : > { %v3368_v52 = vadd.f32 1.0, %v4661_v7  ;;  %v3371_v23 = vmul.f32 -0.5, %v4661_v7  ;;  %v3374_v61 = vand.u32 2147483647, %v4661_v7  ;;  %v2968_v51 = vmax.f32 %v6534_v50, 0.0 }
 0x338   : > { %3443 = vst [vmem:[%s6091_s22 + $0xc8] sm:$0xff] %v3411_v41  ;;  %v3340_v15 = vsel %vm3339_vm10, %v3337_v36, %v3334_v26  ;;  %v2969_v2 = vmax.f32 %v6561_v46, 0.0 }
 0x339   : > { %v3412_v8 = vadd.f32 %v3340_v15, %v2964_v60  ;;  %4670 = vlog2.f32 %v3368_v52  ;;  %v3372_v58 = vadd.f32 1.0, %v3371_v23  ;;  %vm3375_vm14 = vcmp.lt.f32.partialorder %v3374_v61, 0.0004427343 }
 0x33a   : > { %v4663_v40 = vpop.eup %4662 }
 0x33b   : > { %3444 = vst [vmem:[%s6091_s22 + $0xd0] sm:$0xff] %v3412_v8  ;;  %v3343_v32 = vmul.f32 0.6931472, %v4663_v40  ;;  %v4665_v37 = vpop.eup %4664  ;;  %v3373_v28 = vmul.f32 %v4661_v7, %v3372_v58 }
 0x33c   : > { %v3377_v45 = vadd.f32 1.0, %v4665_v37  ;;  %v3380_v47 = vmul.f32 -0.5, %v4665_v37  ;;  %v3383_v5 = vand.u32 2147483647, %v4665_v37 }
 0x33d   : > { %v4667_v63 = vpop.eup %4666  ;;  %v3349_v48 = vsel %vm3348_vm11, %v3346_v22, %v3343_v32 }
 0x33e   : > { %v3413_v55 = vadd.f32 %v3349_v48, %v2965_v9  ;;  %v3352_v59 = vmul.f32 0.6931472, %v4667_v63  ;;  %4672 = vlog2.f32 %v3377_v45  ;;  %v3381_v35 = vadd.f32 1.0, %v3380_v47 }
 0x33f   : > { %vm3384_vm15 = vcmp.lt.f32.partialorder %v3383_v5, 0.0004427343 }
 0x340   : > { %v4669_v49 = vpop.eup %4668  ;;  %3445 = vst [vmem:[%s6091_s22 + $0xd8] sm:$0xff] %v3413_v55  ;;  %v3358_v0 = vsel %vm3357_vm12, %v3355_v18, %v3352_v59  ;;  %v3382_v24 = vmul.f32 %v4665_v37, %v3381_v35 }
 0x341   : > { %v3414_v53 = vadd.f32 %v3358_v0, %v2966_v57  ;;  %v3361_v43 = vmul.f32 0.6931472, %v4669_v49 }
 0x343   : > { %3446 = vst [vmem:[%s6091_s22 + $0xe0] sm:$0xff] %v3414_v53  ;;  %v3367_v39 = vsel %vm3366_vm13, %v3364_v11, %v3361_v43 }
 0x344   : > { %v3415_v6 = vadd.f32 %v3367_v39, %v2967_v25 }
 0x346   : > { %v4671_v1 = vpop.eup %4670  ;;  %3447 = vst [vmem:[%s6091_s22 + $0xe8] sm:$0xff] %v3415_v6 }
 0x347   : > { %v3370_v62 = vmul.f32 0.6931472, %v4671_v1 }
 0x349   : > { %v3376_v3 = vsel %vm3375_vm14, %v3373_v28, %v3370_v62 }
 0x34a   : > { %v3416_v30 = vadd.f32 %v3376_v3, %v2968_v51 }
 0x34b   : > { %v4673_v34 = vpop.eup %4672 }
 0x34c   : > { %3448 = vst [vmem:[%s6091_s22 + $0xf0] sm:$0xff] %v3416_v30  ;;  %v3379_v10 = vmul.f32 0.6931472, %v4673_v34 }
 0x34e   : > { %v3385_v50 = vsel %vm3384_vm15, %v3382_v24, %v3379_v10 }
 0x34f   : > { %v3417_v38 = vadd.f32 %v3385_v50, %v2969_v2 }
 0x351   : > { %3449 = vst [vmem:[%s6091_s22 + $0xf8] sm:$0xff] %v3417_v38 }
 0x352   : > { %4767 = shalt.err (!%p4764_p10)
}
 0x353   : > { %s4768_s28 = scalar_lea.hbm %s6621_s9, 4096  ;;  %s4772_s7 = scalar_lea.hbm %s6675_s3, 8192 }
 0x354   : > { %p4769_p3 = scmp.ne.s32.totalorder %s6621_s9, %s4768_s28  ;;  %p4773_p12 = scmp.lt.s32.totalorder %s6621_s9, %s6675_s3 }
 0x355   : > { %p4774_p7 = scmp.lt.s32.totalorder %s4772_s7, %s4768_s28 }
 0x356   : > { %p4770_p1 = pnand %p4769_p3, %p4965_p13 }
 0x357   : > { %p4775_p9 = por %p4774_p7, %p4773_p12 }
 0x358   : > { %p4771_p6 = pneg %p4770_p1 }
 0x35a   : > { %p4776_p4 = pnand %p4775_p9, %p4771_p6 }
 0x35c   : > { %4779 = shalt.err (!%p4776_p4)
}
 0x35d   : > { %s4848_s22 = smov 128   ;;  %s4849_s24 = smov 8  }
 0x35e   : > { %4371 = dma.vmem_to_hbm [thread:$0]  (%p4965_p13), %s6623_s29, 4096, %s6621_s9, %s3451_s15, %s4848_s22, %s4848_s22, %s4849_s24  }
 0x35f PF: > { %s3481_s6 = sand.u32 1, %s4818_s12   ;;  %p6722_p8 = scmp.ne.s32.totalorder %s6681_s23, 0 }
 0x360   : > { %p6723_p0 = scmp.ge.s32.totalorder %s4838_s17, 2  ;;  %s3482_s8 = scalar_lea.sflag [#allocation4], %s3481_s6 }
 0x362   : > { %p4385_p11 = pnand %p6723_p0, %p6722_p8 }
 0x364   : > { %p4386_p2 = pneg %p4385_p11 }
 0x366   : > { %4813 = dma.done.wait (%p4386_p2), %s3482_s8, 4096  }
 0x367   : > { %4815 = vsyncadd (%p4386_p2), %s3482_s8, 4294963200  ;;  %s20_s17 = sadd.s32 1, %s4838_s17   ;;  %s6724_s12 = smov %s4822_s13 }
 0x368   : > { %p17_p5 = scmp.ge.s32.totalorder %s20_s17, 4   ;;  %s6725_s13 = smov %s4826_s14 }
 0x369   : > { %s6726_s14 = smov %s4977_s30  ;;  %s6727_s15 = smov %s4834_s16 }
 0x36a   : > { %s6728_s16 = smov %s6730_s18  ;;  %19 = sbr.rel (!%p17_p5) target bundleno = 7 (0x7), region = 85 }
 0x36f   :  { %3487 = vsyncpa [#allocation3], 1 }
 0x370   :  { %3489 = vsyncpa [#allocation3 + $0x1], 1 }
 0x371   :  { %3490 = vsyncpa [#allocation6], 1 }
 0x372   :  { %3491 = vsyncpa [#allocation4], 1 }
 0x373   :  { %3493 = vsyncpa [#allocation4 + $0x1], 1 }

</bundles_post_ra>
